<compile_context>
chip_gen: v7x
topology: tpu7x:2x2x1
jax: 0.10.0
libtpu: 0.0.40
codegen_flags: <defaults>
</compile_context>

<pallas_src>
import jax
import jax.numpy as jnp
from jax.experimental import pallas as pl
from jax.experimental.pallas import tpu as pltpu


def _leaky_relu(v, slope=0.2):
    return jnp.where(v > 0, v, slope * v)


def discriminator_kernel(x_ref, th_ref,
                         w1x_ref, w1t_ref, b1_ref,
                         w2_ref, b2_ref,
                         w3_ref, b3_ref,
                         w4_ref, b4_ref,
                         out_ref):
    # Matmul inputs in bf16, fp32 accumulation.
    x = x_ref[...].astype(jnp.bfloat16)
    th = th_ref[...].astype(jnp.bfloat16)

    # fc1 with the concat fused: [x | theta] @ [w1_x ; w1_theta] + b1
    h1 = (jnp.dot(x, w1x_ref[...], preferred_element_type=jnp.float32)
          + jnp.dot(th, w1t_ref[...], preferred_element_type=jnp.float32)
          + b1_ref[...])
    h1 = _leaky_relu(h1).astype(jnp.bfloat16)

    h2 = jnp.dot(h1, w2_ref[...], preferred_element_type=jnp.float32) + b2_ref[...]
    h2 = _leaky_relu(h2).astype(jnp.bfloat16)

    h3 = jnp.dot(h2, w3_ref[...], preferred_element_type=jnp.float32) + b3_ref[...]
    h3 = _leaky_relu(h3)  # fp32 [TILE_B, 128]

    # fc4 (128 -> 1) on VPU/XLU: multiply by the broadcast [1,128] weight row
    # and lane-reduce; avoids an N=1 MXU matmul + drain.
    logits = jnp.sum(h3 * w4_ref[...], axis=-1, keepdims=True) + b4_ref[...]
    out_ref[...] = jax.nn.sigmoid(logits).astype(out_ref.dtype)


def discriminator_forward(theta, x, params, *, tile_b=256):
    """theta: [B, k, theta_dim], x: [B, x_dim]. Returns validity [B, 1]."""
    B = theta.shape[0]
    x_dim = x.shape[-1]
    theta_flat = theta.reshape(B, -1)               # [B, k*theta_dim]
    t_dim = theta_flat.shape[-1]

    (w1, b1), (w2, b2), (w3, b3), (w4, b4) = params

    # Split fc1 so the concat fuses into the kernel; bf16 for MXU inputs.
    w1x = w1[:x_dim].astype(jnp.bfloat16)           # [x_dim, 512]
    w1t = w1[x_dim:].astype(jnp.bfloat16)           # [k*theta_dim, 512]
    w2b = w2.astype(jnp.bfloat16)                   # [512, 256]
    w3b = w3.astype(jnp.bfloat16)                   # [256, 128]
    w4row = w4.reshape(1, -1).astype(jnp.float32)   # [1, 128] used on the VPU
    b4s = b4.reshape(1, 1).astype(jnp.float32)      # [1, 1]

    # Pad batch to a multiple of the tile.
    n_tiles = -(-B // tile_b)
    Bp = n_tiles * tile_b
    if Bp != B:
        pad = Bp - B
        x_p = jnp.pad(x, ((0, pad), (0, 0)))
        th_p = jnp.pad(theta_flat, ((0, pad), (0, 0)))
    else:
        x_p, th_p = x, theta_flat

    def batch_spec(cols):
        return pl.BlockSpec((tile_b, cols), lambda i: (i, 0))

    def const_spec(shape):
        # Weights/biases: same block every grid step -> DMA'd once, VMEM-resident.
        return pl.BlockSpec(shape, lambda i: (0, 0))

    args = (x_p, th_p, w1x, w1t, b1, w2b, b2, w3b, b3, w4row, b4s)
    in_specs = [
        batch_spec(x_dim),
        batch_spec(t_dim),
        const_spec(w1x.shape), const_spec(w1t.shape), const_spec(b1.shape),
        const_spec(w2b.shape), const_spec(b2.shape),
        const_spec(w3b.shape), const_spec(b3.shape),
        const_spec(w4row.shape), const_spec(b4s.shape),
    ]

    out = pl.pallas_call(
        discriminator_kernel,
        out_shape=jax.ShapeDtypeStruct((Bp, 1), jnp.float32),
        grid=(n_tiles,),
        in_specs=in_specs,
        # Note: 1-wide output lane -> masked store; negligible bytes here.
        out_specs=pl.BlockSpec((tile_b, 1), lambda i: (i, 0)),
        compiler_params=pltpu.CompilerParams(
            dimension_semantics=("parallel",)),
    )(*args)
    return out[:B]


def init_params(key, in_dim):
    """Deterministic init matching the nn.Linear shapes (stored transposed)."""
    dims = [in_dim, 512, 256, 128, 1]
    params = []
    for i in range(4):
        key, kw, kb = jax.random.split(key, 3)
        fan_in = dims[i]
        bound = 1.0 / jnp.sqrt(fan_in)
        w = jax.random.uniform(kw, (dims[i], dims[i + 1]),
                               minval=-bound, maxval=bound, dtype=jnp.float32)
        b = jax.random.uniform(kb, (1, dims[i + 1]),
                               minval=-bound, maxval=bound, dtype=jnp.float32)
        params.append((w, b))
    return params


def reference_forward(theta, x, params):
    """Pure-JAX fp32 reference matching the PyTorch module."""
    B = theta.shape[0]
    h = jnp.concatenate([x, theta.reshape(B, -1)], axis=-1)
    (w1, b1), (w2, b2), (w3, b3), (w4, b4) = params
    h = _leaky_relu(h @ w1 + b1)
    h = _leaky_relu(h @ w2 + b2)
    h = _leaky_relu(h @ w3 + b3)
    return jax.nn.sigmoid(h @ w4 + b4)


if __name__ == "__main__":
    # Small shapes consistent with the module's forward.
    B, x_dim, theta_dim, k = 8, 16, 4, 2
    in_dim = x_dim + k * theta_dim

    key = jax.random.PRNGKey(0)
    k_theta, k_x, k_params = jax.random.split(key, 3)

    theta = jax.random.normal(k_theta, (B, k, theta_dim), dtype=jnp.float32)
    x = jax.random.normal(k_x, (B, x_dim), dtype=jnp.float32)
    params = init_params(k_params, in_dim)

    validity = discriminator_forward(theta, x, params)
    validity = jax.block_until_ready(validity)

    ref = reference_forward(theta, x, params)
    assert validity.shape == (B, 1)
    # bf16 MXU inputs -> loosened tolerance vs. the fp32 reference.
    assert jnp.allclose(validity, ref, atol=2e-2, rtol=2e-2), (
        jnp.max(jnp.abs(validity - ref)))

    print("KERNEL_OK")
</pallas_src>

<mosaic_0001>
module attributes {stable_mosaic.version = 11 : i64} {
  func.func @discriminator_kernel(%arg0: i32, %arg1: memref<256x16xf32, #tpu.memory_space<vmem>>, %arg2: memref<256x8xf32, #tpu.memory_space<vmem>>, %arg3: memref<16x512xbf16, #tpu.memory_space<vmem>>, %arg4: memref<8x512xbf16, #tpu.memory_space<vmem>>, %arg5: memref<1x512xf32, #tpu.memory_space<vmem>>, %arg6: memref<512x256xbf16, #tpu.memory_space<vmem>>, %arg7: memref<1x256xf32, #tpu.memory_space<vmem>>, %arg8: memref<256x128xbf16, #tpu.memory_space<vmem>>, %arg9: memref<1x128xf32, #tpu.memory_space<vmem>>, %arg10: memref<1x128xf32, #tpu.memory_space<vmem>>, %arg11: memref<1x1xf32, #tpu.memory_space<vmem>>, %arg12: memref<256x1xf32, #tpu.memory_space<vmem>>) attributes {dimension_semantics = [#tpu.dimension_semantics<parallel>], iteration_bounds = array<i64: 1>, scalar_prefetch = 0 : i64, scratch_operands = 0 : i64, tpu.core_type = #tpu.core_type<tc>, window_params = [{transform_indices = @transform_0, window_bounds = array<i64: 256, 16>}, {transform_indices = @transform_1, window_bounds = array<i64: 256, 8>}, {pipeline_mode = #tpu.pipeline_mode<synchronous>, transform_indices = @transform_2, window_bounds = array<i64: 16, 512>}, {pipeline_mode = #tpu.pipeline_mode<synchronous>, transform_indices = @transform_3, window_bounds = array<i64: 8, 512>}, {pipeline_mode = #tpu.pipeline_mode<synchronous>, transform_indices = @transform_4, window_bounds = array<i64: 1, 512>}, {pipeline_mode = #tpu.pipeline_mode<synchronous>, transform_indices = @transform_5, window_bounds = array<i64: 512, 256>}, {pipeline_mode = #tpu.pipeline_mode<synchronous>, transform_indices = @transform_6, window_bounds = array<i64: 1, 256>}, {pipeline_mode = #tpu.pipeline_mode<synchronous>, transform_indices = @transform_7, window_bounds = array<i64: 256, 128>}, {pipeline_mode = #tpu.pipeline_mode<synchronous>, transform_indices = @transform_8, window_bounds = array<i64: 1, 128>}, {pipeline_mode = #tpu.pipeline_mode<synchronous>, transform_indices = @transform_9, window_bounds = array<i64: 1, 128>}, {pipeline_mode = #tpu.pipeline_mode<synchronous>, transform_indices = @transform_10, window_bounds = array<i64: 1, 1>}, {transform_indices = @transform_11, window_bounds = array<i64: 256, 1>}]} {
    %c0 = arith.constant 0 : index
    %c0_0 = arith.constant 0 : index
    %0 = vector.load %arg1[%c0, %c0_0] : memref<256x16xf32, #tpu.memory_space<vmem>>, vector<256x16xf32>
    %1 = arith.truncf %0 : vector<256x16xf32> to vector<256x16xbf16>
    %c0_1 = arith.constant 0 : index
    %c0_2 = arith.constant 0 : index
    %2 = vector.load %arg2[%c0_1, %c0_2] : memref<256x8xf32, #tpu.memory_space<vmem>>, vector<256x8xf32>
    %3 = arith.truncf %2 : vector<256x8xf32> to vector<256x8xbf16>
    %c0_3 = arith.constant 0 : index
    %c0_4 = arith.constant 0 : index
    %4 = vector.load %arg3[%c0_3, %c0_4] : memref<16x512xbf16, #tpu.memory_space<vmem>>, vector<16x512xbf16>
    %cst = arith.constant dense<0.000000e+00> : vector<256x512xf32>
    %5 = tpu.matmul %1, %4, %cst {dimension_numbers = #tpu.dot_dimension_numbers<[1], [0], [0], [1], [0, 0, 1, 1], [], []>} : vector<256x16xbf16>, vector<16x512xbf16>, vector<256x512xf32> -> vector<256x512xf32>
    %c0_5 = arith.constant 0 : index
    %c0_6 = arith.constant 0 : index
    %6 = vector.load %arg4[%c0_5, %c0_6] : memref<8x512xbf16, #tpu.memory_space<vmem>>, vector<8x512xbf16>
    %cst_7 = arith.constant dense<0.000000e+00> : vector<256x512xf32>
    %7 = tpu.matmul %3, %6, %cst_7 {dimension_numbers = #tpu.dot_dimension_numbers<[1], [0], [0], [1], [0, 0, 1, 1], [], []>} : vector<256x8xbf16>, vector<8x512xbf16>, vector<256x512xf32> -> vector<256x512xf32>
    %8 = arith.addf %5, %7 : vector<256x512xf32>
    %c0_8 = arith.constant 0 : index
    %c0_9 = arith.constant 0 : index
    %9 = vector.load %arg5[%c0_8, %c0_9] : memref<1x512xf32, #tpu.memory_space<vmem>>, vector<1x512xf32>
    %10 = vector.broadcast %9 : vector<1x512xf32> to vector<256x512xf32>
    %11 = arith.addf %8, %10 : vector<256x512xf32>
    %cst_10 = arith.constant 0.000000e+00 : f32
    %12 = vector.broadcast %cst_10 : f32 to vector<256x512xf32>
    %13 = arith.cmpf ogt, %11, %12 : vector<256x512xf32>
    %cst_11 = arith.constant 2.000000e-01 : f32
    %14 = vector.broadcast %cst_11 : f32 to vector<256x512xf32>
    %15 = arith.mulf %14, %11 : vector<256x512xf32>
    %16 = arith.select %13, %11, %15 : vector<256x512xi1>, vector<256x512xf32>
    %17 = arith.truncf %16 : vector<256x512xf32> to vector<256x512xbf16>
    %c0_12 = arith.constant 0 : index
    %c0_13 = arith.constant 0 : index
    %18 = vector.load %arg6[%c0_12, %c0_13] : memref<512x256xbf16, #tpu.memory_space<vmem>>, vector<512x256xbf16>
    %cst_14 = arith.constant dense<0.000000e+00> : vector<256x256xf32>
    %19 = tpu.matmul %17, %18, %cst_14 {dimension_numbers = #tpu.dot_dimension_numbers<[1], [0], [0], [1], [0, 0, 1, 1], [], []>} : vector<256x512xbf16>, vector<512x256xbf16>, vector<256x256xf32> -> vector<256x256xf32>
    %c0_15 = arith.constant 0 : index
    %c0_16 = arith.constant 0 : index
    %20 = vector.load %arg7[%c0_15, %c0_16] : memref<1x256xf32, #tpu.memory_space<vmem>>, vector<1x256xf32>
    %21 = vector.broadcast %20 : vector<1x256xf32> to vector<256x256xf32>
    %22 = arith.addf %19, %21 : vector<256x256xf32>
    %cst_17 = arith.constant 0.000000e+00 : f32
    %23 = vector.broadcast %cst_17 : f32 to vector<256x256xf32>
    %24 = arith.cmpf ogt, %22, %23 : vector<256x256xf32>
    %cst_18 = arith.constant 2.000000e-01 : f32
    %25 = vector.broadcast %cst_18 : f32 to vector<256x256xf32>
    %26 = arith.mulf %25, %22 : vector<256x256xf32>
    %27 = arith.select %24, %22, %26 : vector<256x256xi1>, vector<256x256xf32>
    %28 = arith.truncf %27 : vector<256x256xf32> to vector<256x256xbf16>
    %c0_19 = arith.constant 0 : index
    %c0_20 = arith.constant 0 : index
    %29 = vector.load %arg8[%c0_19, %c0_20] : memref<256x128xbf16, #tpu.memory_space<vmem>>, vector<256x128xbf16>
    %cst_21 = arith.constant dense<0.000000e+00> : vector<256x128xf32>
    %30 = tpu.matmul %28, %29, %cst_21 {dimension_numbers = #tpu.dot_dimension_numbers<[1], [0], [0], [1], [0, 0, 1, 1], [], []>} : vector<256x256xbf16>, vector<256x128xbf16>, vector<256x128xf32> -> vector<256x128xf32>
    %c0_22 = arith.constant 0 : index
    %c0_23 = arith.constant 0 : index
    %31 = vector.load %arg9[%c0_22, %c0_23] : memref<1x128xf32, #tpu.memory_space<vmem>>, vector<1x128xf32>
    %32 = vector.broadcast %31 : vector<1x128xf32> to vector<256x128xf32>
    %33 = arith.addf %30, %32 : vector<256x128xf32>
    %cst_24 = arith.constant 0.000000e+00 : f32
    %34 = vector.broadcast %cst_24 : f32 to vector<256x128xf32>
    %35 = arith.cmpf ogt, %33, %34 : vector<256x128xf32>
    %cst_25 = arith.constant 2.000000e-01 : f32
    %36 = vector.broadcast %cst_25 : f32 to vector<256x128xf32>
    %37 = arith.mulf %36, %33 : vector<256x128xf32>
    %38 = arith.select %35, %33, %37 : vector<256x128xi1>, vector<256x128xf32>
    %c0_26 = arith.constant 0 : index
    %c0_27 = arith.constant 0 : index
    %39 = vector.load %arg10[%c0_26, %c0_27] : memref<1x128xf32, #tpu.memory_space<vmem>>, vector<1x128xf32>
    %40 = vector.broadcast %39 : vector<1x128xf32> to vector<256x128xf32>
    %41 = arith.mulf %38, %40 : vector<256x128xf32>
    %cst_28 = arith.constant dense<0.000000e+00> : vector<256xf32>
    %42 = vector.multi_reduction <add>, %41, %cst_28 [1] : vector<256x128xf32> to vector<256xf32>
    %43 = vector.shape_cast %42 : vector<256xf32> to vector<256x1xf32>
    %c0_29 = arith.constant 0 : index
    %c0_30 = arith.constant 0 : index
    %44 = vector.load %arg11[%c0_29, %c0_30] : memref<1x1xf32, #tpu.memory_space<vmem>>, vector<1x1xf32>
    %45 = vector.broadcast %44 : vector<1x1xf32> to vector<256x1xf32>
    %46 = arith.addf %43, %45 : vector<256x1xf32>
    %47 = arith.negf %46 : vector<256x1xf32>
    %48 = math.exp %47 : vector<256x1xf32>
    %cst_31 = arith.constant 1.000000e+00 : f32
    %49 = vector.broadcast %cst_31 : f32 to vector<256x1xf32>
    %50 = arith.addf %49, %48 : vector<256x1xf32>
    %51 = arith.divf %49, %50 : vector<256x1xf32>
    %c0_32 = arith.constant 0 : index
    %c0_33 = arith.constant 0 : index
    %52 = vector.load %arg12[%c0_32, %c0_33] : memref<256x1xf32, #tpu.memory_space<vmem>>, vector<256x1xf32>
    tpu.vector_store %arg12[%c0_32, %c0_33], %51 {strides = array<i32>} : memref<256x1xf32, #tpu.memory_space<vmem>>, vector<256x1xf32>,
    return
  }
  func.func @transform_0(%arg0: i32) -> (i32, i32) {
    %c0_i32 = arith.constant 0 : i32
    %c0_i32_0 = arith.constant 0 : i32
    return %arg0, %c0_i32 : i32, i32
  }
  func.func @transform_1(%arg0: i32) -> (i32, i32) {
    %c0_i32 = arith.constant 0 : i32
    %c0_i32_0 = arith.constant 0 : i32
    return %arg0, %c0_i32 : i32, i32
  }
  func.func @transform_2(%arg0: i32) -> (i32, i32) {
    %c0_i32 = arith.constant 0 : i32
    %c0_i32_0 = arith.constant 0 : i32
    %c0_i32_1 = arith.constant 0 : i32
    return %c0_i32, %c0_i32_0 : i32, i32
  }
  func.func @transform_3(%arg0: i32) -> (i32, i32) {
    %c0_i32 = arith.constant 0 : i32
    %c0_i32_0 = arith.constant 0 : i32
    %c0_i32_1 = arith.constant 0 : i32
    return %c0_i32, %c0_i32_0 : i32, i32
  }
  func.func @transform_4(%arg0: i32) -> (i32, i32) {
    %c0_i32 = arith.constant 0 : i32
    %c0_i32_0 = arith.constant 0 : i32
    %c0_i32_1 = arith.constant 0 : i32
    return %c0_i32, %c0_i32_0 : i32, i32
  }
  func.func @transform_5(%arg0: i32) -> (i32, i32) {
    %c0_i32 = arith.constant 0 : i32
    %c0_i32_0 = arith.constant 0 : i32
    %c0_i32_1 = arith.constant 0 : i32
    return %c0_i32, %c0_i32_0 : i32, i32
  }
  func.func @transform_6(%arg0: i32) -> (i32, i32) {
    %c0_i32 = arith.constant 0 : i32
    %c0_i32_0 = arith.constant 0 : i32
    %c0_i32_1 = arith.constant 0 : i32
    return %c0_i32, %c0_i32_0 : i32, i32
  }
  func.func @transform_7(%arg0: i32) -> (i32, i32) {
    %c0_i32 = arith.constant 0 : i32
    %c0_i32_0 = arith.constant 0 : i32
    %c0_i32_1 = arith.constant 0 : i32
    return %c0_i32, %c0_i32_0 : i32, i32
  }
  func.func @transform_8(%arg0: i32) -> (i32, i32) {
    %c0_i32 = arith.constant 0 : i32
    %c0_i32_0 = arith.constant 0 : i32
    %c0_i32_1 = arith.constant 0 : i32
    return %c0_i32, %c0_i32_0 : i32, i32
  }
  func.func @transform_9(%arg0: i32) -> (i32, i32) {
    %c0_i32 = arith.constant 0 : i32
    %c0_i32_0 = arith.constant 0 : i32
    %c0_i32_1 = arith.constant 0 : i32
    return %c0_i32, %c0_i32_0 : i32, i32
  }
  func.func @transform_10(%arg0: i32) -> (i32, i32) {
    %c0_i32 = arith.constant 0 : i32
    %c0_i32_0 = arith.constant 0 : i32
    %c0_i32_1 = arith.constant 0 : i32
    return %c0_i32, %c0_i32_0 : i32, i32
  }
  func.func @transform_11(%arg0: i32) -> (i32, i32) {
    %c0_i32 = arith.constant 0 : i32
    %c0_i32_0 = arith.constant 0 : i32
    return %arg0, %c0_i32 : i32, i32
  }
}

</mosaic_0001>

<bundles_post_ra>
// kernel: tpu_custom_call.1
= control target key start
LH: loop header
LB: loop body
LE: loop exit
PB: predicated region body
PF: predicated region fallthrough
CT: control target
= control target key end

     0   :  { %s5580_s0 = inlined_call_operand.vmem [shape: f32[256,16], index: 0, kind: input, shape index: {}]   ;;  %s5581_s1 = inlined_call_operand.vmem [shape: f32[256,8], index: 1, kind: input, shape index: {}]   ;;  %s5582_s2 = inlined_call_operand.vmem [shape: bf16[16,512], index: 2, kind: input, shape index: {}]   ;;  %s5583_s3 = inlined_call_operand.vmem [shape: bf16[8,512], index: 3, kind: input, shape index: {}]   ;;  %s5584_s4 = inlined_call_operand.vmem [shape: f32[1,512], index: 4, kind: input, shape index: {}]   ;;  %s5585_s5 = inlined_call_operand.vmem [shape: bf16[512,256], index: 5, kind: input, shape index: {}]   ;;  %s5586_s6 = inlined_call_operand.vmem [shape: f32[1,256], index: 6, kind: input, shape index: {}]   ;;  %s5587_s7 = inlined_call_operand.hbm [shape: bf16[256,128], index: 7, kind: input, shape index: {}]   ;;  %s5588_s8 = inlined_call_operand.vmem [shape: f32[1,128], index: 8, kind: input, shape index: {}]   ;;  %s5589_s9 = inlined_call_operand.vmem [shape: f32[1,128], index: 9, kind: input, shape index: {}]   ;;  %s5590_s10 = inlined_call_operand.<no memory space> [shape: f32[1,1], index: 10, kind: input, shape index: {}]   ;;  %s5591_s11 = inlined_call_operand.vmem [shape: f32[256,1], index: 11, kind: output, shape index: {}]  }
   0x1   :  { %v16_v0 = vstv %s5590_s10 }
   0x2   :  { %17 = vst [vmem:[#allocation2] sm:$0x1] %v16_v0 }
   0x3   :  { %18 = vsyncpa [#allocation4], 0  ;;  %s4275_s19 = smov [#allocation3]   ;;  %s4251_s23 = scalar_lea.hbm %s5587_s7, 2048 }
   0x4   :  { %s38_s20 = sshll.u32 %s4275_s19, 4  ;;  %p4252_p0 = scmp.ne.s32.totalorder %s5587_s7, %s4251_s23  ;;  %s39_s20 = int_to_ptr.vmem [resolvable:$true] %s38_s20 }
   0x5   :  { %p4255_p1 = scmp.lt.u32.totalorder %s4251_s23, %s5587_s7 }
   0x7   :  { %p4257_p2 = pnand %p4255_p1, %p4252_p0 }
   0x9   :  { %4260 = shalt.err (!%p4257_p2)
}
   0xa   :  { %s4261_s10 = scalar_lea.vmem %s39_s20, 2048  ;;  %p4266_p4 = scmp.lt.s32.totalorder %s39_s20, %s39_s20 }
   0xb   :  { %p4262_p3 = scmp.ne.s32.totalorder %s39_s20, %s4261_s10  ;;  %p4267_p5 = scmp.lt.s32.totalorder %s4261_s10, %s4261_s10 }
   0xd   :  { %p4268_p6 = por %p4267_p5, %p4266_p4 }
   0xf   :  { %p4269_p7 = pnand %p4268_p6, %p4262_p3 }
  0x11   :  { %4272 = shalt.err (!%p4269_p7)
}
  0x12   :  { %s4276_s28 = smov 64   ;;  %s4277_s29 = smov 4  }
  0x13   :  { %44 = dma.hbm_to_vmem [thread:$0]  %s5587_s7, 2048, %s39_s20, [#allocation4], %s4276_s28, %s4276_s28, %s4277_s29  }
  0x14   :  { %4273 = dma.done.wait [#allocation4], 2048  }
  0x15   :  { %4274 = vsyncadd [#allocation4], 4294965248  ;;  %v4278_v1 = vmov 0   ;;  %v155_v2 = vld [vmem:[%s5583_s3] sm:$0xff]  ;;  %vm216_vm0 = vcmask 1043456   ;;  %v104_v4 = vld [vmem:[%s5581_s1 + $0x8] sm:$0xff] }
  0x16   :  { %261 = vmatprep.mubr.bf16.mxu0 %v4278_v1  ;;  %341 = vmatprep.mubr.bf16.mxu1 %v4278_v1  ;;  %v103_v3 = vld [vmem:[%s5581_s1] sm:$0xff]  ;;  %v3439_v5 = vcombine.high %v155_v2, %v155_v2  ;;  %v3438_v6 = vcombine.low %v155_v2, %v155_v2  ;;  %v120_v8 = vld [vmem:[%s5581_s1 + $0x88] sm:$0xff]  ;;  %vm167_vm1 = vcmask 64512   ;;  %v105_v18 = vld [vmem:[%s5581_s1 + $0x10] sm:$0xff]  ;;  %vm635_vm2 = vcmask 130048  }
  0x17   :  { %v119_v7 = vld [vmem:[%s5581_s1 + $0x80] sm:$0xff]  ;;  %v4377_v11 = vpack.c.bf16 %v104_v4, %v103_v3  ;;  %v156_v13 = vld [vmem:[%s5583_s3 + $0x8] sm:$0xff]  ;;  %v106_v19 = vld [vmem:[%s5581_s1 + $0x18] sm:$0xff] }
  0x18   :  { %v4005_v9 = vld [vmem:[%s5582_s2 + $0x4] ss:$16 sps:$4 sm:$0xff]   ;;  %3442 = vmatprep.subr.msk.bf16.mxu0 %vm216_vm0, %v3439_v5  ;;  %3739 = vmatprep.subr.msk.bf16.mxu1 %vm216_vm0, %v3439_v5  ;;  %v218_v10 = vsel %vm216_vm0, %v3438_v6, 0  ;;  %v4379_v12 = vpack.c.bf16 %v120_v8, %v119_v7  ;;  %v4003_v14 = vld [vmem:[%s5582_s2] ss:$16 sps:$4 sm:$0xff]   ;;  %v3441_v15 = vcombine.high %v156_v13, %v156_v13  ;;  %v3440_v16 = vcombine.low %v156_v13, %v156_v13  ;;  %v122_v21 = vld [vmem:[%s5581_s1 + $0x98] sm:$0xff] }
  0x19   :  { %230 = vmatpush1.bf16.msra.mxu0 %v218_v10  ;;  %3740 = vmatpush1.bf16.msra.mxu1 %v218_v10  ;;  %v121_v20 = vld [vmem:[%s5581_s1 + $0x90] sm:$0xff]  ;;  %v4407_v22 = vpack.c.bf16 %v106_v19, %v105_v18  ;;  %v4010_v24 = vld [vmem:[%s5582_s2 + $0xc] ss:$16 sps:$4 sm:$0xff]   ;;  %v107_v25 = vld [vmem:[%s5581_s1 + $0x20] sm:$0xff] }
  0x1a   :  { %684 = vmatprep.subr.bf16.mxu0 %v4005_v9  ;;  %3459 = vmatprep.subr.msk.bf16.mxu1 %vm216_vm0, %v3441_v15  ;;  %v224_v17 = vsel %vm216_vm0, %v3440_v16, 0  ;;  %v4409_v23 = vpack.c.bf16 %v122_v21, %v121_v20  ;;  %v108_v26 = vld [vmem:[%s5581_s1 + $0x28] sm:$0xff]  ;;  %v123_v27 = vld [vmem:[%s5581_s1 + $0xa0] sm:$0xff]  ;;  %v109_v31 = vld [vmem:[%s5581_s1 + $0x30] sm:$0xff] }
  0x1b   :  { %v124_v28 = vld [vmem:[%s5581_s1 + $0xa8] sm:$0xff]  ;;  %v4432_v29 = vpack.c.bf16 %v108_v26, %v107_v25  ;;  %v110_v32 = vld [vmem:[%s5581_s1 + $0x38] sm:$0xff]  ;;  %v125_v33 = vld [vmem:[%s5581_s1 + $0xb0] sm:$0xff] }
  0x1c   :  { %3443 = vmatmul.mubr.msk.bf16.vlgmr.msra.gmra.mrb[0].mxu0 %vm167_vm1, %v4377_v11  ;;  %3451 = vmatmul.mubr.msk.bf16.vlgmr.msra.gmra.mrb[0].mxu1 %vm167_vm1, %v4379_v12  ;;  %v4434_v30 = vpack.c.bf16 %v124_v28, %v123_v27  ;;  %v126_v34 = vld [vmem:[%s5581_s1 + $0xb8] sm:$0xff]  ;;  %v4454_v35 = vpack.c.bf16 %v110_v32, %v109_v31  ;;  %v111_v37 = vld [vmem:[%s5581_s1 + $0x40] sm:$0xff]  ;;  %v112_v38 = vld [vmem:[%s5581_s1 + $0x48] sm:$0xff] }
  0x1d   :  { %685 = vmatpush1.bf16.msra.mxu0 %v4003_v14  ;;  %423 = vmatpush1.bf16.msra.mxu1 %v224_v17  ;;  %v4456_v36 = vpack.c.bf16 %v126_v34, %v125_v33  ;;  %v127_v39 = vld [vmem:[%s5581_s1 + $0xc0] sm:$0xff]  ;;  %v128_v40 = vld [vmem:[%s5581_s1 + $0xc8] sm:$0xff]  ;;  %v4476_v41 = vpack.c.bf16 %v112_v38, %v111_v37  ;;  %v113_v43 = vld [vmem:[%s5581_s1 + $0x50] sm:$0xff] }
  0x1e   :  { %271 = vmatprep.mubr.bf16.mxu0 %v4278_v1  ;;  %351 = vmatprep.mubr.bf16.mxu1 %v4278_v1  ;;  %v4478_v42 = vpack.c.bf16 %v128_v40, %v127_v39  ;;  %v114_v44 = vld [vmem:[%s5581_s1 + $0x58] sm:$0xff]  ;;  %v129_v45 = vld [vmem:[%s5581_s1 + $0xd0] sm:$0xff]  ;;  %v4013_v47 = vld [vmem:[%s5585_s5 + $0x4] ss:$8 sps:$4 sm:$0xff]  }
  0x1f   :  { %877 = vmatprep.subr.bf16.mxu1 %v4010_v24  ;;  %v130_v46 = vld [vmem:[%s5581_s1 + $0xd8] sm:$0xff]  ;;  %2064 = vmatprep.subr.bf16.mxu0 %v4013_v47  ;;  %v4501_v48 = vpack.c.bf16 %v114_v44, %v113_v43  ;;  %v115_v50 = vld [vmem:[%s5581_s1 + $0x60] sm:$0xff]  ;;  %v116_v51 = vld [vmem:[%s5581_s1 + $0x68] sm:$0xff] }
  0x20   :  { %v4503_v49 = vpack.c.bf16 %v130_v46, %v129_v45  ;;  %v131_v52 = vld [vmem:[%s5581_s1 + $0xe0] sm:$0xff]  ;;  %v132_v53 = vld [vmem:[%s5581_s1 + $0xe8] sm:$0xff]  ;;  %v4523_v54 = vpack.c.bf16 %v116_v51, %v115_v50  ;;  %v117_v56 = vld [vmem:[%s5581_s1 + $0x70] sm:$0xff] }
  0x21   :  { %v4525_v55 = vpack.c.bf16 %v132_v53, %v131_v52  ;;  %v118_v57 = vld [vmem:[%s5581_s1 + $0x78] sm:$0xff]  ;;  %v133_v58 = vld [vmem:[%s5581_s1 + $0xf0] sm:$0xff]  ;;  %v55_v62 = vld [vmem:[%s5580_s0] sm:$0xff] }
  0x22   :  { %v134_v59 = vld [vmem:[%s5581_s1 + $0xf8] sm:$0xff]  ;;  %v4545_v60 = vpack.c.bf16 %v118_v57, %v117_v56  ;;  %v56_v63 = vld [vmem:[%s5580_s0 + $0x8] sm:$0xff]  ;;  %v57_v5 = vld [vmem:[%s5580_s0 + $0x10] sm:$0xff] }
  0x23   :  { %v4547_v61 = vpack.c.bf16 %v134_v59, %v133_v58  ;;  %v4561_v0 = vpack.c.bf16 %v56_v63, %v55_v62  ;;  %v4008_v2 = vld [vmem:[%s5582_s2 + $0x8] ss:$16 sps:$4 sm:$0xff]   ;;  %v4016_v4 = vld [vmem:[%s5585_s5 + $0x14] ss:$8 sps:$4 sm:$0xff]   ;;  %v4019_v8 = vld [vmem:[%s5585_s5 + $0x24] ss:$8 sps:$4 sm:$0xff]  }
  0x24   :  { %3444 = vmatmul.mubr.msk.bf16.gmra.mrb[4].mxu0 %vm167_vm1, %v4407_v22  ;;  %3452 = vmatmul.mubr.msk.bf16.gmra.mrb[4].mxu1 %vm167_vm1, %v4409_v23  ;;  %v4011_v3 = vld [vmem:[%s5585_s5] ss:$8 sps:$4 sm:$0xff]   ;;  %v58_v6 = vld [vmem:[%s5580_s0 + $0x18] sm:$0xff]  ;;  %v4025_v16 = vld [vmem:[%s5585_s5 + $0x44] ss:$8 sps:$4 sm:$0xff]  }
  0x25   :  { %281 = vmatprep.mubr.bf16.mxu0 %v4278_v1  ;;  %361 = vmatprep.mubr.bf16.mxu1 %v4278_v1  ;;  %v4014_v7 = vld [vmem:[%s5585_s5 + $0x10] ss:$8 sps:$4 sm:$0xff]   ;;  %v4590_v9 = vpack.c.bf16 %v58_v6, %v57_v5  ;;  %v4017_v10 = vld [vmem:[%s5585_s5 + $0x20] ss:$8 sps:$4 sm:$0xff]   ;;  %v4028_v19 = vld [vmem:[%s5585_s5 + $0x54] ss:$8 sps:$4 sm:$0xff]  }
  0x26   :  { %v59_v13 = vld [vmem:[%s5580_s0 + $0x20] sm:$0xff]  ;;  %v60_v14 = vld [vmem:[%s5580_s0 + $0x28] sm:$0xff]  ;;  %v4020_v15 = vld [vmem:[%s5585_s5 + $0x30] ss:$8 sps:$4 sm:$0xff]  }
  0x27   :  { %v4616_v17 = vpack.c.bf16 %v60_v14, %v59_v13  ;;  %v4023_v18 = vld [vmem:[%s5585_s5 + $0x40] ss:$8 sps:$4 sm:$0xff]   ;;  %v61_v20 = vld [vmem:[%s5580_s0 + $0x30] sm:$0xff]  ;;  %v62_v21 = vld [vmem:[%s5580_s0 + $0x38] sm:$0xff] }
  0x28   :  { %v4031_v24 = vld [vmem:[%s5585_s5 + $0x64] ss:$8 sps:$4 sm:$0xff]   ;;  %v4642_v25 = vpack.c.bf16 %v62_v21, %v61_v20  ;;  %v4029_v26 = vld [vmem:[%s5585_s5 + $0x60] ss:$8 sps:$4 sm:$0xff]   ;;  %v4034_v27 = vld [vmem:[%s5585_s5 + $0x74] ss:$8 sps:$4 sm:$0xff]  }
  0x29   :  { %v63_v28 = vld [vmem:[%s5580_s0 + $0x40] sm:$0xff]  ;;  %v4032_v31 = vld [vmem:[%s5585_s5 + $0x70] ss:$8 sps:$4 sm:$0xff]   ;;  %v4040_v40 = vld [vmem:[%s5585_s5 + $0x94] ss:$8 sps:$4 sm:$0xff]  }
  0x2a   :  { %v4035_v33 = vld [vmem:[%s5585_s5 + $0x80] ss:$8 sps:$4 sm:$0xff]   ;;  %v4037_v34 = vld [vmem:[%s5585_s5 + $0x84] ss:$8 sps:$4 sm:$0xff]   ;;  %v66_v37 = vld [vmem:[%s5580_s0 + $0x58] sm:$0xff] }
  0x2b   :  { %v4038_v39 = vld [vmem:[%s5585_s5 + $0x90] ss:$8 sps:$4 sm:$0xff]   ;;  %v68_v43 = vld [vmem:[%s5580_s0 + $0x68] sm:$0xff]  ;;  %v4046_v52 = vld [vmem:[%s5585_s5 + $0xb4] ss:$8 sps:$4 sm:$0xff]  }
  0x2c   :  { %3445 = vmatmul.mubr.msk.bf16.gmra.mrb[8].mxu0 %vm167_vm1, %v4432_v29  ;;  %3453 = vmatmul.mubr.msk.bf16.gmra.mrb[8].mxu1 %vm167_vm1, %v4434_v30  ;;  %v4041_v45 = vld [vmem:[%s5585_s5 + $0xa0] ss:$8 sps:$4 sm:$0xff]   ;;  %v4043_v46 = vld [vmem:[%s5585_s5 + $0xa4] ss:$8 sps:$4 sm:$0xff]   ;;  %v69_v47 = vld [vmem:[%s5580_s0 + $0x70] sm:$0xff] }
  0x2d   :  { %291 = vmatprep.mubr.bf16.mxu0 %v4278_v1  ;;  %371 = vmatprep.mubr.bf16.mxu1 %v4278_v1  ;;  %v4044_v51 = vld [vmem:[%s5585_s5 + $0xb0] ss:$8 sps:$4 sm:$0xff]   ;;  %v71_v53 = vld [vmem:[%s5580_s0 + $0x80] sm:$0xff]  ;;  %v4052_v63 = vld [vmem:[%s5585_s5 + $0xd4] ss:$8 sps:$4 sm:$0xff]  }
  0x2e   :  { %v4047_v57 = vld [vmem:[%s5585_s5 + $0xc0] ss:$8 sps:$4 sm:$0xff]   ;;  %v4049_v58 = vld [vmem:[%s5585_s5 + $0xc4] ss:$8 sps:$4 sm:$0xff]   ;;  %v73_v59 = vld [vmem:[%s5580_s0 + $0x90] sm:$0xff] }
  0x2f   :  { %v4050_v62 = vld [vmem:[%s5585_s5 + $0xd0] ss:$8 sps:$4 sm:$0xff]   ;;  %v4055_v5 = vld [vmem:[%s5585_s5 + $0xe4] ss:$8 sps:$4 sm:$0xff]  }
  0x30   :  { %v77_v6 = vld [vmem:[%s5580_s0 + $0xb0] sm:$0xff]  ;;  %v86_v21 = vld [vmem:[%s5580_s0 + $0xf8] sm:$0xff] }
  0x31   :  { %v81_v14 = vld [vmem:[%s5580_s0 + $0xd0] sm:$0xff] }
  0x34   :  { %3446 = vmatmul.mubr.msk.bf16.gmra.mrb[12].mxu0 %vm167_vm1, %v4454_v35  ;;  %3454 = vmatmul.mubr.msk.bf16.gmra.mrb[12].mxu1 %vm167_vm1, %v4456_v36 }
  0x35   :  { %301 = vmatprep.mubr.bf16.mxu0 %v4278_v1  ;;  %381 = vmatprep.mubr.bf16.mxu1 %v4278_v1 }
  0x3c   :  { %3447 = vmatmul.mubr.msk.bf16.gmra.mrb[16].mxu0 %vm167_vm1, %v4476_v41  ;;  %3455 = vmatmul.mubr.msk.bf16.gmra.mrb[16].mxu1 %vm167_vm1, %v4478_v42 }
  0x3d   :  { %311 = vmatprep.mubr.bf16.mxu0 %v4278_v1  ;;  %391 = vmatprep.mubr.bf16.mxu1 %v4278_v1 }
  0x44   :  { %3448 = vmatmul.mubr.msk.bf16.gmra.mrb[20].mxu0 %vm167_vm1, %v4501_v48  ;;  %3456 = vmatmul.mubr.msk.bf16.gmra.mrb[20].mxu1 %vm167_vm1, %v4503_v49 }
  0x45   :  { %321 = vmatprep.mubr.bf16.mxu0 %v4278_v1  ;;  %401 = vmatprep.mubr.bf16.mxu1 %v4278_v1 }
  0x4c   :  { %3449 = vmatmul.mubr.msk.bf16.gmra.mrb[24].mxu0 %vm167_vm1, %v4523_v54  ;;  %3457 = vmatmul.mubr.msk.bf16.gmra.mrb[24].mxu1 %vm167_vm1, %v4525_v55 }
  0x4d   :  { %331 = vmatprep.mubr.bf16.mxu0 %v4278_v1  ;;  %411 = vmatprep.mubr.bf16.mxu1 %v4278_v1 }
  0x54   :  { %3450 = vmatmul.mubr.msk.bf16.gmra.mrb[28].mxu0 %vm167_vm1, %v4545_v60  ;;  %3458 = vmatmul.mubr.msk.bf16.gmra.mrb[28].mxu1 %vm167_vm1, %v4547_v61 }
  0x55   :  { %454 = vmatprep.mubr.bf16.mxu1 %v4278_v1  ;;  %716 = vmatprep.mubr.bf16.mxu0 %v4278_v1 }
  0x5c   :  { %3460 = vmatmul.mubr.msk.bf16.vlgmr.msra.gmra.mrb[32].mxu1 %vm167_vm1, %v4377_v11  ;;  %3480 = vmatmul.mubr.msk.bf16.vlgmr.msra.gmra.mrb[0].mxu0 %vm635_vm2, %v4561_v0  ;;  %v4022_v11 = vld [vmem:[%s5585_s5 + $0x34] ss:$8 sps:$4 sm:$0xff]  }
  0x5d   :  { %878 = vmatpush1.bf16.msra.mxu1 %v4008_v2  ;;  %464 = vmatprep.mubr.bf16.mxu1 %v4278_v1  ;;  %v75_v2 = vld [vmem:[%s5580_s0 + $0xa0] sm:$0xff] }
  0x5e   :  { %726 = vmatprep.mubr.bf16.mxu0 %v4278_v1  ;;  %2065 = vmatpush1.bf16.msra.mxu0 %v4011_v3 }
  0x5f   :  { %2066 = vmatprep.subr.bf16.mxu0 %v4016_v4  ;;  %v4053_v4 = vld [vmem:[%s5585_s5 + $0xe0] ss:$8 sps:$4 sm:$0xff]  }
  0x62   :  { %2067 = vmatpush1.bf16.msra.mxu0 %v4014_v7 }
  0x63   :  { %2068 = vmatprep.subr.bf16.mxu0 %v4019_v8  ;;  %v79_v8 = vld [vmem:[%s5580_s0 + $0xc0] sm:$0xff] }
  0x64   :  { %3461 = vmatmul.mubr.msk.bf16.gmra.mrb[36].mxu1 %vm167_vm1, %v4407_v22  ;;  %3481 = vmatmul.mubr.msk.bf16.gmra.mrb[4].mxu0 %vm635_vm2, %v4590_v9  ;;  %v4026_v22 = vld [vmem:[%s5585_s5 + $0x50] ss:$8 sps:$4 sm:$0xff]  }
  0x65   :  { %474 = vmatprep.mubr.bf16.mxu1 %v4278_v1  ;;  %736 = vmatprep.mubr.bf16.mxu0 %v4278_v1 }
  0x66   :  { %2069 = vmatpush1.bf16.msra.mxu0 %v4017_v10  ;;  %v80_v10 = vld [vmem:[%s5580_s0 + $0xc8] sm:$0xff] }
  0x67   :  { %2070 = vmatprep.subr.bf16.mxu0 %v4022_v11  ;;  %v4058_v11 = vld [vmem:[%s5585_s5 + $0xf4] ss:$8 sps:$4 sm:$0xff]   ;;  %v4825_v13 = vpack.c.bf16 %v80_v10, %v79_v8 }
  0x6a   :  { %2071 = vmatpush1.bf16.msra.mxu0 %v4020_v15  ;;  %v82_v15 = vld [vmem:[%s5580_s0 + $0xd8] sm:$0xff] }
  0x6b   :  { %2072 = vmatprep.subr.bf16.mxu0 %v4025_v16  ;;  %v4061_v16 = vld [vmem:[%s5585_s5 + $0x104] ss:$8 sps:$4 sm:$0xff]  }
  0x6c   :  { %3462 = vmatmul.mubr.msk.bf16.gmra.mrb[40].mxu1 %vm167_vm1, %v4432_v29  ;;  %3482 = vmatmul.mubr.msk.bf16.gmra.mrb[8].mxu0 %vm635_vm2, %v4616_v17  ;;  %v64_v29 = vld [vmem:[%s5580_s0 + $0x48] sm:$0xff] }
  0x6d   :  { %484 = vmatprep.mubr.bf16.mxu1 %v4278_v1  ;;  %746 = vmatprep.mubr.bf16.mxu0 %v4278_v1  ;;  %v4665_v32 = vpack.c.bf16 %v64_v29, %v63_v28 }
  0x6e   :  { %2073 = vmatpush1.bf16.msra.mxu0 %v4023_v18  ;;  %v83_v18 = vld [vmem:[%s5580_s0 + $0xe0] sm:$0xff] }
  0x6f   :  { %2074 = vmatprep.subr.bf16.mxu0 %v4028_v19  ;;  %v84_v19 = vld [vmem:[%s5580_s0 + $0xe8] sm:$0xff] }
  0x70   :  { %v4856_v20 = vpack.c.bf16 %v84_v19, %v83_v18 }
  0x72   :  { %2075 = vmatpush1.bf16.msra.mxu0 %v4026_v22 }
  0x73   :  { %2076 = vmatprep.subr.bf16.mxu0 %v4031_v24 }
  0x74   :  { %3463 = vmatmul.mubr.msk.bf16.gmra.mrb[44].mxu1 %vm167_vm1, %v4454_v35  ;;  %3483 = vmatmul.mubr.msk.bf16.gmra.mrb[12].mxu0 %vm635_vm2, %v4642_v25  ;;  %v65_v35 = vld [vmem:[%s5580_s0 + $0x50] sm:$0xff] }
  0x75   :  { %494 = vmatprep.mubr.bf16.mxu1 %v4278_v1  ;;  %756 = vmatprep.mubr.bf16.mxu0 %v4278_v1  ;;  %v4685_v38 = vpack.c.bf16 %v66_v37, %v65_v35 }
  0x76   :  { %2077 = vmatpush1.bf16.msra.mxu0 %v4029_v26 }
  0x77   :  { %2078 = vmatprep.subr.bf16.mxu0 %v4034_v27 }
  0x7a   :  { %2079 = vmatpush1.bf16.msra.mxu0 %v4032_v31 }
  0x7b   :  { %2080 = vmatprep.subr.bf16.mxu0 %v4037_v34 }
  0x7c   :  { %3464 = vmatmul.mubr.msk.bf16.gmra.mrb[48].mxu1 %vm167_vm1, %v4476_v41  ;;  %3484 = vmatmul.mubr.msk.bf16.gmra.mrb[16].mxu0 %vm635_vm2, %v4665_v32  ;;  %v67_v41 = vld [vmem:[%s5580_s0 + $0x60] sm:$0xff] }
  0x7d   :  { %504 = vmatprep.mubr.bf16.mxu1 %v4278_v1  ;;  %766 = vmatprep.mubr.bf16.mxu0 %v4278_v1  ;;  %v4705_v44 = vpack.c.bf16 %v68_v43, %v67_v41 }
  0x7e   :  { %2081 = vmatpush1.bf16.msra.mxu0 %v4035_v33 }
  0x7f   :  { %2082 = vmatprep.subr.bf16.mxu0 %v4040_v40 }
  0x82   :  { %2083 = vmatpush1.bf16.msra.mxu0 %v4038_v39 }
  0x83   :  { %2084 = vmatprep.subr.bf16.mxu0 %v4043_v46 }
  0x84   :  { %3465 = vmatmul.mubr.msk.bf16.gmra.mrb[52].mxu1 %vm167_vm1, %v4501_v48  ;;  %3485 = vmatmul.mubr.msk.bf16.gmra.mrb[20].mxu0 %vm635_vm2, %v4685_v38  ;;  %v70_v48 = vld [vmem:[%s5580_s0 + $0x78] sm:$0xff] }
  0x85   :  { %514 = vmatprep.mubr.bf16.mxu1 %v4278_v1  ;;  %776 = vmatprep.mubr.bf16.mxu0 %v4278_v1  ;;  %v4725_v50 = vpack.c.bf16 %v70_v48, %v69_v47  ;;  %v1072_v48 = vlaneseq }
  0x86   :  { %2085 = vmatpush1.bf16.msra.mxu0 %v4041_v45 }
  0x87   :  { %2086 = vmatprep.subr.bf16.mxu0 %v4046_v52  ;;  %v4962_v52 = vshrl.u32 %v1072_v48, 7 }
  0x8a   :  { %2087 = vmatpush1.bf16.msra.mxu0 %v4044_v51 }
  0x8b   :  { %2088 = vmatprep.subr.bf16.mxu0 %v4049_v58  ;;  %v4975_v58 = vld [vmem:[%s5584_s4] sm:$0xf] }
  0x8c   :  { %3466 = vmatmul.mubr.msk.bf16.gmra.mrb[56].mxu1 %vm167_vm1, %v4523_v54  ;;  %3486 = vmatmul.mubr.msk.bf16.gmra.mrb[24].mxu0 %vm635_vm2, %v4705_v44  ;;  %v72_v54 = vld [vmem:[%s5580_s0 + $0x88] sm:$0xff] }
  0x8d   :  { %524 = vmatprep.mubr.bf16.mxu1 %v4278_v1  ;;  %786 = vmatprep.mubr.bf16.mxu0 %v4278_v1  ;;  %v4745_v56 = vpack.c.bf16 %v72_v54, %v71_v53 }
  0x8e   :  { %2089 = vmatpush1.bf16.msra.mxu0 %v4047_v57 }
  0x8f   :  { %2090 = vmatprep.subr.bf16.mxu0 %v4052_v63 }
  0x92   :  { %2091 = vmatpush1.bf16.msra.mxu0 %v4050_v62 }
  0x93   :  { %2092 = vmatprep.subr.bf16.mxu0 %v4055_v5 }
  0x94   :  { %3467 = vmatmul.mubr.msk.bf16.gmra.mrb[60].mxu1 %vm167_vm1, %v4545_v60  ;;  %3487 = vmatmul.mubr.msk.bf16.gmra.mrb[28].mxu0 %vm635_vm2, %v4725_v50 }
  0x95   :  { %534 = vmatprep.mubr.bf16.mxu1 %v4278_v1  ;;  %796 = vmatprep.mubr.bf16.mxu0 %v4278_v1 }
  0x96   :  { %2093 = vmatpush1.bf16.msra.mxu0 %v4053_v4 }
  0x97   :  { %2094 = vmatprep.subr.bf16.mxu0 %v4058_v11 }
  0x9c   :  { %3468 = vmatmul.mubr.msk.bf16.gmra.mrb[64].mxu1 %vm167_vm1, %v4379_v12  ;;  %3488 = vmatmul.mubr.msk.bf16.gmra.mrb[32].mxu0 %vm635_vm2, %v4745_v56  ;;  %v74_v12 = vld [vmem:[%s5580_s0 + $0x98] sm:$0xff] }
  0x9d   :  { %544 = vmatprep.mubr.bf16.mxu1 %v4278_v1  ;;  %806 = vmatprep.mubr.bf16.mxu0 %v4278_v1  ;;  %v4765_v60 = vpack.c.bf16 %v74_v12, %v73_v59  ;;  %v1078_v59 = vsub.s32 1, %v4962_v52 }
  0x9f   :  { %v4990_v62 = vrot.slane %v4975_v58, %v1078_v59 }
  0xa4   :  { %3469 = vmatmul.mubr.msk.bf16.gmra.mrb[68].mxu1 %vm167_vm1, %v4409_v23  ;;  %3489 = vmatmul.mubr.msk.bf16.gmra.mrb[36].mxu0 %vm635_vm2, %v4765_v60  ;;  %v76_v23 = vld [vmem:[%s5580_s0 + $0xa8] sm:$0xff] }
  0xa5   :  { %554 = vmatprep.mubr.bf16.mxu1 %v4278_v1  ;;  %816 = vmatprep.mubr.bf16.mxu0 %v4278_v1  ;;  %v4785_v3 = vpack.c.bf16 %v76_v23, %v75_v2 }
  0xac   :  { %3470 = vmatmul.mubr.msk.bf16.gmra.mrb[72].mxu1 %vm167_vm1, %v4434_v30  ;;  %3490 = vmatmul.mubr.msk.bf16.gmra.mrb[40].mxu0 %vm635_vm2, %v4785_v3  ;;  %v78_v30 = vld [vmem:[%s5580_s0 + $0xb8] sm:$0xff] }
  0xad   :  { %564 = vmatprep.mubr.bf16.mxu1 %v4278_v1  ;;  %826 = vmatprep.mubr.bf16.mxu0 %v4278_v1  ;;  %v4805_v7 = vpack.c.bf16 %v78_v30, %v77_v6 }
  0xb4   :  { %3471 = vmatmul.mubr.msk.bf16.gmra.mrb[76].mxu1 %vm167_vm1, %v4456_v36  ;;  %3491 = vmatmul.mubr.msk.bf16.gmra.mrb[44].mxu0 %vm635_vm2, %v4805_v7  ;;  %v4056_v36 = vld [vmem:[%s5585_s5 + $0xf0] ss:$8 sps:$4 sm:$0xff]  }
  0xb5   :  { %574 = vmatprep.mubr.bf16.mxu1 %v4278_v1  ;;  %836 = vmatprep.mubr.bf16.mxu0 %v4278_v1 }
  0xb6   :  { %2095 = vmatpush1.bf16.msra.mxu0 %v4056_v36 }
  0xb7   :  { %2257 = vmatprep.subr.bf16.mxu0 %v4061_v16 }
  0xbc   :  { %3472 = vmatmul.mubr.msk.bf16.gmra.mrb[80].mxu1 %vm167_vm1, %v4478_v42  ;;  %3492 = vmatmul.mubr.msk.bf16.gmra.mrb[48].mxu0 %vm635_vm2, %v4825_v13  ;;  %v4842_v42 = vpack.c.bf16 %v82_v15, %v81_v14 }
  0xbd   :  { %584 = vmatprep.mubr.bf16.mxu1 %v4278_v1  ;;  %846 = vmatprep.mubr.bf16.mxu0 %v4278_v1 }
  0xc4   :  { %3473 = vmatmul.mubr.msk.bf16.gmra.mrb[84].mxu1 %vm167_vm1, %v4503_v49  ;;  %3493 = vmatmul.mubr.msk.bf16.gmra.mrb[52].mxu0 %vm635_vm2, %v4842_v42  ;;  %v85_v49 = vld [vmem:[%s5580_s0 + $0xf0] sm:$0xff] }
  0xc5   :  { %594 = vmatprep.mubr.bf16.mxu1 %v4278_v1  ;;  %856 = vmatprep.mubr.bf16.mxu0 %v4278_v1  ;;  %v4870_v22 = vpack.c.bf16 %v86_v21, %v85_v49 }
  0xcc   :  { %3474 = vmatmul.mubr.msk.bf16.gmra.mrb[88].mxu1 %vm167_vm1, %v4525_v55  ;;  %3494 = vmatmul.mubr.msk.bf16.gmra.mrb[56].mxu0 %vm635_vm2, %v4856_v20 }
  0xcd   :  { %604 = vmatprep.mubr.bf16.mxu1 %v4278_v1  ;;  %866 = vmatprep.mubr.bf16.mxu0 %v4278_v1 }
  0xd4   :  { %3475 = vmatmul.mubr.msk.bf16.gmra.mrb[92].mxu1 %vm167_vm1, %v4547_v61  ;;  %3495 = vmatmul.mubr.msk.bf16.gmra.mrb[60].mxu0 %vm635_vm2, %v4870_v22 }
  0xd5   :  { %909 = vmatprep.mubr.bf16.mxu1 %v4278_v1 }
  0xdc   :  { %3496 = vmatmul.mubr.msk.bf16.vlgmr.msra.gmra.mrb[32].mxu1 %vm635_vm2, %v4561_v0 }
  0xdd   :  { %919 = vmatprep.mubr.bf16.mxu1 %v4278_v1 }
  0xe4   :  { %3497 = vmatmul.mubr.msk.bf16.gmra.mrb[36].mxu1 %vm635_vm2, %v4590_v9 }
  0xe5   :  { %929 = vmatprep.mubr.bf16.mxu1 %v4278_v1 }
  0xec   :  { %3498 = vmatmul.mubr.msk.bf16.gmra.mrb[40].mxu1 %vm635_vm2, %v4616_v17 }
  0xed   :  { %939 = vmatprep.mubr.bf16.mxu1 %v4278_v1 }
  0xef   :  { %v4886_v55 = vpop.f32.mrb[0].mxu1 }
  0xf0   :  { %v4888_v61 = vpop.f32.mrb[1].mxu1 }
  0xf1   :  { %v4890_v24 = vpop.f32.mrb[2].mxu1 }
  0xf2   :  { %v4892_v26 = vpop.f32.mrb[3].mxu1 }
  0xf4   :  { %3499 = vmatmul.mubr.msk.bf16.gmra.mrb[44].mxu1 %vm635_vm2, %v4642_v25 }
  0xf5   :  { %949 = vmatprep.mubr.bf16.mxu1 %v4278_v1 }
  0xf7   :  { %v4897_v0 = vpop.f32.mrb[4].mxu1 }
  0xf8   :  { %v4899_v9 = vpop.f32.mrb[5].mxu1 }
  0xf9   :  { %v4901_v17 = vpop.f32.mrb[6].mxu1 }
  0xfa   :  { %v4903_v27 = vpop.f32.mrb[7].mxu1 }
  0xfc   :  { %3500 = vmatmul.mubr.msk.bf16.gmra.mrb[48].mxu1 %vm635_vm2, %v4665_v32 }
  0xfd   :  { %959 = vmatprep.mubr.bf16.mxu1 %v4278_v1 }
  0xff   :  { %v4908_v28 = vpop.f32.mrb[8].mxu1 }
 0x100   :  { %v4910_v29 = vpop.f32.mrb[9].mxu1 }
 0x101   :  { %v4912_v25 = vpop.f32.mrb[10].mxu1 }
 0x102   :  { %v4914_v31 = vpop.f32.mrb[11].mxu1 }
 0x104   :  { %3501 = vmatmul.mubr.msk.bf16.gmra.mrb[52].mxu1 %vm635_vm2, %v4685_v38 }
 0x105   :  { %969 = vmatprep.mubr.bf16.mxu1 %v4278_v1 }
 0x107   :  { %v4919_v33 = vpop.f32.mrb[12].mxu1 }
 0x108   :  { %v4921_v34 = vpop.f32.mrb[13].mxu1 }
 0x109   :  { %v4923_v32 = vpop.f32.mrb[14].mxu1 }
 0x10a   :  { %v4925_v35 = vpop.f32.mrb[15].mxu1 }
 0x10c   :  { %3502 = vmatmul.mubr.msk.bf16.gmra.mrb[56].mxu1 %vm635_vm2, %v4705_v44 }
 0x10d   :  { %979 = vmatprep.mubr.bf16.mxu1 %v4278_v1 }
 0x10f   :  { %v4930_v37 = vpop.f32.mrb[16].mxu1 }
 0x110   :  { %v4932_v39 = vpop.f32.mrb[17].mxu1 }
 0x111   :  { %v4934_v38 = vpop.f32.mrb[18].mxu1 }
 0x112   :  { %v4936_v40 = vpop.f32.mrb[19].mxu1 }
 0x114   :  { %3503 = vmatmul.mubr.msk.bf16.gmra.mrb[60].mxu1 %vm635_vm2, %v4725_v50 }
 0x115   :  { %989 = vmatprep.mubr.bf16.mxu1 %v4278_v1 }
 0x117   :  { %v4941_v41 = vpop.f32.mrb[20].mxu1 }
 0x118   :  { %v4943_v43 = vpop.f32.mrb[21].mxu1 }
 0x119   :  { %v4945_v44 = vpop.f32.mrb[22].mxu1 }
 0x11a   :  { %v4947_v45 = vpop.f32.mrb[23].mxu1 }
 0x11c   :  { %3504 = vmatmul.mubr.msk.bf16.gmra.mrb[64].mxu1 %vm635_vm2, %v4745_v56  ;;  %v1074_v56 = vsub.s32 0, %v4962_v52 }
 0x11d   :  { %999 = vmatprep.mubr.bf16.mxu1 %v4278_v1 }
 0x11f   :  { %v4952_v46 = vpop.f32.mrb[24].mxu1 }
 0x120   :  { %v4954_v47 = vpop.f32.mrb[25].mxu1 }
 0x121   :  { %v4956_v50 = vpop.f32.mrb[26].mxu1 }
 0x122   :  { %v4958_v51 = vpop.f32.mrb[27].mxu1 }
 0x124   :  { %3505 = vmatmul.mubr.msk.bf16.gmra.mrb[68].mxu1 %vm635_vm2, %v4765_v60  ;;  %v4985_v60 = vrot.slane %v4975_v58, %v1074_v56 }
 0x125   :  { %1009 = vmatprep.mubr.bf16.mxu1 %v4278_v1 }
 0x127   :  { %v4965_v53 = vpop.f32.mrb[28].mxu1 }
 0x128   :  { %v4967_v54 = vpop.f32.mrb[29].mxu1 }
 0x129   :  { %v4970_v57 = vpop.f32.mrb[30].mxu1 }
 0x12a   :  { %v4978_v12 = vpop.f32.mrb[31].mxu1 }
 0x12c   :  { %3506 = vmatmul.mubr.msk.bf16.gmra.mrb[72].mxu1 %vm635_vm2, %v4785_v3 }
 0x12d   :  { %1019 = vmatprep.mubr.bf16.mxu1 %v4278_v1 }
 0x12f   :  { %v718_v63 = vpop.f32.mrb[0].mxu0 }
 0x130   :  { %v1092_v2 = vadd.f32 %v4985_v60, %v718_v63  ;;  %v720_v23 = vpop.f32.mrb[1].mxu0 }
 0x131   :  { %v1093_v4 = vadd.f32 %v4990_v62, %v720_v23  ;;  %v722_v5 = vpop.f32.mrb[2].mxu0  ;;  %v4059_v23 = vld [vmem:[%s5585_s5 + $0x100] ss:$8 sps:$4 sm:$0xff]  }
 0x132   :  { %v1348_v3 = vmul.f32 0.2, %v1092_v2  ;;  %v1096_v6 = vadd.f32 %v4985_v60, %v722_v5  ;;  %v724_v30 = vpop.f32.mrb[3].mxu0  ;;  %vm1220_vm3 = vcmp.gt.f32.partialorder %v1092_v2, 0.0 }
 0x133   :  { %v1349_v8 = vmul.f32 0.2, %v1093_v4  ;;  %v1097_v10 = vadd.f32 %v4990_v62, %v724_v30  ;;  %vm1221_vm4 = vcmp.gt.f32.partialorder %v1093_v4, 0.0 }
 0x134   :  { %vm1224_vm5 = vcmp.gt.f32.partialorder %v1096_v6, 0.0  ;;  %v1352_v11 = vmul.f32 0.2, %v1096_v6  ;;  %3507 = vmatmul.mubr.msk.bf16.gmra.mrb[76].mxu1 %vm635_vm2, %v4805_v7  ;;  %v1476_v14 = vsel %vm1220_vm3, %v1092_v2, %v1348_v3  ;;  %v4064_v2 = vld [vmem:[%s5585_s5 + $0x114] ss:$8 sps:$4 sm:$0xff]  }
 0x135   :  { %vm1225_vm6 = vcmp.gt.f32.partialorder %v1097_v10, 0.0  ;;  %v1353_v36 = vmul.f32 0.2, %v1097_v10  ;;  %1029 = vmatprep.mubr.bf16.mxu1 %v4278_v1  ;;  %v1477_v19 = vsel %vm1221_vm4, %v1093_v4, %v1349_v8 }
 0x136   :  { %v1480_v15 = vsel %vm1224_vm5, %v1096_v6, %v1352_v11  ;;  %v4062_v11 = vld [vmem:[%s5585_s5 + $0x110] ss:$8 sps:$4 sm:$0xff]  }
 0x137   :  { %v1604_v16 = vpack.c.bf16 %v1480_v15, %v1476_v14  ;;  %v728_v18 = vpop.f32.mrb[4].mxu0  ;;  %v1481_v49 = vsel %vm1225_vm6, %v1097_v10, %v1353_v36  ;;  %v4067_v14 = vld [vmem:[%s5585_s5 + $0x124] ss:$8 sps:$4 sm:$0xff]  }
 0x138   :  { %v1100_v21 = vadd.f32 %v4985_v60, %v728_v18  ;;  %v730_v48 = vpop.f32.mrb[5].mxu0  ;;  %v1605_v63 = vpack.c.bf16 %v1481_v49, %v1477_v19 }
 0x139   :  { %v1101_v7 = vadd.f32 %v4990_v62, %v730_v48  ;;  %v732_v5 = vpop.f32.mrb[6].mxu0 }
 0x13a   :  { %v1356_v3 = vmul.f32 0.2, %v1100_v21  ;;  %v1104_v6 = vadd.f32 %v4985_v60, %v732_v5  ;;  %v734_v4 = vpop.f32.mrb[7].mxu0  ;;  %2096 = vmatprep.mubr.bf16.mxu0 %v1605_v63  ;;  %vm1228_vm7 = vcmp.gt.f32.partialorder %v1100_v21, 0.0  ;;  %v4065_v5 = vld [vmem:[%s5585_s5 + $0x120] ss:$8 sps:$4 sm:$0xff]  }
 0x13b   :  { %v1357_v30 = vmul.f32 0.2, %v1101_v7  ;;  %v1105_v8 = vadd.f32 %v4990_v62, %v734_v4  ;;  %2097 = vmatmul.mubr.bf16.vlgmr.msra.gmra.mrb[64].mxu0 %v1604_v16  ;;  %vm1229_vm8 = vcmp.gt.f32.partialorder %v1101_v7, 0.0 }
 0x13c   :  { %vm1232_vm9 = vcmp.gt.f32.partialorder %v1104_v6, 0.0  ;;  %v1360_v10 = vmul.f32 0.2, %v1104_v6  ;;  %3508 = vmatmul.mubr.msk.bf16.gmra.mrb[80].mxu1 %vm635_vm2, %v4825_v13  ;;  %2258 = vmatpush1.bf16.msra.mxu0 %v4059_v23  ;;  %v1484_v15 = vsel %vm1228_vm7, %v1100_v21, %v1356_v3  ;;  %v4070_v21 = vld [vmem:[%s5585_s5 + $0x134] ss:$8 sps:$4 sm:$0xff]  }
 0x13d   :  { %vm1233_vm10 = vcmp.gt.f32.partialorder %v1105_v8, 0.0  ;;  %v1361_v36 = vmul.f32 0.2, %v1105_v8  ;;  %1039 = vmatprep.mubr.bf16.mxu1 %v4278_v1  ;;  %2259 = vmatprep.subr.bf16.mxu0 %v4064_v2  ;;  %v1485_v19 = vsel %vm1229_vm8, %v1101_v7, %v1357_v30 }
 0x13e   :  { %v1488_v16 = vsel %vm1232_vm9, %v1104_v6, %v1360_v10 }
 0x13f   :  { %v738_v18 = vpop.f32.mrb[8].mxu0  ;;  %v1489_v49 = vsel %vm1233_vm10, %v1105_v8, %v1361_v36  ;;  %v1608_v13 = vpack.c.bf16 %v1488_v16, %v1484_v15 }
 0x140   :  { %v1108_v48 = vadd.f32 %v4985_v60, %v738_v18  ;;  %v740_v63 = vpop.f32.mrb[9].mxu0  ;;  %v1609_v23 = vpack.c.bf16 %v1489_v49, %v1485_v19  ;;  %2260 = vmatpush1.bf16.msra.mxu0 %v4062_v11  ;;  %v4068_v11 = vld [vmem:[%s5585_s5 + $0x130] ss:$8 sps:$4 sm:$0xff]  }
 0x141   :  { %v1109_v2 = vadd.f32 %v4990_v62, %v740_v63  ;;  %v742_v4 = vpop.f32.mrb[10].mxu0  ;;  %2261 = vmatprep.subr.bf16.mxu0 %v4067_v14  ;;  %v4073_v14 = vld [vmem:[%s5585_s5 + $0x144] ss:$8 sps:$4 sm:$0xff]  }
 0x142   :  { %v1364_v7 = vmul.f32 0.2, %v1108_v48  ;;  %v1112_v3 = vadd.f32 %v4985_v60, %v742_v4  ;;  %v744_v6 = vpop.f32.mrb[11].mxu0  ;;  %2106 = vmatprep.mubr.bf16.mxu0 %v1609_v23  ;;  %vm1236_vm11 = vcmp.gt.f32.partialorder %v1108_v48, 0.0 }
 0x143   :  { %v1365_v30 = vmul.f32 0.2, %v1109_v2  ;;  %v1113_v8 = vadd.f32 %v4990_v62, %v744_v6  ;;  %2107 = vmatmul.mubr.bf16.gmra.mrb[68].mxu0 %v1608_v13  ;;  %vm1237_vm12 = vcmp.gt.f32.partialorder %v1109_v2, 0.0 }
 0x144   :  { %vm1240_vm13 = vcmp.gt.f32.partialorder %v1112_v3, 0.0  ;;  %v1368_v10 = vmul.f32 0.2, %v1112_v3  ;;  %3509 = vmatmul.mubr.msk.bf16.gmra.mrb[84].mxu1 %vm635_vm2, %v4842_v42  ;;  %2262 = vmatpush1.bf16.msra.mxu0 %v4065_v5  ;;  %v1492_v15 = vsel %vm1236_vm11, %v1108_v48, %v1364_v7  ;;  %v4071_v5 = vld [vmem:[%s5585_s5 + $0x140] ss:$8 sps:$4 sm:$0xff]  }
 0x145   :  { %vm1241_vm14 = vcmp.gt.f32.partialorder %v1113_v8, 0.0  ;;  %v1369_v36 = vmul.f32 0.2, %v1113_v8  ;;  %1049 = vmatprep.mubr.bf16.mxu1 %v4278_v1  ;;  %2263 = vmatprep.subr.bf16.mxu0 %v4070_v21  ;;  %v1493_v19 = vsel %vm1237_vm12, %v1109_v2, %v1365_v30  ;;  %v4076_v48 = vld [vmem:[%s5585_s5 + $0x154] ss:$8 sps:$4 sm:$0xff]  }
 0x146   :  { %v1496_v16 = vsel %vm1240_vm13, %v1112_v3, %v1368_v10  ;;  %v4074_v10 = vld [vmem:[%s5585_s5 + $0x150] ss:$8 sps:$4 sm:$0xff]  }
 0x147   :  { %v748_v18 = vpop.f32.mrb[12].mxu0  ;;  %v1497_v49 = vsel %vm1241_vm14, %v1113_v8, %v1369_v36  ;;  %v1612_v42 = vpack.c.bf16 %v1496_v16, %v1492_v15  ;;  %v4079_v36 = vld [vmem:[%s5585_s5 + $0x164] ss:$8 sps:$4 sm:$0xff]  }
 0x148   :  { %v1116_v13 = vadd.f32 %v4985_v60, %v748_v18  ;;  %v750_v63 = vpop.f32.mrb[13].mxu0  ;;  %v1613_v23 = vpack.c.bf16 %v1497_v49, %v1493_v19  ;;  %2264 = vmatpush1.bf16.msra.mxu0 %v4068_v11 }
 0x149   :  { %v1117_v4 = vadd.f32 %v4990_v62, %v750_v63  ;;  %v752_v21 = vpop.f32.mrb[14].mxu0  ;;  %2265 = vmatprep.subr.bf16.mxu0 %v4073_v14 }
 0x14a   :  { %v1372_v2 = vmul.f32 0.2, %v1116_v13  ;;  %v1120_v7 = vadd.f32 %v4985_v60, %v752_v21  ;;  %v754_v3 = vpop.f32.mrb[15].mxu0  ;;  %2116 = vmatprep.mubr.bf16.mxu0 %v1613_v23  ;;  %vm1244_vm15 = vcmp.gt.f32.partialorder %v1116_v13, 0.0 }
 0x14b   :  { %v1373_v6 = vmul.f32 0.2, %v1117_v4  ;;  %v1121_v30 = vadd.f32 %v4990_v62, %v754_v3  ;;  %2117 = vmatmul.mubr.bf16.gmra.mrb[72].mxu0 %v1612_v42  ;;  %vm1245_vm0 = vcmp.gt.f32.partialorder %v1117_v4, 0.0 }
 0x14c   :  { %vm1248_vm1 = vcmp.gt.f32.partialorder %v1120_v7, 0.0  ;;  %v1376_v8 = vmul.f32 0.2, %v1120_v7  ;;  %3510 = vmatmul.mubr.msk.bf16.gmra.mrb[88].mxu1 %vm635_vm2, %v4856_v20  ;;  %2266 = vmatpush1.bf16.msra.mxu0 %v4071_v5  ;;  %v1500_v14 = vsel %vm1244_vm15, %v1116_v13, %v1372_v2  ;;  %v4082_v13 = vld [vmem:[%s5585_s5 + $0x174] ss:$8 sps:$4 sm:$0xff]  }
 0x14d   :  { %vm1249_vm3 = vcmp.gt.f32.partialorder %v1121_v30, 0.0  ;;  %v1377_v11 = vmul.f32 0.2, %v1121_v30  ;;  %1059 = vmatprep.mubr.bf16.mxu1 %v4278_v1  ;;  %2267 = vmatprep.subr.bf16.mxu0 %v4076_v48  ;;  %v1501_v18 = vsel %vm1245_vm0, %v1117_v4, %v1373_v6  ;;  %v4077_v1 = vld [vmem:[%s5585_s5 + $0x160] ss:$8 sps:$4 sm:$0xff]  }
 0x14e   :  { %v1504_v15 = vsel %vm1248_vm1, %v1120_v7, %v1376_v8  ;;  %v4080_v6 = vld [vmem:[%s5585_s5 + $0x170] ss:$8 sps:$4 sm:$0xff]   ;;  %v4085_v8 = vld [vmem:[%s5585_s5 + $0x184] ss:$8 sps:$4 sm:$0xff]  }
 0x14f   :  { %v758_v16 = vpop.f32.mrb[16].mxu0  ;;  %v1505_v19 = vsel %vm1249_vm3, %v1121_v30, %v1377_v11  ;;  %v1616_v20 = vpack.c.bf16 %v1504_v15, %v1500_v14 }
 0x150   :  { %v1124_v49 = vadd.f32 %v4985_v60, %v758_v16  ;;  %v760_v42 = vpop.f32.mrb[17].mxu0  ;;  %v1617_v63 = vpack.c.bf16 %v1505_v19, %v1501_v18  ;;  %2268 = vmatpush1.bf16.msra.mxu0 %v4074_v10 }
 0x151   :  { %v1125_v23 = vadd.f32 %v4990_v62, %v760_v42  ;;  %v762_v5 = vpop.f32.mrb[18].mxu0  ;;  %2269 = vmatprep.subr.bf16.mxu0 %v4079_v36 }
 0x152   :  { %v1380_v4 = vmul.f32 0.2, %v1124_v49  ;;  %v1128_v21 = vadd.f32 %v4985_v60, %v762_v5  ;;  %v764_v48 = vpop.f32.mrb[19].mxu0  ;;  %2126 = vmatprep.mubr.bf16.mxu0 %v1617_v63  ;;  %vm1252_vm4 = vcmp.gt.f32.partialorder %v1124_v49, 0.0 }
 0x153   :  { %v1381_v2 = vmul.f32 0.2, %v1125_v23  ;;  %v1129_v7 = vadd.f32 %v4990_v62, %v764_v48  ;;  %2127 = vmatmul.mubr.bf16.gmra.mrb[76].mxu0 %v1616_v20  ;;  %vm1253_vm5 = vcmp.gt.f32.partialorder %v1125_v23, 0.0  ;;  %v4083_v20 = vld [vmem:[%s5585_s5 + $0x180] ss:$8 sps:$4 sm:$0xff]  }
 0x154   :  { %vm1256_vm6 = vcmp.gt.f32.partialorder %v1128_v21, 0.0  ;;  %v1384_v3 = vmul.f32 0.2, %v1128_v21  ;;  %3511 = vmatmul.mubr.msk.bf16.gmra.mrb[92].mxu1 %vm635_vm2, %v4870_v22  ;;  %2270 = vmatpush1.bf16.msra.mxu0 %v4077_v1  ;;  %v1508_v10 = vsel %vm1252_vm4, %v1124_v49, %v1380_v4  ;;  %v4088_v49 = vld [vmem:[%s5585_s5 + $0x194] ss:$8 sps:$4 sm:$0xff]  }
 0x155   :  { %vm1257_vm7 = vcmp.gt.f32.partialorder %v1129_v7, 0.0  ;;  %v1385_v30 = vmul.f32 0.2, %v1129_v7  ;;  %2271 = vmatprep.subr.bf16.mxu0 %v4082_v13  ;;  %v1509_v14 = vsel %vm1253_vm5, %v1125_v23, %v1381_v2  ;;  %v4086_v48 = vld [vmem:[%s5585_s5 + $0x190] ss:$8 sps:$4 sm:$0xff]  }
 0x156   :  { %v1512_v11 = vsel %vm1256_vm6, %v1128_v21, %v1384_v3 }
 0x157   :  { %v768_v36 = vpop.f32.mrb[20].mxu0  ;;  %v1513_v15 = vsel %vm1257_vm7, %v1129_v7, %v1385_v30  ;;  %v1620_v16 = vpack.c.bf16 %v1512_v11, %v1508_v10  ;;  %v4091_v7 = vld [vmem:[%s5585_s5 + $0x1a4] ss:$8 sps:$4 sm:$0xff]  }
 0x158   :  { %v1132_v22 = vadd.f32 %v4985_v60, %v768_v36  ;;  %v770_v18 = vpop.f32.mrb[21].mxu0  ;;  %v1621_v19 = vpack.c.bf16 %v1513_v15, %v1509_v14  ;;  %2272 = vmatpush1.bf16.msra.mxu0 %v4080_v6 }
 0x159   :  { %v1133_v42 = vadd.f32 %v4990_v62, %v770_v18  ;;  %v772_v63 = vpop.f32.mrb[22].mxu0  ;;  %2273 = vmatprep.subr.bf16.mxu0 %v4085_v8 }
 0x15a   :  { %v1388_v1 = vmul.f32 0.2, %v1132_v22  ;;  %v1136_v23 = vadd.f32 %v4985_v60, %v772_v63  ;;  %v774_v5 = vpop.f32.mrb[23].mxu0  ;;  %2136 = vmatprep.mubr.bf16.mxu0 %v1621_v19  ;;  %vm1260_vm2 = vcmp.gt.f32.partialorder %v1132_v22, 0.0 }
 0x15b   :  { %v1389_v13 = vmul.f32 0.2, %v1133_v42  ;;  %v1137_v4 = vadd.f32 %v4990_v62, %v774_v5  ;;  %2137 = vmatmul.mubr.bf16.gmra.mrb[80].mxu0 %v1620_v16  ;;  %vm1261_vm8 = vcmp.gt.f32.partialorder %v1133_v42, 0.0  ;;  %v4089_v16 = vld [vmem:[%s5585_s5 + $0x1a0] ss:$8 sps:$4 sm:$0xff]  }
 0x15c   :  { %vm1264_vm9 = vcmp.gt.f32.partialorder %v1136_v23, 0.0  ;;  %v1392_v21 = vmul.f32 0.2, %v1136_v23  ;;  %2274 = vmatpush1.bf16.msra.mxu0 %v4083_v20  ;;  %v1516_v3 = vsel %vm1260_vm2, %v1132_v22, %v1388_v1  ;;  %v4094_v22 = vld [vmem:[%s5585_s5 + $0x1b4] ss:$8 sps:$4 sm:$0xff]  }
 0x15d   :  { %vm1265_vm10 = vcmp.gt.f32.partialorder %v1137_v4, 0.0  ;;  %v1393_v2 = vmul.f32 0.2, %v1137_v4  ;;  %2275 = vmatprep.subr.bf16.mxu0 %v4088_v49  ;;  %v1517_v8 = vsel %vm1261_vm8, %v1133_v42, %v1389_v13  ;;  %v4092_v5 = vld [vmem:[%s5585_s5 + $0x1b0] ss:$8 sps:$4 sm:$0xff]  }
 0x15e   :  { %v1520_v6 = vsel %vm1264_vm9, %v1136_v23, %v1392_v21 }
 0x15f   :  { %v778_v30 = vpop.f32.mrb[24].mxu0  ;;  %v1521_v10 = vsel %vm1265_vm10, %v1137_v4, %v1393_v2  ;;  %v1624_v11 = vpack.c.bf16 %v1520_v6, %v1516_v3  ;;  %v4097_v4 = vld [vmem:[%s5585_s5 + $0x1c4] ss:$8 sps:$4 sm:$0xff]  }
 0x160   :  { %v1140_v36 = vadd.f32 %v4985_v60, %v778_v30  ;;  %v780_v14 = vpop.f32.mrb[25].mxu0  ;;  %v1625_v15 = vpack.c.bf16 %v1521_v10, %v1517_v8  ;;  %2276 = vmatpush1.bf16.msra.mxu0 %v4086_v48 }
 0x161   :  { %v1141_v18 = vadd.f32 %v4990_v62, %v780_v14  ;;  %v782_v19 = vpop.f32.mrb[26].mxu0  ;;  %2277 = vmatprep.subr.bf16.mxu0 %v4091_v7 }
 0x162   :  { %v1396_v20 = vmul.f32 0.2, %v1140_v36  ;;  %v1144_v42 = vadd.f32 %v4985_v60, %v782_v19  ;;  %v784_v63 = vpop.f32.mrb[27].mxu0  ;;  %2146 = vmatprep.mubr.bf16.mxu0 %v1625_v15  ;;  %vm1268_vm11 = vcmp.gt.f32.partialorder %v1140_v36, 0.0 }
 0x163   :  { %v1397_v49 = vmul.f32 0.2, %v1141_v18  ;;  %v1145_v1 = vadd.f32 %v4990_v62, %v784_v63  ;;  %2147 = vmatmul.mubr.bf16.gmra.mrb[84].mxu0 %v1624_v11  ;;  %vm1269_vm12 = vcmp.gt.f32.partialorder %v1141_v18, 0.0  ;;  %v4095_v11 = vld [vmem:[%s5585_s5 + $0x1c0] ss:$8 sps:$4 sm:$0xff]  }
 0x164   :  { %vm1272_vm13 = vcmp.gt.f32.partialorder %v1144_v42, 0.0  ;;  %v1400_v23 = vmul.f32 0.2, %v1144_v42  ;;  %2278 = vmatpush1.bf16.msra.mxu0 %v4089_v16  ;;  %v1524_v21 = vsel %vm1268_vm11, %v1140_v36, %v1396_v20  ;;  %v4100_v36 = vld [vmem:[%s5585_s5 + $0x1d4] ss:$8 sps:$4 sm:$0xff]  }
 0x165   :  { %vm1273_vm14 = vcmp.gt.f32.partialorder %v1145_v1, 0.0  ;;  %v1401_v13 = vmul.f32 0.2, %v1145_v1  ;;  %2279 = vmatprep.subr.bf16.mxu0 %v4094_v22  ;;  %v1525_v7 = vsel %vm1269_vm12, %v1141_v18, %v1397_v49  ;;  %v4098_v63 = vld [vmem:[%s5585_s5 + $0x1d0] ss:$8 sps:$4 sm:$0xff]  }
 0x166   :  { %v1528_v48 = vsel %vm1272_vm13, %v1144_v42, %v1400_v23 }
 0x167   :  { %v788_v2 = vpop.f32.mrb[28].mxu0  ;;  %v1529_v3 = vsel %vm1273_vm14, %v1145_v1, %v1401_v13  ;;  %v1628_v6 = vpack.c.bf16 %v1528_v48, %v1524_v21  ;;  %v4103_v1 = vld [vmem:[%s5585_s5 + $0x1e4] ss:$8 sps:$4 sm:$0xff]  }
 0x168   :  { %v1148_v30 = vadd.f32 %v4985_v60, %v788_v2  ;;  %v790_v8 = vpop.f32.mrb[29].mxu0  ;;  %v1629_v10 = vpack.c.bf16 %v1529_v3, %v1525_v7  ;;  %2280 = vmatpush1.bf16.msra.mxu0 %v4092_v5 }
 0x169   :  { %v1149_v14 = vadd.f32 %v4990_v62, %v790_v8  ;;  %v792_v15 = vpop.f32.mrb[30].mxu0  ;;  %2281 = vmatprep.subr.bf16.mxu0 %v4097_v4 }
 0x16a   :  { %v1404_v16 = vmul.f32 0.2, %v1148_v30  ;;  %v1152_v18 = vadd.f32 %v4985_v60, %v792_v15  ;;  %v794_v19 = vpop.f32.mrb[31].mxu0  ;;  %2156 = vmatprep.mubr.bf16.mxu0 %v1629_v10  ;;  %vm1276_vm15 = vcmp.gt.f32.partialorder %v1148_v30, 0.0 }
 0x16b   :  { %v1405_v22 = vmul.f32 0.2, %v1149_v14  ;;  %v1153_v20 = vadd.f32 %v4990_v62, %v794_v19  ;;  %2157 = vmatmul.mubr.bf16.gmra.mrb[88].mxu0 %v1628_v6  ;;  %vm1277_vm0 = vcmp.gt.f32.partialorder %v1149_v14, 0.0  ;;  %v4101_v6 = vld [vmem:[%s5585_s5 + $0x1e0] ss:$8 sps:$4 sm:$0xff]  }
 0x16c   :  { %vm1280_vm1 = vcmp.gt.f32.partialorder %v1152_v18, 0.0  ;;  %v1408_v42 = vmul.f32 0.2, %v1152_v18  ;;  %2282 = vmatpush1.bf16.msra.mxu0 %v4095_v11  ;;  %v1532_v23 = vsel %vm1276_vm15, %v1148_v30, %v1404_v16  ;;  %v4106_v30 = vld [vmem:[%s5585_s5 + $0x1f4] ss:$8 sps:$4 sm:$0xff]  }
 0x16d   :  { %vm1281_vm3 = vcmp.gt.f32.partialorder %v1153_v20, 0.0  ;;  %v1409_v49 = vmul.f32 0.2, %v1153_v20  ;;  %2283 = vmatprep.subr.bf16.mxu0 %v4100_v36  ;;  %v1533_v4 = vsel %vm1277_vm0, %v1149_v14, %v1405_v22 }
 0x16e   :  { %v1536_v5 = vsel %vm1280_vm1, %v1152_v18, %v1408_v42  ;;  %v4104_v18 = vld [vmem:[%s5585_s5 + $0x1f0] ss:$8 sps:$4 sm:$0xff]  }
 0x16f   :  { %v798_v13 = vpop.f32.mrb[32].mxu0  ;;  %v1537_v21 = vsel %vm1281_vm3, %v1153_v20, %v1409_v49  ;;  %v1632_v48 = vpack.c.bf16 %v1536_v5, %v1532_v23 }
 0x170   :  { %v799_v2 = vadd.f32 %v798_v13, %v4886_v55  ;;  %v800_v7 = vpop.f32.mrb[33].mxu0  ;;  %v1633_v3 = vpack.c.bf16 %v1537_v21, %v1533_v4  ;;  %2284 = vmatpush1.bf16.msra.mxu0 %v4098_v63 }
 0x171   :  { %v801_v8 = vadd.f32 %v800_v7, %v4888_v61  ;;  %v802_v10 = vpop.f32.mrb[34].mxu0  ;;  %2285 = vmatprep.subr.bf16.mxu0 %v4103_v1 }
 0x172   :  { %v1156_v11 = vadd.f32 %v4985_v60, %v799_v2  ;;  %v803_v14 = vadd.f32 %v802_v10, %v4890_v24  ;;  %v804_v55 = vpop.f32.mrb[35].mxu0  ;;  %2166 = vmatprep.mubr.bf16.mxu0 %v1633_v3 }
 0x173   :  { %v1157_v15 = vadd.f32 %v4990_v62, %v801_v8  ;;  %v805_v36 = vadd.f32 %v804_v55, %v4892_v26  ;;  %2167 = vmatmul.mubr.bf16.gmra.mrb[92].mxu0 %v1632_v48 }
 0x174   :  { %v1412_v16 = vmul.f32 0.2, %v1156_v11  ;;  %v1160_v61 = vadd.f32 %v4985_v60, %v803_v14  ;;  %2286 = vmatpush1.bf16.msra.mxu0 %v4101_v6  ;;  %vm1284_vm4 = vcmp.gt.f32.partialorder %v1156_v11, 0.0 }
 0x175   :  { %v1413_v19 = vmul.f32 0.2, %v1157_v15  ;;  %v1161_v22 = vadd.f32 %v4990_v62, %v805_v36  ;;  %2287 = vmatprep.subr.bf16.mxu0 %v4106_v30  ;;  %vm1285_vm5 = vcmp.gt.f32.partialorder %v1157_v15, 0.0 }
 0x176   :  { %vm1288_vm6 = vcmp.gt.f32.partialorder %v1160_v61, 0.0  ;;  %v1416_v24 = vmul.f32 0.2, %v1160_v61  ;;  %v1540_v49 = vsel %vm1284_vm4, %v1156_v11, %v1412_v16 }
 0x177   :  { %vm1289_vm7 = vcmp.gt.f32.partialorder %v1161_v22, 0.0  ;;  %v1417_v20 = vmul.f32 0.2, %v1161_v22  ;;  %v808_v26 = vpop.f32.mrb[36].mxu0  ;;  %v1541_v13 = vsel %vm1285_vm5, %v1157_v15, %v1413_v19 }
 0x178   :  { %v809_v42 = vadd.f32 %v808_v26, %v4897_v0  ;;  %v810_v63 = vpop.f32.mrb[37].mxu0  ;;  %v1544_v1 = vsel %vm1288_vm6, %v1160_v61, %v1416_v24  ;;  %2288 = vmatpush1.bf16.msra.mxu0 %v4104_v18 }
 0x179   :  { %v811_v23 = vadd.f32 %v810_v63, %v4899_v9  ;;  %v812_v5 = vpop.f32.mrb[38].mxu0  ;;  %v1545_v4 = vsel %vm1289_vm7, %v1161_v22, %v1417_v20  ;;  %v1636_v21 = vpack.c.bf16 %v1544_v1, %v1540_v49 }
 0x17a   :  { %v1164_v48 = vadd.f32 %v4985_v60, %v809_v42  ;;  %v813_v2 = vadd.f32 %v812_v5, %v4901_v17  ;;  %v814_v7 = vpop.f32.mrb[39].mxu0  ;;  %v1637_v3 = vpack.c.bf16 %v1545_v4, %v1541_v13 }
 0x17b   :  { %v1165_v6 = vadd.f32 %v4990_v62, %v811_v23  ;;  %v815_v0 = vadd.f32 %v814_v7, %v4903_v27 }
 0x17c   :  { %v1420_v8 = vmul.f32 0.2, %v1164_v48  ;;  %v1168_v10 = vadd.f32 %v4985_v60, %v813_v2  ;;  %2176 = vmatprep.mubr.bf16.mxu0 %v1637_v3  ;;  %vm1292_vm2 = vcmp.gt.f32.partialorder %v1164_v48, 0.0 }
 0x17d   :  { %v1421_v9 = vmul.f32 0.2, %v1165_v6  ;;  %v1169_v30 = vadd.f32 %v4990_v62, %v815_v0  ;;  %2177 = vmatmul.mubr.bf16.gmra.mrb[96].mxu0 %v1636_v21  ;;  %vm1293_vm8 = vcmp.gt.f32.partialorder %v1165_v6, 0.0 }
 0x17e   :  { %vm1296_vm9 = vcmp.gt.f32.partialorder %v1168_v10, 0.0  ;;  %v1424_v11 = vmul.f32 0.2, %v1168_v10  ;;  %v1548_v36 = vsel %vm1292_vm2, %v1164_v48, %v1420_v8 }
 0x17f   :  { %vm1297_vm10 = vcmp.gt.f32.partialorder %v1169_v30, 0.0  ;;  %v1425_v17 = vmul.f32 0.2, %v1169_v30  ;;  %v818_v14 = vpop.f32.mrb[40].mxu0  ;;  %v1549_v18 = vsel %vm1293_vm8, %v1165_v6, %v1421_v9 }
 0x180   :  { %v819_v55 = vadd.f32 %v818_v14, %v4908_v28  ;;  %v820_v15 = vpop.f32.mrb[41].mxu0  ;;  %v1552_v27 = vsel %vm1296_vm9, %v1168_v10, %v1424_v11 }
 0x181   :  { %v821_v16 = vadd.f32 %v820_v15, %v4910_v29  ;;  %v822_v61 = vpop.f32.mrb[42].mxu0  ;;  %v1553_v19 = vsel %vm1297_vm10, %v1169_v30, %v1425_v17  ;;  %v1640_v22 = vpack.c.bf16 %v1552_v27, %v1548_v36 }
 0x182   :  { %v1172_v24 = vadd.f32 %v4985_v60, %v819_v55  ;;  %v823_v20 = vadd.f32 %v822_v61, %v4912_v25  ;;  %v824_v26 = vpop.f32.mrb[43].mxu0  ;;  %v1641_v42 = vpack.c.bf16 %v1553_v19, %v1549_v18 }
 0x183   :  { %v1173_v63 = vadd.f32 %v4990_v62, %v821_v16  ;;  %v825_v49 = vadd.f32 %v824_v26, %v4914_v31 }
 0x184   :  { %v1428_v28 = vmul.f32 0.2, %v1172_v24  ;;  %v1176_v1 = vadd.f32 %v4985_v60, %v823_v20  ;;  %2186 = vmatprep.mubr.bf16.mxu0 %v1641_v42  ;;  %vm1300_vm11 = vcmp.gt.f32.partialorder %v1172_v24, 0.0 }
 0x185   :  { %v1429_v29 = vmul.f32 0.2, %v1173_v63  ;;  %v1177_v23 = vadd.f32 %v4990_v62, %v825_v49  ;;  %2187 = vmatmul.mubr.bf16.gmra.mrb[100].mxu0 %v1640_v22  ;;  %vm1301_vm12 = vcmp.gt.f32.partialorder %v1173_v63, 0.0 }
 0x186   :  { %vm1304_vm13 = vcmp.gt.f32.partialorder %v1176_v1, 0.0  ;;  %v1432_v5 = vmul.f32 0.2, %v1176_v1  ;;  %v1556_v48 = vsel %vm1300_vm11, %v1172_v24, %v1428_v28 }
 0x187   :  { %vm1305_vm14 = vcmp.gt.f32.partialorder %v1177_v23, 0.0  ;;  %v1433_v25 = vmul.f32 0.2, %v1177_v23  ;;  %v828_v13 = vpop.f32.mrb[44].mxu0  ;;  %v1557_v3 = vsel %vm1301_vm12, %v1173_v63, %v1429_v29 }
 0x188   :  { %v829_v4 = vadd.f32 %v828_v13, %v4919_v33  ;;  %v830_v21 = vpop.f32.mrb[45].mxu0  ;;  %v1560_v31 = vsel %vm1304_vm13, %v1176_v1, %v1432_v5 }
 0x189   :  { %v831_v2 = vadd.f32 %v830_v21, %v4921_v34  ;;  %v832_v7 = vpop.f32.mrb[46].mxu0  ;;  %v1561_v6 = vsel %vm1305_vm14, %v1177_v23, %v1433_v25  ;;  %v1644_v0 = vpack.c.bf16 %v1560_v31, %v1556_v48 }
 0x18a   :  { %v1180_v8 = vadd.f32 %v4985_v60, %v829_v4  ;;  %v833_v10 = vadd.f32 %v832_v7, %v4923_v32  ;;  %v834_v9 = vpop.f32.mrb[47].mxu0  ;;  %v1645_v30 = vpack.c.bf16 %v1561_v6, %v1557_v3 }
 0x18b   :  { %v1181_v11 = vadd.f32 %v4990_v62, %v831_v2  ;;  %v835_v17 = vadd.f32 %v834_v9, %v4925_v35 }
 0x18c   :  { %v1436_v33 = vmul.f32 0.2, %v1180_v8  ;;  %v1184_v14 = vadd.f32 %v4985_v60, %v833_v10  ;;  %2196 = vmatprep.mubr.bf16.mxu0 %v1645_v30  ;;  %vm1308_vm15 = vcmp.gt.f32.partialorder %v1180_v8, 0.0 }
 0x18d   :  { %v1437_v34 = vmul.f32 0.2, %v1181_v11  ;;  %v1185_v55 = vadd.f32 %v4990_v62, %v835_v17  ;;  %2197 = vmatmul.mubr.bf16.gmra.mrb[104].mxu0 %v1644_v0  ;;  %vm1309_vm0 = vcmp.gt.f32.partialorder %v1181_v11, 0.0 }
 0x18e   :  { %vm1312_vm1 = vcmp.gt.f32.partialorder %v1184_v14, 0.0  ;;  %v1440_v15 = vmul.f32 0.2, %v1184_v14  ;;  %v1564_v61 = vsel %vm1308_vm15, %v1180_v8, %v1436_v33  ;;  %v4107_v33 = vld [vmem:[#allocation3 + $0x40] sm:$0xff]  }
 0x18f   :  { %vm1313_vm3 = vcmp.gt.f32.partialorder %v1185_v55, 0.0  ;;  %v1441_v32 = vmul.f32 0.2, %v1185_v55  ;;  %v838_v36 = vpop.f32.mrb[48].mxu0  ;;  %v1565_v22 = vsel %vm1309_vm0, %v1181_v11, %v1437_v34  ;;  %3627 = vmatprep.subr.bf16.mxu1 %v4107_v33 }
 0x190   :  { %v839_v27 = vadd.f32 %v838_v36, %v4930_v37  ;;  %v840_v16 = vpop.f32.mrb[49].mxu0  ;;  %v1568_v35 = vsel %vm1312_vm1, %v1184_v14, %v1440_v15  ;;  %v4108_v14 = vld [vmem:[#allocation3] sm:$0xff]  }
 0x191   :  { %v841_v18 = vadd.f32 %v840_v16, %v4932_v39  ;;  %v842_v19 = vpop.f32.mrb[50].mxu0  ;;  %v1569_v24 = vsel %vm1313_vm3, %v1185_v55, %v1441_v32  ;;  %v1648_v20 = vpack.c.bf16 %v1568_v35, %v1564_v61  ;;  %3628 = vmatpush3.bf16.msra.mxu1 %v4108_v14 }
 0x192   :  { %v1188_v26 = vadd.f32 %v4985_v60, %v839_v27  ;;  %v843_v42 = vadd.f32 %v842_v19, %v4934_v38  ;;  %v844_v63 = vpop.f32.mrb[51].mxu0  ;;  %v1649_v49 = vpack.c.bf16 %v1569_v24, %v1565_v22 }
 0x193   :  { %v1189_v28 = vadd.f32 %v4990_v62, %v841_v18  ;;  %v845_v1 = vadd.f32 %v844_v63, %v4936_v40 }
 0x194   :  { %v1444_v37 = vmul.f32 0.2, %v1188_v26  ;;  %v1192_v29 = vadd.f32 %v4985_v60, %v843_v42  ;;  %2206 = vmatprep.mubr.bf16.mxu0 %v1649_v49  ;;  %vm1316_vm4 = vcmp.gt.f32.partialorder %v1188_v26, 0.0 }
 0x195   :  { %v1445_v39 = vmul.f32 0.2, %v1189_v28  ;;  %v1193_v23 = vadd.f32 %v4990_v62, %v845_v1  ;;  %2207 = vmatmul.mubr.bf16.gmra.mrb[108].mxu0 %v1648_v20  ;;  %vm1317_vm5 = vcmp.gt.f32.partialorder %v1189_v28, 0.0 }
 0x196   :  { %vm1320_vm6 = vcmp.gt.f32.partialorder %v1192_v29, 0.0  ;;  %v1448_v5 = vmul.f32 0.2, %v1192_v29  ;;  %v1572_v21 = vsel %vm1316_vm4, %v1188_v26, %v1444_v37  ;;  %v1082_v37 = vsub.s32 2, %v4962_v52 }
 0x197   :  { %vm1321_vm7 = vcmp.gt.f32.partialorder %v1193_v23, 0.0  ;;  %v1449_v38 = vmul.f32 0.2, %v1193_v23  ;;  %v848_v25 = vpop.f32.mrb[52].mxu0  ;;  %v1573_v2 = vsel %vm1317_vm5, %v1189_v28, %v1445_v39 }
 0x198   :  { %v849_v13 = vadd.f32 %v848_v25, %v4941_v41  ;;  %v850_v4 = vpop.f32.mrb[53].mxu0  ;;  %v1576_v40 = vsel %vm1320_vm6, %v1192_v29, %v1448_v5  ;;  %v1086_v5 = vsub.s32 3, %v4962_v52 }
 0x199   :  { %v851_v48 = vadd.f32 %v850_v4, %v4943_v43  ;;  %v852_v31 = vpop.f32.mrb[54].mxu0  ;;  %v1577_v7 = vsel %vm1321_vm7, %v1193_v23, %v1449_v38  ;;  %v1652_v3 = vpack.c.bf16 %v1576_v40, %v1572_v21 }
 0x19a   :  { %v1196_v6 = vadd.f32 %v4985_v60, %v849_v13  ;;  %v853_v0 = vadd.f32 %v852_v31, %v4945_v44  ;;  %v854_v8 = vpop.f32.mrb[55].mxu0  ;;  %v1653_v10 = vpack.c.bf16 %v1577_v7, %v1573_v2 }
 0x19b   :  { %v1197_v9 = vadd.f32 %v4990_v62, %v851_v48  ;;  %v855_v30 = vadd.f32 %v854_v8, %v4947_v45 }
 0x19c   :  { %v1452_v41 = vmul.f32 0.2, %v1196_v6  ;;  %v1200_v11 = vadd.f32 %v4985_v60, %v853_v0  ;;  %2216 = vmatprep.mubr.bf16.mxu0 %v1653_v10  ;;  %vm1324_vm2 = vcmp.gt.f32.partialorder %v1196_v6, 0.0  ;;  %v4109_v10 = vld [vmem:[#allocation3 + $0x48] sm:$0xff]  }
 0x19d   :  { %v1453_v43 = vmul.f32 0.2, %v1197_v9  ;;  %v1201_v17 = vadd.f32 %v4990_v62, %v855_v30  ;;  %2217 = vmatmul.mubr.bf16.gmra.mrb[112].mxu0 %v1652_v3  ;;  %vm1325_vm8 = vcmp.gt.f32.partialorder %v1197_v9, 0.0  ;;  %3629 = vmatprep.subr.bf16.mxu1 %v4109_v10  ;;  %v4119_v10 = vld [vmem:[#allocation3 + $0x70] sm:$0xff]  }
 0x19e   :  { %vm1328_vm9 = vcmp.gt.f32.partialorder %v1200_v11, 0.0  ;;  %v1456_v44 = vmul.f32 0.2, %v1200_v11  ;;  %v1580_v32 = vsel %vm1324_vm2, %v1196_v6, %v1452_v41 }
 0x19f   :  { %vm1329_vm10 = vcmp.gt.f32.partialorder %v1201_v17, 0.0  ;;  %v1457_v34 = vmul.f32 0.2, %v1201_v17  ;;  %v858_v55 = vpop.f32.mrb[56].mxu0  ;;  %v1581_v61 = vsel %vm1325_vm8, %v1197_v9, %v1453_v43  ;;  %v4110_v9 = vld [vmem:[#allocation3 + $0x8] sm:$0xff]  }
 0x1a0   :  { %v859_v45 = vadd.f32 %v858_v55, %v4952_v46  ;;  %v860_v15 = vpop.f32.mrb[57].mxu0  ;;  %v1584_v36 = vsel %vm1328_vm9, %v1200_v11, %v1456_v44  ;;  %3630 = vmatpush3.bf16.msra.mxu1 %v4110_v9 }
 0x1a1   :  { %v861_v27 = vadd.f32 %v860_v15, %v4954_v47  ;;  %v862_v16 = vpop.f32.mrb[58].mxu0  ;;  %v1585_v35 = vsel %vm1329_vm10, %v1201_v17, %v1457_v34  ;;  %v1656_v18 = vpack.c.bf16 %v1584_v36, %v1580_v32 }
 0x1a2   :  { %v1204_v19 = vadd.f32 %v4985_v60, %v859_v45  ;;  %v863_v22 = vadd.f32 %v862_v16, %v4956_v50  ;;  %v864_v24 = vpop.f32.mrb[59].mxu0  ;;  %v1657_v20 = vpack.c.bf16 %v1585_v35, %v1581_v61  ;;  %v4111_v61 = vld [vmem:[#allocation3 + $0x50] sm:$0xff]  }
 0x1a3   :  { %v1205_v26 = vadd.f32 %v4990_v62, %v861_v27  ;;  %v865_v46 = vadd.f32 %v864_v24, %v4958_v51  ;;  %v4112_v35 = vld [vmem:[#allocation3 + $0x10] sm:$0xff]   ;;  %3631 = vmatprep.subr.bf16.mxu1 %v4111_v61 }
 0x1a4   :  { %v1460_v42 = vmul.f32 0.2, %v1204_v19  ;;  %v1208_v63 = vadd.f32 %v4985_v60, %v863_v22  ;;  %2226 = vmatprep.mubr.bf16.mxu0 %v1657_v20  ;;  %vm1332_vm11 = vcmp.gt.f32.partialorder %v1204_v19, 0.0  ;;  %3632 = vmatpush3.bf16.msra.mxu1 %v4112_v35 }
 0x1a5   :  { %v1461_v47 = vmul.f32 0.2, %v1205_v26  ;;  %v1209_v49 = vadd.f32 %v4990_v62, %v865_v46  ;;  %2227 = vmatmul.mubr.bf16.gmra.mrb[116].mxu0 %v1656_v18  ;;  %vm1333_vm12 = vcmp.gt.f32.partialorder %v1205_v26, 0.0  ;;  %v4113_v18 = vld [vmem:[#allocation3 + $0x58] sm:$0xff]  }
 0x1a6   :  { %vm1336_vm13 = vcmp.gt.f32.partialorder %v1208_v63, 0.0  ;;  %v1464_v28 = vmul.f32 0.2, %v1208_v63  ;;  %v1588_v39 = vsel %vm1332_vm11, %v1204_v19, %v1460_v42  ;;  %3633 = vmatprep.subr.bf16.mxu1 %v4113_v18 }
 0x1a7   :  { %vm1337_vm14 = vcmp.gt.f32.partialorder %v1209_v49, 0.0  ;;  %v1465_v50 = vmul.f32 0.2, %v1209_v49  ;;  %v868_v1 = vpop.f32.mrb[60].mxu0  ;;  %v1589_v13 = vsel %vm1333_vm12, %v1205_v26, %v1461_v47 }
 0x1a8   :  { %v869_v29 = vadd.f32 %v868_v1, %v4965_v53  ;;  %v870_v51 = vpop.f32.mrb[61].mxu0  ;;  %v1592_v23 = vsel %vm1336_vm13, %v1208_v63, %v1464_v28  ;;  %v4115_v1 = vld [vmem:[#allocation3 + $0x60] sm:$0xff]  }
 0x1a9   :  { %v871_v38 = vadd.f32 %v870_v51, %v4967_v54  ;;  %v872_v25 = vpop.f32.mrb[62].mxu0  ;;  %v1593_v4 = vsel %vm1337_vm14, %v1209_v49, %v1465_v50  ;;  %v1660_v21 = vpack.c.bf16 %v1592_v23, %v1588_v39  ;;  %v5198_v54 = vrot.slane %v4975_v58, %v1082_v37  ;;  %v4114_v49 = vld [vmem:[#allocation3 + $0x18] sm:$0xff]  }
 0x1aa   :  { %v1212_v40 = vadd.f32 %v4985_v60, %v869_v29  ;;  %v873_v48 = vadd.f32 %v872_v25, %v4970_v57  ;;  %v874_v31 = vpop.f32.mrb[63].mxu0  ;;  %v1661_v2 = vpack.c.bf16 %v1593_v4, %v1589_v13  ;;  %v5202_v57 = vrot.slane %v4975_v58, %v1086_v5  ;;  %3634 = vmatpush3.bf16.msra.mxu1 %v4114_v49  ;;  %v4117_v13 = vld [vmem:[#allocation3 + $0x68] sm:$0xff]  }
 0x1ab   :  { %v1213_v7 = vadd.f32 %v4990_v62, %v871_v38  ;;  %v875_v53 = vadd.f32 %v874_v31, %v4978_v12  ;;  %v4116_v38 = vld [vmem:[#allocation3 + $0x20] sm:$0xff]   ;;  %3635 = vmatprep.subr.bf16.mxu1 %v4115_v1 }
 0x1ac   :  { %v1468_v3 = vmul.f32 0.2, %v1212_v40  ;;  %v1216_v6 = vadd.f32 %v4985_v60, %v873_v48  ;;  %2236 = vmatprep.mubr.bf16.mxu0 %v1661_v2  ;;  %vm1340_vm15 = vcmp.gt.f32.partialorder %v1212_v40, 0.0 }
 0x1ad   :  { %v1469_v0 = vmul.f32 0.2, %v1213_v7  ;;  %v1217_v8 = vadd.f32 %v4990_v62, %v875_v53  ;;  %2237 = vmatmul.mubr.bf16.gmra.mrb[120].mxu0 %v1660_v21  ;;  %vm1341_vm0 = vcmp.gt.f32.partialorder %v1213_v7, 0.0 }
 0x1ae   :  { %vm1344_vm1 = vcmp.gt.f32.partialorder %v1216_v6, 0.0  ;;  %v1472_v12 = vmul.f32 0.2, %v1216_v6  ;;  %v1596_v43 = vsel %vm1340_vm15, %v1212_v40, %v1468_v3  ;;  %3636 = vmatpush3.bf16.msra.mxu1 %v4116_v38 }
 0x1af   :  { %vm1345_vm3 = vcmp.gt.f32.partialorder %v1217_v8, 0.0  ;;  %v1473_v30 = vmul.f32 0.2, %v1217_v8  ;;  %v911_v60 = vpop.f32.mrb[32].mxu1  ;;  %v1597_v33 = vsel %vm1341_vm0, %v1213_v7, %v1469_v0  ;;  %3637 = vmatprep.subr.bf16.mxu1 %v4117_v13 }
 0x1b0   :  { %v1094_v41 = vadd.f32 %v5198_v54, %v911_v60  ;;  %v913_v11 = vpop.f32.mrb[33].mxu1  ;;  %v1600_v17 = vsel %vm1344_vm1, %v1216_v6, %v1472_v12  ;;  %v4118_v6 = vld [vmem:[#allocation3 + $0x28] sm:$0xff]  }
 0x1b1   :  { %v1095_v62 = vadd.f32 %v5202_v57, %v913_v11  ;;  %v915_v58 = vpop.f32.mrb[34].mxu1  ;;  %v1601_v14 = vsel %vm1345_vm3, %v1217_v8, %v1473_v30  ;;  %v1664_v44 = vpack.c.bf16 %v1600_v17, %v1596_v43  ;;  %v4120_v43 = vld [vmem:[#allocation3 + $0x30] sm:$0xff]  }
 0x1b2   :  { %v1350_v34 = vmul.f32 0.2, %v1094_v41  ;;  %v1098_v55 = vadd.f32 %v5198_v54, %v915_v58  ;;  %v917_v45 = vpop.f32.mrb[35].mxu1  ;;  %v1665_v15 = vpack.c.bf16 %v1601_v14, %v1597_v33  ;;  %vm1222_vm4 = vcmp.gt.f32.partialorder %v1094_v41, 0.0  ;;  %3638 = vmatpush3.bf16.msra.mxu1 %v4118_v6 }
 0x1b3   :  { %v1351_v32 = vmul.f32 0.2, %v1095_v62  ;;  %v1099_v36 = vadd.f32 %v5202_v57, %v917_v45  ;;  %vm1223_vm5 = vcmp.gt.f32.partialorder %v1095_v62, 0.0  ;;  %3639 = vmatprep.subr.bf16.mxu1 %v4119_v10 }
 0x1b4   :  { %vm1226_vm6 = vcmp.gt.f32.partialorder %v1098_v55, 0.0  ;;  %v1354_v27 = vmul.f32 0.2, %v1098_v55  ;;  %2246 = vmatprep.mubr.bf16.mxu0 %v1665_v15  ;;  %v1478_v19 = vsel %vm1222_vm4, %v1094_v41, %v1350_v34 }
 0x1b5   :  { %vm1227_vm7 = vcmp.gt.f32.partialorder %v1099_v36, 0.0  ;;  %v1355_v16 = vmul.f32 0.2, %v1099_v36  ;;  %2247 = vmatmul.mubr.bf16.gmra.mrb[124].mxu0 %v1664_v44  ;;  %v1479_v26 = vsel %vm1223_vm5, %v1095_v62, %v1351_v32  ;;  %v4121_v62 = vld [vmem:[#allocation3 + $0x78] sm:$0xff]  }
 0x1b6   :  { %v1482_v22 = vsel %vm1226_vm6, %v1098_v55, %v1354_v27  ;;  %3640 = vmatpush3.bf16.msra.mxu1 %v4120_v43 }
 0x1b7   :  { %v1606_v24 = vpack.c.bf16 %v1482_v22, %v1478_v19  ;;  %v921_v20 = vpop.f32.mrb[36].mxu1  ;;  %v1483_v46 = vsel %vm1227_vm7, %v1099_v36, %v1355_v16  ;;  %v4122_v36 = vld [vmem:[#allocation3 + $0x38] sm:$0xff]   ;;  %3641 = vmatprep.subr.bf16.mxu1 %v4121_v62 }
 0x1b8   :  { %v1102_v42 = vadd.f32 %v5198_v54, %v921_v20  ;;  %v923_v63 = vpop.f32.mrb[37].mxu1  ;;  %v1607_v47 = vpack.c.bf16 %v1483_v46, %v1479_v26 }
 0x1b9   :  { %v1103_v28 = vadd.f32 %v5202_v57, %v923_v63  ;;  %v925_v50 = vpop.f32.mrb[38].mxu1 }
 0x1ba   :  { %v1358_v37 = vmul.f32 0.2, %v1102_v42  ;;  %v1106_v29 = vadd.f32 %v5198_v54, %v925_v50  ;;  %v927_v51 = vpop.f32.mrb[39].mxu1  ;;  %2289 = vmatprep.mubr.bf16.mxu0 %v1607_v47  ;;  %vm1230_vm2 = vcmp.gt.f32.partialorder %v1102_v42, 0.0  ;;  %3642 = vmatpush3.bf16.msra.mxu1 %v4122_v36 }
 0x1bb   :  { %v1359_v39 = vmul.f32 0.2, %v1103_v28  ;;  %v1107_v23 = vadd.f32 %v5202_v57, %v927_v51  ;;  %vm1231_vm8 = vcmp.gt.f32.partialorder %v1103_v28, 0.0 }
 0x1bc   :  { %vm1234_vm9 = vcmp.gt.f32.partialorder %v1106_v29, 0.0  ;;  %v1362_v5 = vmul.f32 0.2, %v1106_v29  ;;  %v1486_v4 = vsel %vm1230_vm2, %v1102_v42, %v1358_v37 }
 0x1bd   :  { %vm1235_vm10 = vcmp.gt.f32.partialorder %v1107_v23, 0.0  ;;  %v1363_v25 = vmul.f32 0.2, %v1107_v23  ;;  %2290 = vmatmul.mubr.bf16.vlgmr.msra.gmra.mrb[64].mxu0 %v1606_v24  ;;  %v1487_v48 = vsel %vm1231_vm8, %v1103_v28, %v1359_v39 }
 0x1be   :  { %v1490_v21 = vsel %vm1234_vm9, %v1106_v29, %v1362_v5 }
 0x1bf   :  { %v931_v40 = vpop.f32.mrb[40].mxu1  ;;  %v1491_v31 = vsel %vm1235_vm10, %v1107_v23, %v1363_v25  ;;  %v1610_v2 = vpack.c.bf16 %v1490_v21, %v1486_v4 }
 0x1c0   :  { %v1110_v7 = vadd.f32 %v5198_v54, %v931_v40  ;;  %v933_v53 = vpop.f32.mrb[41].mxu1  ;;  %v1611_v3 = vpack.c.bf16 %v1491_v31, %v1487_v48 }
 0x1c1   :  { %v1111_v0 = vadd.f32 %v5202_v57, %v933_v53  ;;  %v935_v8 = vpop.f32.mrb[42].mxu1 }
 0x1c2   :  { %v1366_v9 = vmul.f32 0.2, %v1110_v7  ;;  %v1114_v12 = vadd.f32 %v5198_v54, %v935_v8  ;;  %v937_v30 = vpop.f32.mrb[43].mxu1  ;;  %2299 = vmatprep.mubr.bf16.mxu0 %v1611_v3  ;;  %vm1238_vm11 = vcmp.gt.f32.partialorder %v1110_v7, 0.0 }
 0x1c3   :  { %v1367_v60 = vmul.f32 0.2, %v1111_v0  ;;  %v1115_v41 = vadd.f32 %v5202_v57, %v937_v30  ;;  %vm1239_vm12 = vcmp.gt.f32.partialorder %v1111_v0, 0.0 }
 0x1c4   :  { %vm1242_vm13 = vcmp.gt.f32.partialorder %v1114_v12, 0.0  ;;  %v1370_v11 = vmul.f32 0.2, %v1114_v12  ;;  %v1494_v58 = vsel %vm1238_vm11, %v1110_v7, %v1366_v9 }
 0x1c5   :  { %vm1243_vm14 = vcmp.gt.f32.partialorder %v1115_v41, 0.0  ;;  %v1371_v17 = vmul.f32 0.2, %v1115_v41  ;;  %2300 = vmatmul.mubr.bf16.gmra.mrb[68].mxu0 %v1610_v2  ;;  %v1495_v44 = vsel %vm1239_vm12, %v1111_v0, %v1367_v60 }
 0x1c6   :  { %v1498_v33 = vsel %vm1242_vm13, %v1114_v12, %v1370_v11 }
 0x1c7   :  { %v941_v14 = vpop.f32.mrb[44].mxu1  ;;  %v1499_v34 = vsel %vm1243_vm14, %v1115_v41, %v1371_v17  ;;  %v1614_v55 = vpack.c.bf16 %v1498_v33, %v1494_v58 }
 0x1c8   :  { %v1118_v45 = vadd.f32 %v5198_v54, %v941_v14  ;;  %v943_v15 = vpop.f32.mrb[45].mxu1  ;;  %v1615_v32 = vpack.c.bf16 %v1499_v34, %v1495_v44 }
 0x1c9   :  { %v1119_v27 = vadd.f32 %v5202_v57, %v943_v15  ;;  %v945_v16 = vpop.f32.mrb[46].mxu1 }
 0x1ca   :  { %v1374_v61 = vmul.f32 0.2, %v1118_v45  ;;  %v1122_v35 = vadd.f32 %v5198_v54, %v945_v16  ;;  %v947_v18 = vpop.f32.mrb[47].mxu1  ;;  %2309 = vmatprep.mubr.bf16.mxu0 %v1615_v32  ;;  %vm1246_vm15 = vcmp.gt.f32.partialorder %v1118_v45, 0.0 }
 0x1cb   :  { %v1375_v19 = vmul.f32 0.2, %v1119_v27  ;;  %v1123_v22 = vadd.f32 %v5202_v57, %v947_v18  ;;  %vm1247_vm0 = vcmp.gt.f32.partialorder %v1119_v27, 0.0 }
 0x1cc   :  { %vm1250_vm1 = vcmp.gt.f32.partialorder %v1122_v35, 0.0  ;;  %v1378_v24 = vmul.f32 0.2, %v1122_v35  ;;  %v1502_v26 = vsel %vm1246_vm15, %v1118_v45, %v1374_v61 }
 0x1cd   :  { %vm1251_vm3 = vcmp.gt.f32.partialorder %v1123_v22, 0.0  ;;  %v1379_v20 = vmul.f32 0.2, %v1123_v22  ;;  %2310 = vmatmul.mubr.bf16.gmra.mrb[72].mxu0 %v1614_v55  ;;  %v1503_v63 = vsel %vm1247_vm0, %v1119_v27, %v1375_v19 }
 0x1ce   :  { %v1506_v46 = vsel %vm1250_vm1, %v1122_v35, %v1378_v24 }
 0x1cf   :  { %v951_v42 = vpop.f32.mrb[48].mxu1  ;;  %v1507_v47 = vsel %vm1251_vm3, %v1123_v22, %v1379_v20  ;;  %v1618_v49 = vpack.c.bf16 %v1506_v46, %v1502_v26 }
 0x1d0   :  { %v1126_v28 = vadd.f32 %v5198_v54, %v951_v42  ;;  %v953_v50 = vpop.f32.mrb[49].mxu1  ;;  %v1619_v1 = vpack.c.bf16 %v1507_v47, %v1503_v63 }
 0x1d1   :  { %v1127_v37 = vadd.f32 %v5202_v57, %v953_v50  ;;  %v955_v29 = vpop.f32.mrb[50].mxu1 }
 0x1d2   :  { %v1382_v51 = vmul.f32 0.2, %v1126_v28  ;;  %v1130_v39 = vadd.f32 %v5198_v54, %v955_v29  ;;  %v957_v23 = vpop.f32.mrb[51].mxu1  ;;  %2319 = vmatprep.mubr.bf16.mxu0 %v1619_v1  ;;  %vm1254_vm4 = vcmp.gt.f32.partialorder %v1126_v28, 0.0 }
 0x1d3   :  { %v1383_v5 = vmul.f32 0.2, %v1127_v37  ;;  %v1131_v38 = vadd.f32 %v5202_v57, %v957_v23  ;;  %vm1255_vm5 = vcmp.gt.f32.partialorder %v1127_v37, 0.0 }
 0x1d4   :  { %vm1258_vm6 = vcmp.gt.f32.partialorder %v1130_v39, 0.0  ;;  %v1386_v25 = vmul.f32 0.2, %v1130_v39  ;;  %v1510_v4 = vsel %vm1254_vm4, %v1126_v28, %v1382_v51 }
 0x1d5   :  { %vm1259_vm7 = vcmp.gt.f32.partialorder %v1131_v38, 0.0  ;;  %v1387_v13 = vmul.f32 0.2, %v1131_v38  ;;  %2320 = vmatmul.mubr.bf16.gmra.mrb[76].mxu0 %v1618_v49  ;;  %v1511_v48 = vsel %vm1255_vm5, %v1127_v37, %v1383_v5 }
 0x1d6   :  { %v1514_v21 = vsel %vm1258_vm6, %v1130_v39, %v1386_v25 }
 0x1d7   :  { %v961_v40 = vpop.f32.mrb[52].mxu1  ;;  %v1515_v31 = vsel %vm1259_vm7, %v1131_v38, %v1387_v13  ;;  %v1622_v2 = vpack.c.bf16 %v1514_v21, %v1510_v4 }
 0x1d8   :  { %v1134_v7 = vadd.f32 %v5198_v54, %v961_v40  ;;  %v963_v53 = vpop.f32.mrb[53].mxu1  ;;  %v1623_v3 = vpack.c.bf16 %v1515_v31, %v1511_v48 }
 0x1d9   :  { %v1135_v6 = vadd.f32 %v5202_v57, %v963_v53  ;;  %v965_v0 = vpop.f32.mrb[54].mxu1 }
 0x1da   :  { %v1390_v8 = vmul.f32 0.2, %v1134_v7  ;;  %v1138_v10 = vadd.f32 %v5198_v54, %v965_v0  ;;  %v967_v9 = vpop.f32.mrb[55].mxu1  ;;  %2329 = vmatprep.mubr.bf16.mxu0 %v1623_v3  ;;  %vm1262_vm2 = vcmp.gt.f32.partialorder %v1134_v7, 0.0 }
 0x1db   :  { %v1391_v12 = vmul.f32 0.2, %v1135_v6  ;;  %v1139_v30 = vadd.f32 %v5202_v57, %v967_v9  ;;  %vm1263_vm8 = vcmp.gt.f32.partialorder %v1135_v6, 0.0 }
 0x1dc   :  { %vm1266_vm9 = vcmp.gt.f32.partialorder %v1138_v10, 0.0  ;;  %v1394_v60 = vmul.f32 0.2, %v1138_v10  ;;  %v1518_v11 = vsel %vm1262_vm2, %v1134_v7, %v1390_v8 }
 0x1dd   :  { %vm1267_vm10 = vcmp.gt.f32.partialorder %v1139_v30, 0.0  ;;  %v1395_v41 = vmul.f32 0.2, %v1139_v30  ;;  %2330 = vmatmul.mubr.bf16.gmra.mrb[80].mxu0 %v1622_v2  ;;  %v1519_v62 = vsel %vm1263_vm8, %v1135_v6, %v1391_v12 }
 0x1de   :  { %v1522_v43 = vsel %vm1266_vm9, %v1138_v10, %v1394_v60 }
 0x1df   :  { %v971_v17 = vpop.f32.mrb[56].mxu1  ;;  %v1523_v58 = vsel %vm1267_vm10, %v1139_v30, %v1395_v41  ;;  %v1626_v33 = vpack.c.bf16 %v1522_v43, %v1518_v11 }
 0x1e0   :  { %v1142_v14 = vadd.f32 %v5198_v54, %v971_v17  ;;  %v973_v44 = vpop.f32.mrb[57].mxu1  ;;  %v1627_v34 = vpack.c.bf16 %v1523_v58, %v1519_v62 }
 0x1e1   :  { %v1143_v55 = vadd.f32 %v5202_v57, %v973_v44  ;;  %v975_v45 = vpop.f32.mrb[58].mxu1 }
 0x1e2   :  { %v1398_v15 = vmul.f32 0.2, %v1142_v14  ;;  %v1146_v32 = vadd.f32 %v5198_v54, %v975_v45  ;;  %v977_v36 = vpop.f32.mrb[59].mxu1  ;;  %2339 = vmatprep.mubr.bf16.mxu0 %v1627_v34  ;;  %vm1270_vm11 = vcmp.gt.f32.partialorder %v1142_v14, 0.0 }
 0x1e3   :  { %v1399_v27 = vmul.f32 0.2, %v1143_v55  ;;  %v1147_v16 = vadd.f32 %v5202_v57, %v977_v36  ;;  %vm1271_vm12 = vcmp.gt.f32.partialorder %v1143_v55, 0.0 }
 0x1e4   :  { %vm1274_vm13 = vcmp.gt.f32.partialorder %v1146_v32, 0.0  ;;  %v1402_v61 = vmul.f32 0.2, %v1146_v32  ;;  %v1526_v18 = vsel %vm1270_vm11, %v1142_v14, %v1398_v15 }
 0x1e5   :  { %vm1275_vm14 = vcmp.gt.f32.partialorder %v1147_v16, 0.0  ;;  %v1403_v35 = vmul.f32 0.2, %v1147_v16  ;;  %2340 = vmatmul.mubr.bf16.gmra.mrb[84].mxu0 %v1626_v33  ;;  %v1527_v24 = vsel %vm1271_vm12, %v1143_v55, %v1399_v27 }
 0x1e6   :  { %v1530_v19 = vsel %vm1274_vm13, %v1146_v32, %v1402_v61 }
 0x1e7   :  { %v981_v22 = vpop.f32.mrb[60].mxu1  ;;  %v1531_v20 = vsel %vm1275_vm14, %v1147_v16, %v1403_v35  ;;  %v1630_v26 = vpack.c.bf16 %v1530_v19, %v1526_v18 }
 0x1e8   :  { %v1150_v46 = vadd.f32 %v5198_v54, %v981_v22  ;;  %v983_v42 = vpop.f32.mrb[61].mxu1  ;;  %v1631_v63 = vpack.c.bf16 %v1531_v20, %v1527_v24 }
 0x1e9   :  { %v1151_v47 = vadd.f32 %v5202_v57, %v983_v42  ;;  %v985_v49 = vpop.f32.mrb[62].mxu1 }
 0x1ea   :  { %v1406_v28 = vmul.f32 0.2, %v1150_v46  ;;  %v1154_v50 = vadd.f32 %v5198_v54, %v985_v49  ;;  %v987_v1 = vpop.f32.mrb[63].mxu1  ;;  %2349 = vmatprep.mubr.bf16.mxu0 %v1631_v63  ;;  %vm1278_vm15 = vcmp.gt.f32.partialorder %v1150_v46, 0.0 }
 0x1eb   :  { %v1407_v37 = vmul.f32 0.2, %v1151_v47  ;;  %v1155_v29 = vadd.f32 %v5202_v57, %v987_v1  ;;  %vm1279_vm0 = vcmp.gt.f32.partialorder %v1151_v47, 0.0 }
 0x1ec   :  { %vm1282_vm1 = vcmp.gt.f32.partialorder %v1154_v50, 0.0  ;;  %v1410_v51 = vmul.f32 0.2, %v1154_v50  ;;  %v1534_v23 = vsel %vm1278_vm15, %v1150_v46, %v1406_v28 }
 0x1ed   :  { %vm1283_vm3 = vcmp.gt.f32.partialorder %v1155_v29, 0.0  ;;  %v1411_v39 = vmul.f32 0.2, %v1155_v29  ;;  %2350 = vmatmul.mubr.bf16.gmra.mrb[88].mxu0 %v1630_v26  ;;  %v1535_v25 = vsel %vm1279_vm0, %v1151_v47, %v1407_v37 }
 0x1ee   :  { %v1538_v5 = vsel %vm1282_vm1, %v1154_v50, %v1410_v51 }
 0x1ef   :  { %v991_v38 = vpop.f32.mrb[64].mxu1  ;;  %v1539_v13 = vsel %vm1283_vm3, %v1155_v29, %v1411_v39  ;;  %v1634_v4 = vpack.c.bf16 %v1538_v5, %v1534_v23 }
 0x1f0   :  { %v1158_v21 = vadd.f32 %v5198_v54, %v991_v38  ;;  %v993_v40 = vpop.f32.mrb[65].mxu1  ;;  %v1635_v48 = vpack.c.bf16 %v1539_v13, %v1535_v25 }
 0x1f1   :  { %v1159_v31 = vadd.f32 %v5202_v57, %v993_v40  ;;  %v995_v2 = vpop.f32.mrb[66].mxu1 }
 0x1f2   :  { %v1414_v7 = vmul.f32 0.2, %v1158_v21  ;;  %v1162_v53 = vadd.f32 %v5198_v54, %v995_v2  ;;  %v997_v3 = vpop.f32.mrb[67].mxu1  ;;  %2359 = vmatprep.mubr.bf16.mxu0 %v1635_v48  ;;  %vm1286_vm4 = vcmp.gt.f32.partialorder %v1158_v21, 0.0 }
 0x1f3   :  { %v1415_v6 = vmul.f32 0.2, %v1159_v31  ;;  %v1163_v0 = vadd.f32 %v5202_v57, %v997_v3  ;;  %vm1287_vm5 = vcmp.gt.f32.partialorder %v1159_v31, 0.0 }
 0x1f4   :  { %vm1290_vm6 = vcmp.gt.f32.partialorder %v1162_v53, 0.0  ;;  %v1418_v8 = vmul.f32 0.2, %v1162_v53  ;;  %v1542_v9 = vsel %vm1286_vm4, %v1158_v21, %v1414_v7 }
 0x1f5   :  { %vm1291_vm7 = vcmp.gt.f32.partialorder %v1163_v0, 0.0  ;;  %v1419_v10 = vmul.f32 0.2, %v1163_v0  ;;  %2360 = vmatmul.mubr.bf16.gmra.mrb[92].mxu0 %v1634_v4  ;;  %v1543_v60 = vsel %vm1287_vm5, %v1159_v31, %v1415_v6 }
 0x1f6   :  { %v1546_v12 = vsel %vm1290_vm6, %v1162_v53, %v1418_v8 }
 0x1f7   :  { %v1001_v30 = vpop.f32.mrb[68].mxu1  ;;  %v1547_v41 = vsel %vm1291_vm7, %v1163_v0, %v1419_v10  ;;  %v1638_v11 = vpack.c.bf16 %v1546_v12, %v1542_v9 }
 0x1f8   :  { %v1166_v43 = vadd.f32 %v5198_v54, %v1001_v30  ;;  %v1003_v17 = vpop.f32.mrb[69].mxu1  ;;  %v1639_v62 = vpack.c.bf16 %v1547_v41, %v1543_v60 }
 0x1f9   :  { %v1167_v58 = vadd.f32 %v5202_v57, %v1003_v17  ;;  %v1005_v33 = vpop.f32.mrb[70].mxu1 }
 0x1fa   :  { %v1422_v14 = vmul.f32 0.2, %v1166_v43  ;;  %v1170_v44 = vadd.f32 %v5198_v54, %v1005_v33  ;;  %v1007_v34 = vpop.f32.mrb[71].mxu1  ;;  %2369 = vmatprep.mubr.bf16.mxu0 %v1639_v62  ;;  %vm1294_vm2 = vcmp.gt.f32.partialorder %v1166_v43, 0.0 }
 0x1fb   :  { %v1423_v55 = vmul.f32 0.2, %v1167_v58  ;;  %v1171_v45 = vadd.f32 %v5202_v57, %v1007_v34  ;;  %vm1295_vm8 = vcmp.gt.f32.partialorder %v1167_v58, 0.0 }
 0x1fc   :  { %vm1298_vm9 = vcmp.gt.f32.partialorder %v1170_v44, 0.0  ;;  %v1426_v15 = vmul.f32 0.2, %v1170_v44  ;;  %v1550_v36 = vsel %vm1294_vm2, %v1166_v43, %v1422_v14 }
 0x1fd   :  { %vm1299_vm10 = vcmp.gt.f32.partialorder %v1171_v45, 0.0  ;;  %v1427_v32 = vmul.f32 0.2, %v1171_v45  ;;  %2370 = vmatmul.mubr.bf16.gmra.mrb[96].mxu0 %v1638_v11  ;;  %v1551_v61 = vsel %vm1295_vm8, %v1167_v58, %v1423_v55 }
 0x1fe   :  { %v1554_v27 = vsel %vm1298_vm9, %v1170_v44, %v1426_v15 }
 0x1ff   :  { %v1011_v16 = vpop.f32.mrb[72].mxu1  ;;  %v1555_v35 = vsel %vm1299_vm10, %v1171_v45, %v1427_v32  ;;  %v1642_v18 = vpack.c.bf16 %v1554_v27, %v1550_v36 }
 0x200   :  { %v1174_v19 = vadd.f32 %v5198_v54, %v1011_v16  ;;  %v1013_v22 = vpop.f32.mrb[73].mxu1  ;;  %v1643_v24 = vpack.c.bf16 %v1555_v35, %v1551_v61 }
 0x201   :  { %v1175_v20 = vadd.f32 %v5202_v57, %v1013_v22  ;;  %v1015_v26 = vpop.f32.mrb[74].mxu1 }
 0x202   :  { %v1430_v46 = vmul.f32 0.2, %v1174_v19  ;;  %v1178_v42 = vadd.f32 %v5198_v54, %v1015_v26  ;;  %v1017_v63 = vpop.f32.mrb[75].mxu1  ;;  %2379 = vmatprep.mubr.bf16.mxu0 %v1643_v24  ;;  %vm1302_vm11 = vcmp.gt.f32.partialorder %v1174_v19, 0.0 }
 0x203   :  { %v1431_v47 = vmul.f32 0.2, %v1175_v20  ;;  %v1179_v49 = vadd.f32 %v5202_v57, %v1017_v63  ;;  %vm1303_vm12 = vcmp.gt.f32.partialorder %v1175_v20, 0.0 }
 0x204   :  { %vm1306_vm13 = vcmp.gt.f32.partialorder %v1178_v42, 0.0  ;;  %v1434_v28 = vmul.f32 0.2, %v1178_v42  ;;  %v1558_v1 = vsel %vm1302_vm11, %v1174_v19, %v1430_v46 }
 0x205   :  { %vm1307_vm14 = vcmp.gt.f32.partialorder %v1179_v49, 0.0  ;;  %v1435_v50 = vmul.f32 0.2, %v1179_v49  ;;  %2380 = vmatmul.mubr.bf16.gmra.mrb[100].mxu0 %v1642_v18  ;;  %v1559_v51 = vsel %vm1303_vm12, %v1175_v20, %v1431_v47 }
 0x206   :  { %v1562_v37 = vsel %vm1306_vm13, %v1178_v42, %v1434_v28 }
 0x207   :  { %v1021_v29 = vpop.f32.mrb[76].mxu1  ;;  %v1563_v39 = vsel %vm1307_vm14, %v1179_v49, %v1435_v50  ;;  %v1646_v23 = vpack.c.bf16 %v1562_v37, %v1558_v1 }
 0x208   :  { %v1182_v5 = vadd.f32 %v5198_v54, %v1021_v29  ;;  %v1023_v38 = vpop.f32.mrb[77].mxu1  ;;  %v1647_v25 = vpack.c.bf16 %v1563_v39, %v1559_v51 }
 0x209   :  { %v1183_v13 = vadd.f32 %v5202_v57, %v1023_v38  ;;  %v1025_v4 = vpop.f32.mrb[78].mxu1 }
 0x20a   :  { %v1438_v21 = vmul.f32 0.2, %v1182_v5  ;;  %v1186_v40 = vadd.f32 %v5198_v54, %v1025_v4  ;;  %v1027_v48 = vpop.f32.mrb[79].mxu1  ;;  %2389 = vmatprep.mubr.bf16.mxu0 %v1647_v25  ;;  %vm1310_vm15 = vcmp.gt.f32.partialorder %v1182_v5, 0.0 }
 0x20b   :  { %v1439_v31 = vmul.f32 0.2, %v1183_v13  ;;  %v1187_v2 = vadd.f32 %v5202_v57, %v1027_v48  ;;  %vm1311_vm0 = vcmp.gt.f32.partialorder %v1183_v13, 0.0 }
 0x20c   :  { %vm1314_vm1 = vcmp.gt.f32.partialorder %v1186_v40, 0.0  ;;  %v1442_v7 = vmul.f32 0.2, %v1186_v40  ;;  %v1566_v3 = vsel %vm1310_vm15, %v1182_v5, %v1438_v21 }
 0x20d   :  { %vm1315_vm3 = vcmp.gt.f32.partialorder %v1187_v2, 0.0  ;;  %v1443_v53 = vmul.f32 0.2, %v1187_v2  ;;  %2390 = vmatmul.mubr.bf16.gmra.mrb[104].mxu0 %v1646_v23  ;;  %v1567_v8 = vsel %vm1311_vm0, %v1183_v13, %v1439_v31 }
 0x20e   :  { %v1570_v6 = vsel %vm1314_vm1, %v1186_v40, %v1442_v7 }
 0x20f   :  { %v1031_v0 = vpop.f32.mrb[80].mxu1  ;;  %v1571_v10 = vsel %vm1315_vm3, %v1187_v2, %v1443_v53  ;;  %v1650_v9 = vpack.c.bf16 %v1570_v6, %v1566_v3 }
 0x210   :  { %v1190_v12 = vadd.f32 %v5198_v54, %v1031_v0  ;;  %v1033_v30 = vpop.f32.mrb[81].mxu1  ;;  %v1651_v60 = vpack.c.bf16 %v1571_v10, %v1567_v8 }
 0x211   :  { %v1191_v41 = vadd.f32 %v5202_v57, %v1033_v30  ;;  %v1035_v11 = vpop.f32.mrb[82].mxu1 }
 0x212   :  { %v1446_v43 = vmul.f32 0.2, %v1190_v12  ;;  %v1194_v17 = vadd.f32 %v5198_v54, %v1035_v11  ;;  %v1037_v62 = vpop.f32.mrb[83].mxu1  ;;  %2399 = vmatprep.mubr.bf16.mxu0 %v1651_v60  ;;  %vm1318_vm4 = vcmp.gt.f32.partialorder %v1190_v12, 0.0 }
 0x213   :  { %v1447_v58 = vmul.f32 0.2, %v1191_v41  ;;  %v1195_v33 = vadd.f32 %v5202_v57, %v1037_v62  ;;  %vm1319_vm5 = vcmp.gt.f32.partialorder %v1191_v41, 0.0 }
 0x214   :  { %vm1322_vm6 = vcmp.gt.f32.partialorder %v1194_v17, 0.0  ;;  %v1450_v14 = vmul.f32 0.2, %v1194_v17  ;;  %v1574_v34 = vsel %vm1318_vm4, %v1190_v12, %v1446_v43 }
 0x215   :  { %vm1323_vm7 = vcmp.gt.f32.partialorder %v1195_v33, 0.0  ;;  %v1451_v44 = vmul.f32 0.2, %v1195_v33  ;;  %2400 = vmatmul.mubr.bf16.gmra.mrb[108].mxu0 %v1650_v9  ;;  %v1575_v15 = vsel %vm1319_vm5, %v1191_v41, %v1447_v58 }
 0x216   :  { %v1578_v55 = vsel %vm1322_vm6, %v1194_v17, %v1450_v14 }
 0x217   :  { %v1041_v45 = vpop.f32.mrb[84].mxu1  ;;  %v1579_v32 = vsel %vm1323_vm7, %v1195_v33, %v1451_v44  ;;  %v1654_v36 = vpack.c.bf16 %v1578_v55, %v1574_v34 }
 0x218   :  { %v1198_v27 = vadd.f32 %v5198_v54, %v1041_v45  ;;  %v1043_v16 = vpop.f32.mrb[85].mxu1  ;;  %v1655_v61 = vpack.c.bf16 %v1579_v32, %v1575_v15 }
 0x219   :  { %v1199_v35 = vadd.f32 %v5202_v57, %v1043_v16  ;;  %v1045_v18 = vpop.f32.mrb[86].mxu1 }
 0x21a   :  { %v1454_v19 = vmul.f32 0.2, %v1198_v27  ;;  %v1202_v22 = vadd.f32 %v5198_v54, %v1045_v18  ;;  %v1047_v24 = vpop.f32.mrb[87].mxu1  ;;  %2409 = vmatprep.mubr.bf16.mxu0 %v1655_v61  ;;  %vm1326_vm2 = vcmp.gt.f32.partialorder %v1198_v27, 0.0 }
 0x21b   :  { %v1455_v20 = vmul.f32 0.2, %v1199_v35  ;;  %v1203_v26 = vadd.f32 %v5202_v57, %v1047_v24  ;;  %vm1327_vm8 = vcmp.gt.f32.partialorder %v1199_v35, 0.0 }
 0x21c   :  { %vm1330_vm9 = vcmp.gt.f32.partialorder %v1202_v22, 0.0  ;;  %v1458_v46 = vmul.f32 0.2, %v1202_v22  ;;  %v1582_v63 = vsel %vm1326_vm2, %v1198_v27, %v1454_v19 }
 0x21d   :  { %vm1331_vm10 = vcmp.gt.f32.partialorder %v1203_v26, 0.0  ;;  %v1459_v42 = vmul.f32 0.2, %v1203_v26  ;;  %2410 = vmatmul.mubr.bf16.gmra.mrb[112].mxu0 %v1654_v36  ;;  %v1583_v28 = vsel %vm1327_vm8, %v1199_v35, %v1455_v20 }
 0x21e   :  { %v1586_v47 = vsel %vm1330_vm9, %v1202_v22, %v1458_v46 }
 0x21f   :  { %v1051_v49 = vpop.f32.mrb[88].mxu1  ;;  %v1587_v50 = vsel %vm1331_vm10, %v1203_v26, %v1459_v42  ;;  %v1658_v1 = vpack.c.bf16 %v1586_v47, %v1582_v63 }
 0x220   :  { %v1206_v37 = vadd.f32 %v5198_v54, %v1051_v49  ;;  %v1053_v29 = vpop.f32.mrb[89].mxu1  ;;  %v1659_v51 = vpack.c.bf16 %v1587_v50, %v1583_v28 }
 0x221   :  { %v1207_v39 = vadd.f32 %v5202_v57, %v1053_v29  ;;  %v1055_v23 = vpop.f32.mrb[90].mxu1 }
 0x222   :  { %v1462_v5 = vmul.f32 0.2, %v1206_v37  ;;  %v1210_v38 = vadd.f32 %v5198_v54, %v1055_v23  ;;  %v1057_v25 = vpop.f32.mrb[91].mxu1  ;;  %2419 = vmatprep.mubr.bf16.mxu0 %v1659_v51  ;;  %vm1334_vm11 = vcmp.gt.f32.partialorder %v1206_v37, 0.0 }
 0x223   :  { %v1463_v13 = vmul.f32 0.2, %v1207_v39  ;;  %v1211_v4 = vadd.f32 %v5202_v57, %v1057_v25  ;;  %vm1335_vm12 = vcmp.gt.f32.partialorder %v1207_v39, 0.0 }
 0x224   :  { %vm1338_vm13 = vcmp.gt.f32.partialorder %v1210_v38, 0.0  ;;  %v1466_v21 = vmul.f32 0.2, %v1210_v38  ;;  %v1590_v48 = vsel %vm1334_vm11, %v1206_v37, %v1462_v5 }
 0x225   :  { %vm1339_vm14 = vcmp.gt.f32.partialorder %v1211_v4, 0.0  ;;  %v1467_v40 = vmul.f32 0.2, %v1211_v4  ;;  %2420 = vmatmul.mubr.bf16.gmra.mrb[116].mxu0 %v1658_v1  ;;  %v1591_v7 = vsel %vm1335_vm12, %v1207_v39, %v1463_v13 }
 0x226   :  { %v1594_v31 = vsel %vm1338_vm13, %v1210_v38, %v1466_v21 }
 0x227   :  { %v1061_v2 = vpop.f32.mrb[92].mxu1  ;;  %v1595_v53 = vsel %vm1339_vm14, %v1211_v4, %v1467_v40  ;;  %v1662_v3 = vpack.c.bf16 %v1594_v31, %v1590_v48 }
 0x228   :  { %v1214_v6 = vadd.f32 %v5198_v54, %v1061_v2  ;;  %v1063_v0 = vpop.f32.mrb[93].mxu1  ;;  %v1663_v8 = vpack.c.bf16 %v1595_v53, %v1591_v7 }
 0x229   :  { %v1215_v10 = vadd.f32 %v5202_v57, %v1063_v0  ;;  %v1065_v9 = vpop.f32.mrb[94].mxu1 }
 0x22a   :  { %v1470_v12 = vmul.f32 0.2, %v1214_v6  ;;  %v1218_v30 = vadd.f32 %v5198_v54, %v1065_v9  ;;  %v1067_v60 = vpop.f32.mrb[95].mxu1  ;;  %2429 = vmatprep.mubr.bf16.mxu0 %v1663_v8  ;;  %vm1342_vm15 = vcmp.gt.f32.partialorder %v1214_v6, 0.0  ;;  %v1732_v54 = vld [vmem:[%s5586_s6] sm:$0x3] }
 0x22b   :  { %v1471_v41 = vmul.f32 0.2, %v1215_v10  ;;  %v1219_v11 = vadd.f32 %v5202_v57, %v1067_v60  ;;  %vm1343_vm0 = vcmp.gt.f32.partialorder %v1215_v10, 0.0  ;;  %v5274_v57 = vrot.slane %v1732_v54, %v1074_v56 }
 0x22c   :  { %vm1346_vm1 = vcmp.gt.f32.partialorder %v1218_v30, 0.0  ;;  %v1474_v43 = vmul.f32 0.2, %v1218_v30  ;;  %v1598_v62 = vsel %vm1342_vm15, %v1214_v6, %v1470_v12  ;;  %v5278_v55 = vrot.slane %v1732_v54, %v1078_v59 }
 0x22d   :  { %vm1347_vm3 = vcmp.gt.f32.partialorder %v1219_v11, 0.0  ;;  %v1475_v17 = vmul.f32 0.2, %v1219_v11  ;;  %2430 = vmatmul.mubr.bf16.gmra.mrb[120].mxu0 %v1662_v3  ;;  %v1599_v33 = vsel %vm1343_vm0, %v1215_v10, %v1471_v41 }
 0x22e   :  { %v1602_v58 = vsel %vm1346_vm1, %v1218_v30, %v1474_v43 }
 0x22f   :  { %v1603_v14 = vsel %vm1347_vm3, %v1219_v11, %v1475_v17  ;;  %v1666_v44 = vpack.c.bf16 %v1602_v58, %v1598_v62 }
 0x230   :  { %v1667_v34 = vpack.c.bf16 %v1603_v14, %v1599_v33 }
 0x232   :  { %2439 = vmatprep.mubr.bf16.mxu0 %v1667_v34 }
 0x235   :  { %2440 = vmatmul.mubr.bf16.gmra.mrb[124].mxu0 %v1666_v44 }
 0x290   :  { %v2291_v45 = vpop.f32.mrb[64].mxu0 }
 0x291   :  { %v3773_v15 = vadd.f32 %v2291_v45, %v5274_v57  ;;  %v2293_v32 = vpop.f32.mrb[65].mxu0 }
 0x292   :  { %v3774_v36 = vadd.f32 %v2293_v32, %v5278_v55  ;;  %v2295_v27 = vpop.f32.mrb[66].mxu0 }
 0x293   :  { %v2514_v16 = vmul.f32 0.2, %v3773_v15  ;;  %v3775_v61 = vadd.f32 %v2295_v27, %v5274_v57  ;;  %v2297_v35 = vpop.f32.mrb[67].mxu0  ;;  %vm2450_vm4 = vcmp.gt.f32.partialorder %v3773_v15, 0.0 }
 0x294   :  { %v2515_v18 = vmul.f32 0.2, %v3774_v36  ;;  %v3776_v56 = vadd.f32 %v2297_v35, %v5278_v55  ;;  %vm2451_vm5 = vcmp.gt.f32.partialorder %v3774_v36, 0.0 }
 0x295   :  { %vm2452_vm6 = vcmp.gt.f32.partialorder %v3775_v61, 0.0  ;;  %v2516_v52 = vmul.f32 0.2, %v3775_v61  ;;  %v2578_v19 = vsel %vm2450_vm4, %v3773_v15, %v2514_v16 }
 0x296   :  { %vm2453_vm7 = vcmp.gt.f32.partialorder %v3776_v56, 0.0  ;;  %v2517_v59 = vmul.f32 0.2, %v3776_v56  ;;  %v2579_v26 = vsel %vm2451_vm5, %v3774_v36, %v2515_v18 }
 0x297   :  { %v2580_v22 = vsel %vm2452_vm6, %v3775_v61, %v2516_v52 }
 0x298   :  { %v2642_v24 = vpack.c.bf16 %v2580_v22, %v2578_v19  ;;  %v2301_v20 = vpop.f32.mrb[68].mxu0  ;;  %v2581_v46 = vsel %vm2453_vm7, %v3776_v56, %v2517_v59 }
 0x299   :  { %v3777_v42 = vadd.f32 %v2301_v20, %v5274_v57  ;;  %v2303_v63 = vpop.f32.mrb[69].mxu0  ;;  %v2643_v47 = vpack.c.bf16 %v2581_v46, %v2579_v26 }
 0x29a   :  { %v3778_v49 = vadd.f32 %v2303_v63, %v5278_v55  ;;  %v2305_v28 = vpop.f32.mrb[70].mxu0 }
 0x29b   :  { %v2518_v50 = vmul.f32 0.2, %v3777_v42  ;;  %v3779_v1 = vadd.f32 %v2305_v28, %v5274_v57  ;;  %v2307_v37 = vpop.f32.mrb[71].mxu0  ;;  %2841 = vmatprep.mubr.bf16.mxu1 %v2643_v47  ;;  %vm2454_vm2 = vcmp.gt.f32.partialorder %v3777_v42, 0.0 }
 0x29c   :  { %v2519_v29 = vmul.f32 0.2, %v3778_v49  ;;  %v3780_v51 = vadd.f32 %v2307_v37, %v5278_v55  ;;  %2842 = vmatmul.mubr.bf16.vlgmr.msra.gmra.mrb[96].mxu1 %v2642_v24  ;;  %vm2455_vm8 = vcmp.gt.f32.partialorder %v3778_v49, 0.0 }
 0x29d   :  { %vm2456_vm9 = vcmp.gt.f32.partialorder %v3779_v1, 0.0  ;;  %v2520_v39 = vmul.f32 0.2, %v3779_v1  ;;  %v2582_v5 = vsel %vm2454_vm2, %v3777_v42, %v2518_v50 }
 0x29e   :  { %vm2457_vm10 = vcmp.gt.f32.partialorder %v3780_v51, 0.0  ;;  %v2521_v23 = vmul.f32 0.2, %v3780_v51  ;;  %v2583_v13 = vsel %vm2455_vm8, %v3778_v49, %v2519_v29 }
 0x29f   :  { %v2584_v38 = vsel %vm2456_vm9, %v3779_v1, %v2520_v39 }
 0x2a0   :  { %v2311_v25 = vpop.f32.mrb[72].mxu0  ;;  %v2585_v4 = vsel %vm2457_vm10, %v3780_v51, %v2521_v23  ;;  %v2644_v21 = vpack.c.bf16 %v2584_v38, %v2582_v5 }
 0x2a1   :  { %v3781_v40 = vadd.f32 %v2311_v25, %v5274_v57  ;;  %v2313_v48 = vpop.f32.mrb[73].mxu0  ;;  %v2645_v31 = vpack.c.bf16 %v2585_v4, %v2583_v13 }
 0x2a2   :  { %v3782_v2 = vadd.f32 %v2313_v48, %v5278_v55  ;;  %v2315_v7 = vpop.f32.mrb[74].mxu0 }
 0x2a3   :  { %v2522_v53 = vmul.f32 0.2, %v3781_v40  ;;  %v3783_v3 = vadd.f32 %v2315_v7, %v5274_v57  ;;  %v2317_v6 = vpop.f32.mrb[75].mxu0  ;;  %2849 = vmatprep.mubr.bf16.mxu1 %v2645_v31  ;;  %vm2458_vm11 = vcmp.gt.f32.partialorder %v3781_v40, 0.0 }
 0x2a4   :  { %v2523_v0 = vmul.f32 0.2, %v3782_v2  ;;  %v3784_v8 = vadd.f32 %v2317_v6, %v5278_v55  ;;  %2850 = vmatmul.mubr.bf16.gmra.mrb[100].mxu1 %v2644_v21  ;;  %vm2459_vm12 = vcmp.gt.f32.partialorder %v3782_v2, 0.0 }
 0x2a5   :  { %vm2460_vm13 = vcmp.gt.f32.partialorder %v3783_v3, 0.0  ;;  %v2524_v10 = vmul.f32 0.2, %v3783_v3  ;;  %v2586_v12 = vsel %vm2458_vm11, %v3781_v40, %v2522_v53 }
 0x2a6   :  { %vm2461_vm14 = vcmp.gt.f32.partialorder %v3784_v8, 0.0  ;;  %v2525_v9 = vmul.f32 0.2, %v3784_v8  ;;  %v2587_v41 = vsel %vm2459_vm12, %v3782_v2, %v2523_v0 }
 0x2a7   :  { %v2588_v30 = vsel %vm2460_vm13, %v3783_v3, %v2524_v10 }
 0x2a8   :  { %v2321_v60 = vpop.f32.mrb[76].mxu0  ;;  %v2589_v11 = vsel %vm2461_vm14, %v3784_v8, %v2525_v9  ;;  %v2646_v43 = vpack.c.bf16 %v2588_v30, %v2586_v12 }
 0x2a9   :  { %v3785_v17 = vadd.f32 %v2321_v60, %v5274_v57  ;;  %v2323_v62 = vpop.f32.mrb[77].mxu0  ;;  %v2647_v58 = vpack.c.bf16 %v2589_v11, %v2587_v41 }
 0x2aa   :  { %v3786_v33 = vadd.f32 %v2323_v62, %v5278_v55  ;;  %v2325_v14 = vpop.f32.mrb[78].mxu0 }
 0x2ab   :  { %v2526_v44 = vmul.f32 0.2, %v3785_v17  ;;  %v3787_v34 = vadd.f32 %v2325_v14, %v5274_v57  ;;  %v2327_v54 = vpop.f32.mrb[79].mxu0  ;;  %2857 = vmatprep.mubr.bf16.mxu1 %v2647_v58  ;;  %vm2462_vm15 = vcmp.gt.f32.partialorder %v3785_v17, 0.0 }
 0x2ac   :  { %v2527_v45 = vmul.f32 0.2, %v3786_v33  ;;  %v3788_v15 = vadd.f32 %v2327_v54, %v5278_v55  ;;  %2858 = vmatmul.mubr.bf16.gmra.mrb[104].mxu1 %v2646_v43  ;;  %vm2463_vm0 = vcmp.gt.f32.partialorder %v3786_v33, 0.0 }
 0x2ad   :  { %vm2464_vm1 = vcmp.gt.f32.partialorder %v3787_v34, 0.0  ;;  %v2528_v32 = vmul.f32 0.2, %v3787_v34  ;;  %v2590_v27 = vsel %vm2462_vm15, %v3785_v17, %v2526_v44 }
 0x2ae   :  { %vm2465_vm3 = vcmp.gt.f32.partialorder %v3788_v15, 0.0  ;;  %v2529_v36 = vmul.f32 0.2, %v3788_v15  ;;  %v2591_v35 = vsel %vm2463_vm0, %v3786_v33, %v2527_v45 }
 0x2af   :  { %v2592_v16 = vsel %vm2464_vm1, %v3787_v34, %v2528_v32 }
 0x2b0   :  { %v2331_v61 = vpop.f32.mrb[80].mxu0  ;;  %v2593_v18 = vsel %vm2465_vm3, %v3788_v15, %v2529_v36  ;;  %v2648_v56 = vpack.c.bf16 %v2592_v16, %v2590_v27 }
 0x2b1   :  { %v3789_v52 = vadd.f32 %v2331_v61, %v5274_v57  ;;  %v2333_v59 = vpop.f32.mrb[81].mxu0  ;;  %v2649_v19 = vpack.c.bf16 %v2593_v18, %v2591_v35 }
 0x2b2   :  { %v3790_v22 = vadd.f32 %v2333_v59, %v5278_v55  ;;  %v2335_v24 = vpop.f32.mrb[82].mxu0 }
 0x2b3   :  { %v2530_v20 = vmul.f32 0.2, %v3789_v52  ;;  %v3791_v26 = vadd.f32 %v2335_v24, %v5274_v57  ;;  %v2337_v46 = vpop.f32.mrb[83].mxu0  ;;  %2865 = vmatprep.mubr.bf16.mxu1 %v2649_v19  ;;  %vm2466_vm4 = vcmp.gt.f32.partialorder %v3789_v52, 0.0 }
 0x2b4   :  { %v2531_v42 = vmul.f32 0.2, %v3790_v22  ;;  %v3792_v63 = vadd.f32 %v2337_v46, %v5278_v55  ;;  %2866 = vmatmul.mubr.bf16.gmra.mrb[108].mxu1 %v2648_v56  ;;  %vm2467_vm5 = vcmp.gt.f32.partialorder %v3790_v22, 0.0 }
 0x2b5   :  { %vm2468_vm6 = vcmp.gt.f32.partialorder %v3791_v26, 0.0  ;;  %v2532_v47 = vmul.f32 0.2, %v3791_v26  ;;  %v2594_v28 = vsel %vm2466_vm4, %v3789_v52, %v2530_v20 }
 0x2b6   :  { %vm2469_vm7 = vcmp.gt.f32.partialorder %v3792_v63, 0.0  ;;  %v2533_v49 = vmul.f32 0.2, %v3792_v63  ;;  %v2595_v37 = vsel %vm2467_vm5, %v3790_v22, %v2531_v42 }
 0x2b7   :  { %v2596_v50 = vsel %vm2468_vm6, %v3791_v26, %v2532_v47 }
 0x2b8   :  { %v2341_v1 = vpop.f32.mrb[84].mxu0  ;;  %v2597_v29 = vsel %vm2469_vm7, %v3792_v63, %v2533_v49  ;;  %v2650_v51 = vpack.c.bf16 %v2596_v50, %v2594_v28 }
 0x2b9   :  { %v3793_v39 = vadd.f32 %v2341_v1, %v5274_v57  ;;  %v2343_v23 = vpop.f32.mrb[85].mxu0  ;;  %v2651_v5 = vpack.c.bf16 %v2597_v29, %v2595_v37 }
 0x2ba   :  { %v3794_v38 = vadd.f32 %v2343_v23, %v5278_v55  ;;  %v2345_v25 = vpop.f32.mrb[86].mxu0 }
 0x2bb   :  { %v2534_v13 = vmul.f32 0.2, %v3793_v39  ;;  %v3795_v4 = vadd.f32 %v2345_v25, %v5274_v57  ;;  %v2347_v21 = vpop.f32.mrb[87].mxu0  ;;  %2873 = vmatprep.mubr.bf16.mxu1 %v2651_v5  ;;  %vm2470_vm2 = vcmp.gt.f32.partialorder %v3793_v39, 0.0 }
 0x2bc   :  { %v2535_v40 = vmul.f32 0.2, %v3794_v38  ;;  %v3796_v48 = vadd.f32 %v2347_v21, %v5278_v55  ;;  %2874 = vmatmul.mubr.bf16.gmra.mrb[112].mxu1 %v2650_v51  ;;  %vm2471_vm8 = vcmp.gt.f32.partialorder %v3794_v38, 0.0 }
 0x2bd   :  { %vm2472_vm9 = vcmp.gt.f32.partialorder %v3795_v4, 0.0  ;;  %v2536_v31 = vmul.f32 0.2, %v3795_v4  ;;  %v2598_v7 = vsel %vm2470_vm2, %v3793_v39, %v2534_v13 }
 0x2be   :  { %vm2473_vm10 = vcmp.gt.f32.partialorder %v3796_v48, 0.0  ;;  %v2537_v2 = vmul.f32 0.2, %v3796_v48  ;;  %v2599_v6 = vsel %vm2471_vm8, %v3794_v38, %v2535_v40 }
 0x2bf   :  { %v2600_v53 = vsel %vm2472_vm9, %v3795_v4, %v2536_v31 }
 0x2c0   :  { %v2351_v3 = vpop.f32.mrb[88].mxu0  ;;  %v2601_v0 = vsel %vm2473_vm10, %v3796_v48, %v2537_v2  ;;  %v2652_v8 = vpack.c.bf16 %v2600_v53, %v2598_v7 }
 0x2c1   :  { %v3797_v10 = vadd.f32 %v2351_v3, %v5274_v57  ;;  %v2353_v9 = vpop.f32.mrb[89].mxu0  ;;  %v2653_v12 = vpack.c.bf16 %v2601_v0, %v2599_v6 }
 0x2c2   :  { %v3798_v30 = vadd.f32 %v2353_v9, %v5278_v55  ;;  %v2355_v60 = vpop.f32.mrb[90].mxu0 }
 0x2c3   :  { %v2538_v41 = vmul.f32 0.2, %v3797_v10  ;;  %v3799_v11 = vadd.f32 %v2355_v60, %v5274_v57  ;;  %v2357_v43 = vpop.f32.mrb[91].mxu0  ;;  %2881 = vmatprep.mubr.bf16.mxu1 %v2653_v12  ;;  %vm2474_vm11 = vcmp.gt.f32.partialorder %v3797_v10, 0.0 }
 0x2c4   :  { %v2539_v17 = vmul.f32 0.2, %v3798_v30  ;;  %v3800_v62 = vadd.f32 %v2357_v43, %v5278_v55  ;;  %2882 = vmatmul.mubr.bf16.gmra.mrb[116].mxu1 %v2652_v8  ;;  %vm2475_vm12 = vcmp.gt.f32.partialorder %v3798_v30, 0.0 }
 0x2c5   :  { %vm2476_vm13 = vcmp.gt.f32.partialorder %v3799_v11, 0.0  ;;  %v2540_v58 = vmul.f32 0.2, %v3799_v11  ;;  %v2602_v14 = vsel %vm2474_vm11, %v3797_v10, %v2538_v41 }
 0x2c6   :  { %vm2477_vm14 = vcmp.gt.f32.partialorder %v3800_v62, 0.0  ;;  %v2541_v33 = vmul.f32 0.2, %v3800_v62  ;;  %v2603_v54 = vsel %vm2475_vm12, %v3798_v30, %v2539_v17 }
 0x2c7   :  { %v2604_v44 = vsel %vm2476_vm13, %v3799_v11, %v2540_v58 }
 0x2c8   :  { %v2361_v34 = vpop.f32.mrb[92].mxu0  ;;  %v2605_v45 = vsel %vm2477_vm14, %v3800_v62, %v2541_v33  ;;  %v2654_v15 = vpack.c.bf16 %v2604_v44, %v2602_v14 }
 0x2c9   :  { %v3801_v32 = vadd.f32 %v2361_v34, %v5274_v57  ;;  %v2363_v36 = vpop.f32.mrb[93].mxu0  ;;  %v2655_v27 = vpack.c.bf16 %v2605_v45, %v2603_v54 }
 0x2ca   :  { %v3802_v16 = vadd.f32 %v2363_v36, %v5278_v55  ;;  %v2365_v61 = vpop.f32.mrb[94].mxu0 }
 0x2cb   :  { %v2542_v35 = vmul.f32 0.2, %v3801_v32  ;;  %v3803_v18 = vadd.f32 %v2365_v61, %v5274_v57  ;;  %v2367_v56 = vpop.f32.mrb[95].mxu0  ;;  %2889 = vmatprep.mubr.bf16.mxu1 %v2655_v27  ;;  %vm2478_vm15 = vcmp.gt.f32.partialorder %v3801_v32, 0.0 }
 0x2cc   :  { %v2543_v52 = vmul.f32 0.2, %v3802_v16  ;;  %v3804_v59 = vadd.f32 %v2367_v56, %v5278_v55  ;;  %2890 = vmatmul.mubr.bf16.gmra.mrb[120].mxu1 %v2654_v15  ;;  %vm2479_vm0 = vcmp.gt.f32.partialorder %v3802_v16, 0.0 }
 0x2cd   :  { %vm2480_vm1 = vcmp.gt.f32.partialorder %v3803_v18, 0.0  ;;  %v2544_v19 = vmul.f32 0.2, %v3803_v18  ;;  %v2606_v24 = vsel %vm2478_vm15, %v3801_v32, %v2542_v35 }
 0x2ce   :  { %vm2481_vm3 = vcmp.gt.f32.partialorder %v3804_v59, 0.0  ;;  %v2545_v22 = vmul.f32 0.2, %v3804_v59  ;;  %v2607_v46 = vsel %vm2479_vm0, %v3802_v16, %v2543_v52 }
 0x2cf   :  { %v2608_v20 = vsel %vm2480_vm1, %v3803_v18, %v2544_v19 }
 0x2d0   :  { %v2371_v26 = vpop.f32.mrb[96].mxu0  ;;  %v2609_v42 = vsel %vm2481_vm3, %v3804_v59, %v2545_v22  ;;  %v2656_v63 = vpack.c.bf16 %v2608_v20, %v2606_v24 }
 0x2d1   :  { %v3805_v47 = vadd.f32 %v2371_v26, %v5274_v57  ;;  %v2373_v49 = vpop.f32.mrb[97].mxu0  ;;  %v2657_v28 = vpack.c.bf16 %v2609_v42, %v2607_v46 }
 0x2d2   :  { %v3806_v50 = vadd.f32 %v2373_v49, %v5278_v55  ;;  %v2375_v1 = vpop.f32.mrb[98].mxu0 }
 0x2d3   :  { %v2546_v37 = vmul.f32 0.2, %v3805_v47  ;;  %v3807_v29 = vadd.f32 %v2375_v1, %v5274_v57  ;;  %v2377_v51 = vpop.f32.mrb[99].mxu0  ;;  %2897 = vmatprep.mubr.bf16.mxu1 %v2657_v28  ;;  %vm2482_vm4 = vcmp.gt.f32.partialorder %v3805_v47, 0.0 }
 0x2d4   :  { %v2547_v39 = vmul.f32 0.2, %v3806_v50  ;;  %v3808_v23 = vadd.f32 %v2377_v51, %v5278_v55  ;;  %2898 = vmatmul.mubr.bf16.gmra.mrb[124].mxu1 %v2656_v63  ;;  %vm2483_vm5 = vcmp.gt.f32.partialorder %v3806_v50, 0.0 }
 0x2d5   :  { %vm2484_vm6 = vcmp.gt.f32.partialorder %v3807_v29, 0.0  ;;  %v2548_v5 = vmul.f32 0.2, %v3807_v29  ;;  %v2610_v25 = vsel %vm2482_vm4, %v3805_v47, %v2546_v37 }
 0x2d6   :  { %vm2485_vm7 = vcmp.gt.f32.partialorder %v3808_v23, 0.0  ;;  %v2549_v38 = vmul.f32 0.2, %v3808_v23  ;;  %v2611_v21 = vsel %vm2483_vm5, %v3806_v50, %v2547_v39 }
 0x2d7   :  { %v2612_v13 = vsel %vm2484_vm6, %v3807_v29, %v2548_v5 }
 0x2d8   :  { %v2381_v4 = vpop.f32.mrb[100].mxu0  ;;  %v2613_v40 = vsel %vm2485_vm7, %v3808_v23, %v2549_v38  ;;  %v2658_v48 = vpack.c.bf16 %v2612_v13, %v2610_v25 }
 0x2d9   :  { %v3809_v31 = vadd.f32 %v2381_v4, %v5274_v57  ;;  %v2383_v2 = vpop.f32.mrb[101].mxu0  ;;  %v2659_v7 = vpack.c.bf16 %v2613_v40, %v2611_v21 }
 0x2da   :  { %v3810_v53 = vadd.f32 %v2383_v2, %v5278_v55  ;;  %v2385_v3 = vpop.f32.mrb[102].mxu0 }
 0x2db   :  { %v2550_v6 = vmul.f32 0.2, %v3809_v31  ;;  %v3811_v0 = vadd.f32 %v2385_v3, %v5274_v57  ;;  %v2387_v8 = vpop.f32.mrb[103].mxu0  ;;  %2905 = vmatprep.mubr.bf16.mxu1 %v2659_v7  ;;  %vm2486_vm2 = vcmp.gt.f32.partialorder %v3809_v31, 0.0 }
 0x2dc   :  { %v2551_v10 = vmul.f32 0.2, %v3810_v53  ;;  %v3812_v9 = vadd.f32 %v2387_v8, %v5278_v55  ;;  %2906 = vmatmul.mubr.bf16.gmra.mrb[128].mxu1 %v2658_v48  ;;  %vm2487_vm8 = vcmp.gt.f32.partialorder %v3810_v53, 0.0 }
 0x2dd   :  { %vm2488_vm9 = vcmp.gt.f32.partialorder %v3811_v0, 0.0  ;;  %v2552_v12 = vmul.f32 0.2, %v3811_v0  ;;  %v2614_v60 = vsel %vm2486_vm2, %v3809_v31, %v2550_v6 }
 0x2de   :  { %vm2489_vm10 = vcmp.gt.f32.partialorder %v3812_v9, 0.0  ;;  %v2553_v30 = vmul.f32 0.2, %v3812_v9  ;;  %v2615_v43 = vsel %vm2487_vm8, %v3810_v53, %v2551_v10 }
 0x2df   :  { %v2616_v41 = vsel %vm2488_vm9, %v3811_v0, %v2552_v12 }
 0x2e0   :  { %v2391_v11 = vpop.f32.mrb[104].mxu0  ;;  %v2617_v17 = vsel %vm2489_vm10, %v3812_v9, %v2553_v30  ;;  %v2660_v62 = vpack.c.bf16 %v2616_v41, %v2614_v60 }
 0x2e1   :  { %v3813_v58 = vadd.f32 %v2391_v11, %v5274_v57  ;;  %v2393_v33 = vpop.f32.mrb[105].mxu0  ;;  %v2661_v14 = vpack.c.bf16 %v2617_v17, %v2615_v43 }
 0x2e2   :  { %v3814_v44 = vadd.f32 %v2393_v33, %v5278_v55  ;;  %v2395_v34 = vpop.f32.mrb[106].mxu0 }
 0x2e3   :  { %v2554_v54 = vmul.f32 0.2, %v3813_v58  ;;  %v3815_v45 = vadd.f32 %v2395_v34, %v5274_v57  ;;  %v2397_v15 = vpop.f32.mrb[107].mxu0  ;;  %2913 = vmatprep.mubr.bf16.mxu1 %v2661_v14  ;;  %vm2490_vm11 = vcmp.gt.f32.partialorder %v3813_v58, 0.0 }
 0x2e4   :  { %v2555_v32 = vmul.f32 0.2, %v3814_v44  ;;  %v3816_v36 = vadd.f32 %v2397_v15, %v5278_v55  ;;  %2914 = vmatmul.mubr.bf16.gmra.mrb[132].mxu1 %v2660_v62  ;;  %vm2491_vm12 = vcmp.gt.f32.partialorder %v3814_v44, 0.0 }
 0x2e5   :  { %vm2492_vm13 = vcmp.gt.f32.partialorder %v3815_v45, 0.0  ;;  %v2556_v27 = vmul.f32 0.2, %v3815_v45  ;;  %v2618_v61 = vsel %vm2490_vm11, %v3813_v58, %v2554_v54 }
 0x2e6   :  { %vm2493_vm14 = vcmp.gt.f32.partialorder %v3816_v36, 0.0  ;;  %v2557_v16 = vmul.f32 0.2, %v3816_v36  ;;  %v2619_v56 = vsel %vm2491_vm12, %v3814_v44, %v2555_v32 }
 0x2e7   :  { %v2620_v35 = vsel %vm2492_vm13, %v3815_v45, %v2556_v27 }
 0x2e8   :  { %v2401_v18 = vpop.f32.mrb[108].mxu0  ;;  %v2621_v52 = vsel %vm2493_vm14, %v3816_v36, %v2557_v16  ;;  %v2662_v59 = vpack.c.bf16 %v2620_v35, %v2618_v61 }
 0x2e9   :  { %v3817_v19 = vadd.f32 %v2401_v18, %v5274_v57  ;;  %v2403_v22 = vpop.f32.mrb[109].mxu0  ;;  %v2663_v24 = vpack.c.bf16 %v2621_v52, %v2619_v56 }
 0x2ea   :  { %v3818_v20 = vadd.f32 %v2403_v22, %v5278_v55  ;;  %v2405_v26 = vpop.f32.mrb[110].mxu0 }
 0x2eb   :  { %v2558_v46 = vmul.f32 0.2, %v3817_v19  ;;  %v3819_v42 = vadd.f32 %v2405_v26, %v5274_v57  ;;  %v2407_v63 = vpop.f32.mrb[111].mxu0  ;;  %2921 = vmatprep.mubr.bf16.mxu1 %v2663_v24  ;;  %vm2494_vm15 = vcmp.gt.f32.partialorder %v3817_v19, 0.0 }
 0x2ec   :  { %v2559_v47 = vmul.f32 0.2, %v3818_v20  ;;  %v3820_v49 = vadd.f32 %v2407_v63, %v5278_v55  ;;  %2922 = vmatmul.mubr.bf16.gmra.mrb[136].mxu1 %v2662_v59  ;;  %vm2495_vm0 = vcmp.gt.f32.partialorder %v3818_v20, 0.0 }
 0x2ed   :  { %vm2496_vm1 = vcmp.gt.f32.partialorder %v3819_v42, 0.0  ;;  %v2560_v28 = vmul.f32 0.2, %v3819_v42  ;;  %v2622_v1 = vsel %vm2494_vm15, %v3817_v19, %v2558_v46 }
 0x2ee   :  { %vm2497_vm3 = vcmp.gt.f32.partialorder %v3820_v49, 0.0  ;;  %v2561_v50 = vmul.f32 0.2, %v3820_v49  ;;  %v2623_v51 = vsel %vm2495_vm0, %v3818_v20, %v2559_v47 }
 0x2ef   :  { %v2624_v37 = vsel %vm2496_vm1, %v3819_v42, %v2560_v28 }
 0x2f0   :  { %v2411_v29 = vpop.f32.mrb[112].mxu0  ;;  %v2625_v39 = vsel %vm2497_vm3, %v3820_v49, %v2561_v50  ;;  %v2664_v23 = vpack.c.bf16 %v2624_v37, %v2622_v1 }
 0x2f1   :  { %v3821_v5 = vadd.f32 %v2411_v29, %v5274_v57  ;;  %v2413_v38 = vpop.f32.mrb[113].mxu0  ;;  %v2665_v25 = vpack.c.bf16 %v2625_v39, %v2623_v51 }
 0x2f2   :  { %v3822_v13 = vadd.f32 %v2413_v38, %v5278_v55  ;;  %v2415_v4 = vpop.f32.mrb[114].mxu0 }
 0x2f3   :  { %v2562_v21 = vmul.f32 0.2, %v3821_v5  ;;  %v3823_v40 = vadd.f32 %v2415_v4, %v5274_v57  ;;  %v2417_v48 = vpop.f32.mrb[115].mxu0  ;;  %2929 = vmatprep.mubr.bf16.mxu1 %v2665_v25  ;;  %vm2498_vm4 = vcmp.gt.f32.partialorder %v3821_v5, 0.0 }
 0x2f4   :  { %v2563_v31 = vmul.f32 0.2, %v3822_v13  ;;  %v3824_v2 = vadd.f32 %v2417_v48, %v5278_v55  ;;  %2930 = vmatmul.mubr.bf16.gmra.mrb[140].mxu1 %v2664_v23  ;;  %vm2499_vm5 = vcmp.gt.f32.partialorder %v3822_v13, 0.0 }
 0x2f5   :  { %vm2500_vm6 = vcmp.gt.f32.partialorder %v3823_v40, 0.0  ;;  %v2564_v7 = vmul.f32 0.2, %v3823_v40  ;;  %v2626_v3 = vsel %vm2498_vm4, %v3821_v5, %v2562_v21 }
 0x2f6   :  { %vm2501_vm7 = vcmp.gt.f32.partialorder %v3824_v2, 0.0  ;;  %v2565_v53 = vmul.f32 0.2, %v3824_v2  ;;  %v2627_v8 = vsel %vm2499_vm5, %v3822_v13, %v2563_v31 }
 0x2f7   :  { %v2628_v6 = vsel %vm2500_vm6, %v3823_v40, %v2564_v7  ;;  %v5347_v7 = vld [vmem:[%s5588_s8] ss:$0 sm:$0xff] }
 0x2f8   :  { %v2421_v0 = vpop.f32.mrb[116].mxu0  ;;  %v2629_v10 = vsel %vm2501_vm7, %v3824_v2, %v2565_v53  ;;  %v2666_v9 = vpack.c.bf16 %v2628_v6, %v2626_v3 }
 0x2f9   :  { %v3825_v12 = vadd.f32 %v2421_v0, %v5274_v57  ;;  %v2423_v30 = vpop.f32.mrb[117].mxu0  ;;  %v2667_v60 = vpack.c.bf16 %v2629_v10, %v2627_v8 }
 0x2fa   :  { %v3826_v41 = vadd.f32 %v2423_v30, %v5278_v55  ;;  %v2425_v11 = vpop.f32.mrb[118].mxu0 }
 0x2fb   :  { %v2566_v43 = vmul.f32 0.2, %v3825_v12  ;;  %v3827_v17 = vadd.f32 %v2425_v11, %v5274_v57  ;;  %v2427_v62 = vpop.f32.mrb[119].mxu0  ;;  %2937 = vmatprep.mubr.bf16.mxu1 %v2667_v60  ;;  %vm2502_vm2 = vcmp.gt.f32.partialorder %v3825_v12, 0.0 }
 0x2fc   :  { %v2567_v58 = vmul.f32 0.2, %v3826_v41  ;;  %v3828_v33 = vadd.f32 %v2427_v62, %v5278_v55  ;;  %2938 = vmatmul.mubr.bf16.gmra.mrb[144].mxu1 %v2666_v9  ;;  %vm2503_vm8 = vcmp.gt.f32.partialorder %v3826_v41, 0.0 }
 0x2fd   :  { %vm2504_vm9 = vcmp.gt.f32.partialorder %v3827_v17, 0.0  ;;  %v2568_v14 = vmul.f32 0.2, %v3827_v17  ;;  %v2630_v34 = vsel %vm2502_vm2, %v3825_v12, %v2566_v43  ;;  %v5354_v12 = vld [vmem:[%s5589_s9] ss:$0 sm:$0xff] }
 0x2fe   :  { %vm2505_vm10 = vcmp.gt.f32.partialorder %v3828_v33, 0.0  ;;  %v2569_v44 = vmul.f32 0.2, %v3828_v33  ;;  %v2631_v15 = vsel %vm2503_vm8, %v3826_v41, %v2567_v58 }
 0x2ff   :  { %v2632_v54 = vsel %vm2504_vm9, %v3827_v17, %v2568_v14 }
 0x300   :  { %v2431_v45 = vpop.f32.mrb[120].mxu0  ;;  %v2633_v32 = vsel %vm2505_vm10, %v3828_v33, %v2569_v44  ;;  %v2668_v36 = vpack.c.bf16 %v2632_v54, %v2630_v34 }
 0x301   :  { %v3829_v27 = vadd.f32 %v2431_v45, %v5274_v57  ;;  %v2433_v16 = vpop.f32.mrb[121].mxu0  ;;  %v2669_v61 = vpack.c.bf16 %v2633_v32, %v2631_v15 }
 0x302   :  { %v3830_v35 = vadd.f32 %v2433_v16, %v5278_v55  ;;  %v2435_v18 = vpop.f32.mrb[122].mxu0 }
 0x303   :  { %v2570_v56 = vmul.f32 0.2, %v3829_v27  ;;  %v3831_v52 = vadd.f32 %v2435_v18, %v5274_v57  ;;  %v2437_v59 = vpop.f32.mrb[123].mxu0  ;;  %2945 = vmatprep.mubr.bf16.mxu1 %v2669_v61  ;;  %vm2506_vm11 = vcmp.gt.f32.partialorder %v3829_v27, 0.0 }
 0x304   :  { %v2571_v19 = vmul.f32 0.2, %v3830_v35  ;;  %v3832_v22 = vadd.f32 %v2437_v59, %v5278_v55  ;;  %2946 = vmatmul.mubr.bf16.gmra.mrb[148].mxu1 %v2668_v36  ;;  %vm2507_vm12 = vcmp.gt.f32.partialorder %v3830_v35, 0.0 }
 0x305   :  { %vm2508_vm13 = vcmp.gt.f32.partialorder %v3831_v52, 0.0  ;;  %v2572_v24 = vmul.f32 0.2, %v3831_v52  ;;  %v2634_v26 = vsel %vm2506_vm11, %v3829_v27, %v2570_v56 }
 0x306   :  { %vm2509_vm14 = vcmp.gt.f32.partialorder %v3832_v22, 0.0  ;;  %v2573_v20 = vmul.f32 0.2, %v3832_v22  ;;  %v2635_v63 = vsel %vm2507_vm12, %v3830_v35, %v2571_v19 }
 0x307   :  { %v2636_v46 = vsel %vm2508_vm13, %v3831_v52, %v2572_v24 }
 0x308   :  { %v2441_v42 = vpop.f32.mrb[124].mxu0  ;;  %v2637_v47 = vsel %vm2509_vm14, %v3832_v22, %v2573_v20  ;;  %v2670_v49 = vpack.c.bf16 %v2636_v46, %v2634_v26 }
 0x309   :  { %v3833_v28 = vadd.f32 %v2441_v42, %v5274_v57  ;;  %v2443_v50 = vpop.f32.mrb[125].mxu0  ;;  %v2671_v1 = vpack.c.bf16 %v2637_v47, %v2635_v63 }
 0x30a   :  { %v3834_v37 = vadd.f32 %v2443_v50, %v5278_v55  ;;  %v2445_v29 = vpop.f32.mrb[126].mxu0 }
 0x30b   :  { %v2574_v51 = vmul.f32 0.2, %v3833_v28  ;;  %v3835_v39 = vadd.f32 %v2445_v29, %v5274_v57  ;;  %v2447_v23 = vpop.f32.mrb[127].mxu0  ;;  %2953 = vmatprep.mubr.bf16.mxu1 %v2671_v1  ;;  %vm2510_vm15 = vcmp.gt.f32.partialorder %v3833_v28, 0.0 }
 0x30c   :  { %v2575_v5 = vmul.f32 0.2, %v3834_v37  ;;  %v3836_v38 = vadd.f32 %v2447_v23, %v5278_v55  ;;  %2954 = vmatmul.mubr.bf16.gmra.mrb[152].mxu1 %v2670_v49  ;;  %vm2511_vm0 = vcmp.gt.f32.partialorder %v3834_v37, 0.0 }
 0x30d   :  { %vm2512_vm1 = vcmp.gt.f32.partialorder %v3835_v39, 0.0  ;;  %v2576_v25 = vmul.f32 0.2, %v3835_v39  ;;  %v2638_v4 = vsel %vm2510_vm15, %v3833_v28, %v2574_v51 }
 0x30e   :  { %vm2513_vm3 = vcmp.gt.f32.partialorder %v3836_v38, 0.0  ;;  %v2577_v13 = vmul.f32 0.2, %v3836_v38  ;;  %v2639_v40 = vsel %vm2511_vm0, %v3834_v37, %v2575_v5 }
 0x30f   :  { %v2640_v21 = vsel %vm2512_vm1, %v3835_v39, %v2576_v25 }
 0x310   :  { %v2641_v48 = vsel %vm2513_vm3, %v3836_v38, %v2577_v13  ;;  %v2672_v31 = vpack.c.bf16 %v2640_v21, %v2638_v4 }
 0x311   :  { %v2673_v2 = vpack.c.bf16 %v2641_v48, %v2639_v40 }
 0x313   :  { %2961 = vmatprep.mubr.bf16.mxu1 %v2673_v2 }
 0x314   :  { %2962 = vmatmul.mubr.bf16.gmra.mrb[156].mxu1 %v2672_v31 }
 0x36f   :  { %v3643_v57 = vpop.f32.mrb[96].mxu1 }
 0x370   :  { %v3644_v55 = vpop.f32.mrb[97].mxu1 }
 0x371   :  { %v3645_v53 = vadd.f32 %v3644_v55, %v3643_v57  ;;  %v3646_v3 = vpop.f32.mrb[98].mxu1 }
 0x372   :  { %v3647_v6 = vpop.f32.mrb[99].mxu1 }
 0x373   :  { %v2844_v0 = vadd.f32 %v3645_v53, %v5347_v7  ;;  %v3648_v8 = vadd.f32 %v3647_v6, %v3646_v3 }
 0x375   :  { %v2847_v10 = vadd.f32 %v3648_v8, %v5347_v7  ;;  %vm2970_vm4 = vcmp.gt.f32.partialorder %v2844_v0, 0.0  ;;  %v3002_v9 = vmul.f32 0.2, %v2844_v0 }
 0x377   :  { %v3649_v30 = vpop.f32.mrb[100].mxu1  ;;  %v3034_v60 = vsel %vm2970_vm4, %v2844_v0, %v3002_v9  ;;  %vm2971_vm5 = vcmp.gt.f32.partialorder %v2847_v10, 0.0  ;;  %v3003_v41 = vmul.f32 0.2, %v2847_v10 }
 0x378   :  { %v3650_v11 = vpop.f32.mrb[101].mxu1  ;;  %v3073_v43 = vmul.f32 %v5354_v12, %v3034_v60 }
 0x379   :  { %v3651_v17 = vadd.f32 %v3650_v11, %v3649_v30  ;;  %v3652_v62 = vpop.f32.mrb[102].mxu1  ;;  %v3035_v58 = vsel %vm2971_vm5, %v2847_v10, %v3003_v41 }
 0x37a   :  { %v3653_v33 = vpop.f32.mrb[103].mxu1  ;;  %3105 = vadd.xlane.f32.xlu0 %v3073_v43  ;;  %v3074_v34 = vmul.f32 %v5354_v12, %v3035_v58 }
 0x37b   :  { %v2852_v14 = vadd.f32 %v3651_v17, %v5347_v7  ;;  %v3654_v44 = vadd.f32 %v3653_v33, %v3652_v62 }
 0x37d   :  { %v2855_v54 = vadd.f32 %v3654_v44, %v5347_v7  ;;  %vm2972_vm6 = vcmp.gt.f32.partialorder %v2852_v14, 0.0  ;;  %v3004_v45 = vmul.f32 0.2, %v2852_v14 }
 0x37e   :  { %3107 = vadd.xlane.f32.xlu0 %v3074_v34 }
 0x37f   :  { %v3655_v15 = vpop.f32.mrb[104].mxu1  ;;  %v3036_v32 = vsel %vm2972_vm6, %v2852_v14, %v3004_v45  ;;  %vm2973_vm7 = vcmp.gt.f32.partialorder %v2855_v54, 0.0  ;;  %v3005_v36 = vmul.f32 0.2, %v2855_v54 }
 0x380   :  { %v3656_v27 = vpop.f32.mrb[105].mxu1  ;;  %v3075_v16 = vmul.f32 %v5354_v12, %v3036_v32 }
 0x381   :  { %v3657_v61 = vadd.f32 %v3656_v27, %v3655_v15  ;;  %v3658_v35 = vpop.f32.mrb[106].mxu1  ;;  %v3037_v18 = vsel %vm2973_vm7, %v2855_v54, %v3005_v36 }
 0x382   :  { %v3659_v56 = vpop.f32.mrb[107].mxu1  ;;  %3109 = vadd.xlane.f32.xlu1 %v3075_v16  ;;  %v3076_v19 = vmul.f32 %v5354_v12, %v3037_v18 }
 0x383   :  { %v2860_v52 = vadd.f32 %v3657_v61, %v5347_v7  ;;  %v3660_v59 = vadd.f32 %v3659_v56, %v3658_v35 }
 0x385   :  { %v2863_v22 = vadd.f32 %v3660_v59, %v5347_v7  ;;  %vm2974_vm2 = vcmp.gt.f32.partialorder %v2860_v52, 0.0  ;;  %v3006_v24 = vmul.f32 0.2, %v2860_v52 }
 0x386   :  { %3111 = vadd.xlane.f32.xlu1 %v3076_v19 }
 0x387   :  { %v3661_v20 = vpop.f32.mrb[108].mxu1  ;;  %v3038_v26 = vsel %vm2974_vm2, %v2860_v52, %v3006_v24  ;;  %vm2975_vm8 = vcmp.gt.f32.partialorder %v2863_v22, 0.0  ;;  %v3007_v46 = vmul.f32 0.2, %v2863_v22 }
 0x388   :  { %v3662_v42 = vpop.f32.mrb[109].mxu1  ;;  %v3077_v63 = vmul.f32 %v5354_v12, %v3038_v26 }
 0x389   :  { %v3663_v47 = vadd.f32 %v3662_v42, %v3661_v20  ;;  %v3664_v49 = vpop.f32.mrb[110].mxu1  ;;  %v3039_v28 = vsel %vm2975_vm8, %v2863_v22, %v3007_v46 }
 0x38a   :  { %v3665_v50 = vpop.f32.mrb[111].mxu1  ;;  %3113 = vadd.xlane.f32.xlu0 %v3077_v63  ;;  %v3078_v1 = vmul.f32 %v5354_v12, %v3039_v28 }
 0x38b   :  { %v2868_v37 = vadd.f32 %v3663_v47, %v5347_v7  ;;  %v3666_v29 = vadd.f32 %v3665_v50, %v3664_v49 }
 0x38c   :  { %3115 = vadd.xlane.f32.xlu1 %v3078_v1 }
 0x38d   :  { %v2871_v51 = vadd.f32 %v3666_v29, %v5347_v7  ;;  %vm2976_vm9 = vcmp.gt.f32.partialorder %v2868_v37, 0.0  ;;  %v3008_v39 = vmul.f32 0.2, %v2868_v37 }
 0x38f   :  { %v3667_v23 = vpop.f32.mrb[112].mxu1  ;;  %v3040_v5 = vsel %vm2976_vm9, %v2868_v37, %v3008_v39  ;;  %vm2977_vm10 = vcmp.gt.f32.partialorder %v2871_v51, 0.0  ;;  %v3009_v38 = vmul.f32 0.2, %v2871_v51 }
 0x390   :  { %v3668_v25 = vpop.f32.mrb[113].mxu1  ;;  %v3079_v13 = vmul.f32 %v5354_v12, %v3040_v5 }
 0x391   :  { %v3669_v4 = vadd.f32 %v3668_v25, %v3667_v23  ;;  %v3670_v21 = vpop.f32.mrb[114].mxu1  ;;  %v3041_v40 = vsel %vm2977_vm10, %v2871_v51, %v3009_v38 }
 0x392   :  { %v3671_v48 = vpop.f32.mrb[115].mxu1  ;;  %3117 = vadd.xlane.f32.xlu0 %v3079_v13  ;;  %v3080_v31 = vmul.f32 %v5354_v12, %v3041_v40 }
 0x393   :  { %v2876_v2 = vadd.f32 %v3669_v4, %v5347_v7  ;;  %v3672_v57 = vadd.f32 %v3671_v48, %v3670_v21 }
 0x394   :  { %3119 = vadd.xlane.f32.xlu1 %v3080_v31 }
 0x395   :  { %v2879_v55 = vadd.f32 %v3672_v57, %v5347_v7  ;;  %vm2978_vm11 = vcmp.gt.f32.partialorder %v2876_v2, 0.0  ;;  %v3010_v53 = vmul.f32 0.2, %v2876_v2 }
 0x397   :  { %v3673_v3 = vpop.f32.mrb[116].mxu1  ;;  %v3042_v6 = vsel %vm2978_vm11, %v2876_v2, %v3010_v53  ;;  %vm2979_vm12 = vcmp.gt.f32.partialorder %v2879_v55, 0.0  ;;  %v3011_v0 = vmul.f32 0.2, %v2879_v55 }
 0x398   :  { %v3674_v8 = vpop.f32.mrb[117].mxu1  ;;  %v3081_v10 = vmul.f32 %v5354_v12, %v3042_v6 }
 0x399   :  { %v3675_v9 = vadd.f32 %v3674_v8, %v3673_v3  ;;  %v3676_v30 = vpop.f32.mrb[118].mxu1  ;;  %v3043_v60 = vsel %vm2979_vm12, %v2879_v55, %v3011_v0 }
 0x39a   :  { %v3677_v41 = vpop.f32.mrb[119].mxu1  ;;  %3121 = vadd.xlane.f32.xlu0 %v3081_v10  ;;  %v3082_v11 = vmul.f32 %v5354_v12, %v3043_v60 }
 0x39b   :  { %v2884_v43 = vadd.f32 %v3675_v9, %v5347_v7  ;;  %v3678_v17 = vadd.f32 %v3677_v41, %v3676_v30 }
 0x39c   :  { %3123 = vadd.xlane.f32.xlu1 %v3082_v11 }
 0x39d   :  { %v2887_v62 = vadd.f32 %v3678_v17, %v5347_v7  ;;  %vm2980_vm13 = vcmp.gt.f32.partialorder %v2884_v43, 0.0  ;;  %v3012_v58 = vmul.f32 0.2, %v2884_v43 }
 0x39f   :  { %v3679_v33 = vpop.f32.mrb[120].mxu1  ;;  %v3044_v14 = vsel %vm2980_vm13, %v2884_v43, %v3012_v58  ;;  %vm2981_vm14 = vcmp.gt.f32.partialorder %v2887_v62, 0.0  ;;  %v3013_v44 = vmul.f32 0.2, %v2887_v62 }
 0x3a0   :  { %v3680_v34 = vpop.f32.mrb[121].mxu1  ;;  %v3083_v54 = vmul.f32 %v5354_v12, %v3044_v14 }
 0x3a1   :  { %v3681_v45 = vadd.f32 %v3680_v34, %v3679_v33  ;;  %v3682_v15 = vpop.f32.mrb[122].mxu1  ;;  %v3045_v32 = vsel %vm2981_vm14, %v2887_v62, %v3013_v44 }
 0x3a2   :  { %v3683_v36 = vpop.f32.mrb[123].mxu1  ;;  %3125 = vadd.xlane.f32.xlu0 %v3083_v54  ;;  %v3084_v27 = vmul.f32 %v5354_v12, %v3045_v32 }
 0x3a3   :  { %v2892_v16 = vadd.f32 %v3681_v45, %v5347_v7  ;;  %v3684_v61 = vadd.f32 %v3683_v36, %v3682_v15 }
 0x3a4   :  { %3127 = vadd.xlane.f32.xlu1 %v3084_v27 }
 0x3a5   :  { %v2895_v35 = vadd.f32 %v3684_v61, %v5347_v7  ;;  %vm2982_vm15 = vcmp.gt.f32.partialorder %v2892_v16, 0.0  ;;  %v3014_v18 = vmul.f32 0.2, %v2892_v16 }
 0x3a7   :  { %v3685_v56 = vpop.f32.mrb[124].mxu1  ;;  %v3046_v52 = vsel %vm2982_vm15, %v2892_v16, %v3014_v18  ;;  %vm2983_vm0 = vcmp.gt.f32.partialorder %v2895_v35, 0.0  ;;  %v3015_v59 = vmul.f32 0.2, %v2895_v35 }
 0x3a8   :  { %v3686_v19 = vpop.f32.mrb[125].mxu1  ;;  %v3085_v22 = vmul.f32 %v5354_v12, %v3046_v52 }
 0x3a9   :  { %v3687_v24 = vadd.f32 %v3686_v19, %v3685_v56  ;;  %v3688_v20 = vpop.f32.mrb[126].mxu1  ;;  %v3047_v26 = vsel %vm2983_vm0, %v2895_v35, %v3015_v59 }
 0x3aa   :  { %v3689_v46 = vpop.f32.mrb[127].mxu1  ;;  %3129 = vadd.xlane.f32.xlu0 %v3085_v22  ;;  %v3086_v42 = vmul.f32 %v5354_v12, %v3047_v26 }
 0x3ab   :  { %v2900_v63 = vadd.f32 %v3687_v24, %v5347_v7  ;;  %v3690_v47 = vadd.f32 %v3689_v46, %v3688_v20 }
 0x3ac   :  { %3131 = vadd.xlane.f32.xlu1 %v3086_v42 }
 0x3ad   :  { %v2903_v49 = vadd.f32 %v3690_v47, %v5347_v7  ;;  %vm2984_vm1 = vcmp.gt.f32.partialorder %v2900_v63, 0.0  ;;  %v3016_v28 = vmul.f32 0.2, %v2900_v63 }
 0x3af   :  { %v3691_v50 = vpop.f32.mrb[128].mxu1  ;;  %v3048_v1 = vsel %vm2984_vm1, %v2900_v63, %v3016_v28  ;;  %vm2985_vm3 = vcmp.gt.f32.partialorder %v2903_v49, 0.0  ;;  %v3017_v37 = vmul.f32 0.2, %v2903_v49 }
 0x3b0   :  { %v3692_v29 = vpop.f32.mrb[129].mxu1  ;;  %v3087_v51 = vmul.f32 %v5354_v12, %v3048_v1 }
 0x3b1   :  { %v3693_v39 = vadd.f32 %v3692_v29, %v3691_v50  ;;  %v3694_v23 = vpop.f32.mrb[130].mxu1  ;;  %v3049_v5 = vsel %vm2985_vm3, %v2903_v49, %v3017_v37 }
 0x3b2   :  { %v3695_v38 = vpop.f32.mrb[131].mxu1  ;;  %3133 = vadd.xlane.f32.xlu0 %v3087_v51  ;;  %v3088_v25 = vmul.f32 %v5354_v12, %v3049_v5 }
 0x3b3   :  { %v2908_v13 = vadd.f32 %v3693_v39, %v5347_v7  ;;  %v3696_v4 = vadd.f32 %v3695_v38, %v3694_v23 }
 0x3b4   :  { %3135 = vadd.xlane.f32.xlu1 %v3088_v25 }
 0x3b5   :  { %v2911_v21 = vadd.f32 %v3696_v4, %v5347_v7  ;;  %vm2986_vm4 = vcmp.gt.f32.partialorder %v2908_v13, 0.0  ;;  %v3018_v40 = vmul.f32 0.2, %v2908_v13 }
 0x3b7   :  { %v3697_v48 = vpop.f32.mrb[132].mxu1  ;;  %v3050_v31 = vsel %vm2986_vm4, %v2908_v13, %v3018_v40  ;;  %vm2987_vm5 = vcmp.gt.f32.partialorder %v2911_v21, 0.0  ;;  %v3019_v2 = vmul.f32 0.2, %v2911_v21  ;;  %vm3400_vm4 = vcmask 7168  }
 0x3b8   :  { %v3698_v57 = vpop.f32.mrb[133].mxu1  ;;  %v3089_v55 = vmul.f32 %v5354_v12, %v3050_v31 }
 0x3b9   :  { %v3699_v53 = vadd.f32 %v3698_v57, %v3697_v48  ;;  %v3700_v3 = vpop.f32.mrb[134].mxu1  ;;  %v3051_v6 = vsel %vm2987_vm5, %v2911_v21, %v3019_v2 }
 0x3ba   :  { %v3701_v0 = vpop.f32.mrb[135].mxu1  ;;  %3137 = vadd.xlane.f32.xlu0 %v3089_v55  ;;  %v3090_v8 = vmul.f32 %v5354_v12, %v3051_v6 }
 0x3bb   :  { %v2916_v10 = vadd.f32 %v3699_v53, %v5347_v7  ;;  %v3702_v9 = vadd.f32 %v3701_v0, %v3700_v3 }
 0x3bc   :  { %3139 = vadd.xlane.f32.xlu1 %v3090_v8 }
 0x3bd   :  { %v2919_v30 = vadd.f32 %v3702_v9, %v5347_v7  ;;  %vm2988_vm6 = vcmp.gt.f32.partialorder %v2916_v10, 0.0  ;;  %v3020_v60 = vmul.f32 0.2, %v2916_v10 }
 0x3bf   :  { %v3703_v41 = vpop.f32.mrb[136].mxu1  ;;  %v3052_v11 = vsel %vm2988_vm6, %v2916_v10, %v3020_v60  ;;  %vm2989_vm7 = vcmp.gt.f32.partialorder %v2919_v30, 0.0  ;;  %v3021_v43 = vmul.f32 0.2, %v2919_v30 }
 0x3c0   :  { %v3704_v17 = vpop.f32.mrb[137].mxu1  ;;  %v3091_v62 = vmul.f32 %v5354_v12, %v3052_v11 }
 0x3c1   :  { %v3705_v58 = vadd.f32 %v3704_v17, %v3703_v41  ;;  %v3706_v33 = vpop.f32.mrb[138].mxu1  ;;  %v3053_v14 = vsel %vm2989_vm7, %v2919_v30, %v3021_v43 }
 0x3c2   :  { %v3707_v44 = vpop.f32.mrb[139].mxu1  ;;  %3141 = vadd.xlane.f32.xlu0 %v3091_v62  ;;  %v3092_v34 = vmul.f32 %v5354_v12, %v3053_v14 }
 0x3c3   :  { %v2924_v54 = vadd.f32 %v3705_v58, %v5347_v7  ;;  %v3708_v45 = vadd.f32 %v3707_v44, %v3706_v33 }
 0x3c4   :  { %3143 = vadd.xlane.f32.xlu1 %v3092_v34 }
 0x3c5   :  { %v2927_v15 = vadd.f32 %v3708_v45, %v5347_v7  ;;  %vm2990_vm2 = vcmp.gt.f32.partialorder %v2924_v54, 0.0  ;;  %v3022_v32 = vmul.f32 0.2, %v2924_v54 }
 0x3c7   :  { %v3709_v36 = vpop.f32.mrb[140].mxu1  ;;  %v3054_v27 = vsel %vm2990_vm2, %v2924_v54, %v3022_v32  ;;  %vm2991_vm8 = vcmp.gt.f32.partialorder %v2927_v15, 0.0  ;;  %v3023_v16 = vmul.f32 0.2, %v2927_v15 }
 0x3c8   :  { %v3710_v61 = vpop.f32.mrb[141].mxu1  ;;  %v3093_v35 = vmul.f32 %v5354_v12, %v3054_v27 }
 0x3c9   :  { %v3711_v18 = vadd.f32 %v3710_v61, %v3709_v36  ;;  %v3712_v56 = vpop.f32.mrb[142].mxu1  ;;  %v3055_v52 = vsel %vm2991_vm8, %v2927_v15, %v3023_v16 }
 0x3ca   :  { %v3713_v59 = vpop.f32.mrb[143].mxu1  ;;  %3145 = vadd.xlane.f32.xlu0 %v3093_v35  ;;  %v3094_v19 = vmul.f32 %v5354_v12, %v3055_v52 }
 0x3cb   :  { %v2932_v22 = vadd.f32 %v3711_v18, %v5347_v7  ;;  %v3714_v24 = vadd.f32 %v3713_v59, %v3712_v56 }
 0x3cc   :  { %3147 = vadd.xlane.f32.xlu1 %v3094_v19 }
 0x3cd   :  { %v2935_v20 = vadd.f32 %v3714_v24, %v5347_v7  ;;  %vm2992_vm9 = vcmp.gt.f32.partialorder %v2932_v22, 0.0  ;;  %v3024_v26 = vmul.f32 0.2, %v2932_v22 }
 0x3cf   :  { %v3715_v46 = vpop.f32.mrb[144].mxu1  ;;  %v3056_v42 = vsel %vm2992_vm9, %v2932_v22, %v3024_v26  ;;  %vm2993_vm10 = vcmp.gt.f32.partialorder %v2935_v20, 0.0  ;;  %v3025_v63 = vmul.f32 0.2, %v2935_v20  ;;  %v5418_v26 = vld [vmem:[#allocation2] ss:$0 sm:$0xff] }
 0x3d0   :  { %v3716_v47 = vpop.f32.mrb[145].mxu1  ;;  %v3095_v49 = vmul.f32 %v5354_v12, %v3056_v42 }
 0x3d1   :  { %v3717_v28 = vadd.f32 %v3716_v47, %v3715_v46  ;;  %v3718_v50 = vpop.f32.mrb[146].mxu1  ;;  %v3057_v1 = vsel %vm2993_vm10, %v2935_v20, %v3025_v63 }
 0x3d2   :  { %v3719_v37 = vpop.f32.mrb[147].mxu1  ;;  %3149 = vadd.xlane.f32.xlu0 %v3095_v49  ;;  %v3096_v29 = vmul.f32 %v5354_v12, %v3057_v1 }
 0x3d3   :  { %v2940_v51 = vadd.f32 %v3717_v28, %v5347_v7  ;;  %v3720_v39 = vadd.f32 %v3719_v37, %v3718_v50 }
 0x3d4   :  { %3151 = vadd.xlane.f32.xlu1 %v3096_v29 }
 0x3d5   :  { %v2943_v23 = vadd.f32 %v3720_v39, %v5347_v7  ;;  %vm2994_vm11 = vcmp.gt.f32.partialorder %v2940_v51, 0.0  ;;  %v3026_v5 = vmul.f32 0.2, %v2940_v51 }
 0x3d7   :  { %v3721_v38 = vpop.f32.mrb[148].mxu1  ;;  %v3058_v25 = vsel %vm2994_vm11, %v2940_v51, %v3026_v5  ;;  %vm2995_vm12 = vcmp.gt.f32.partialorder %v2943_v23, 0.0  ;;  %v3027_v13 = vmul.f32 0.2, %v2943_v23 }
 0x3d8   :  { %v3722_v4 = vpop.f32.mrb[149].mxu1  ;;  %v3097_v21 = vmul.f32 %v5354_v12, %v3058_v25 }
 0x3d9   :  { %v3723_v40 = vadd.f32 %v3722_v4, %v3721_v38  ;;  %v3724_v48 = vpop.f32.mrb[150].mxu1  ;;  %v3059_v31 = vsel %vm2995_vm12, %v2943_v23, %v3027_v13 }
 0x3da   :  { %v3725_v2 = vpop.f32.mrb[151].mxu1  ;;  %3153 = vadd.xlane.f32.xlu0 %v3097_v21  ;;  %v3098_v57 = vmul.f32 %v5354_v12, %v3059_v31 }
 0x3db   :  { %v2948_v55 = vadd.f32 %v3723_v40, %v5347_v7  ;;  %v3726_v53 = vadd.f32 %v3725_v2, %v3724_v48 }
 0x3dc   :  { %3155 = vadd.xlane.f32.xlu1 %v3098_v57 }
 0x3dd   :  { %v2951_v3 = vadd.f32 %v3726_v53, %v5347_v7  ;;  %vm2996_vm13 = vcmp.gt.f32.partialorder %v2948_v55, 0.0  ;;  %v3028_v6 = vmul.f32 0.2, %v2948_v55 }
 0x3df   :  { %v3727_v0 = vpop.f32.mrb[152].mxu1  ;;  %v3060_v8 = vsel %vm2996_vm13, %v2948_v55, %v3028_v6  ;;  %vm2997_vm14 = vcmp.gt.f32.partialorder %v2951_v3, 0.0  ;;  %v3029_v10 = vmul.f32 0.2, %v2951_v3 }
 0x3e0   :  { %v3728_v9 = vpop.f32.mrb[153].mxu1  ;;  %v3099_v30 = vmul.f32 %v5354_v12, %v3060_v8 }
 0x3e1   :  { %v3729_v60 = vadd.f32 %v3728_v9, %v3727_v0  ;;  %v3730_v41 = vpop.f32.mrb[154].mxu1  ;;  %v3061_v11 = vsel %vm2997_vm14, %v2951_v3, %v3029_v10 }
 0x3e2   :  { %v3731_v43 = vpop.f32.mrb[155].mxu1  ;;  %3157 = vadd.xlane.f32.xlu0 %v3099_v30  ;;  %v3100_v17 = vmul.f32 %v5354_v12, %v3061_v11 }
 0x3e3   :  { %v2956_v62 = vadd.f32 %v3729_v60, %v5347_v7  ;;  %v3732_v58 = vadd.f32 %v3731_v43, %v3730_v41 }
 0x3e4   :  { %3159 = vadd.xlane.f32.xlu1 %v3100_v17 }
 0x3e5   :  { %v2959_v33 = vadd.f32 %v3732_v58, %v5347_v7  ;;  %vm2998_vm15 = vcmp.gt.f32.partialorder %v2956_v62, 0.0  ;;  %v3030_v14 = vmul.f32 0.2, %v2956_v62 }
 0x3e7   :  { %v3733_v44 = vpop.f32.mrb[156].mxu1  ;;  %v3062_v34 = vsel %vm2998_vm15, %v2956_v62, %v3030_v14  ;;  %vm2999_vm0 = vcmp.gt.f32.partialorder %v2959_v33, 0.0  ;;  %v3031_v54 = vmul.f32 0.2, %v2959_v33 }
 0x3e8   :  { %v3734_v45 = vpop.f32.mrb[157].mxu1  ;;  %v3101_v15 = vmul.f32 %v5354_v12, %v3062_v34 }
 0x3e9   :  { %v3735_v32 = vadd.f32 %v3734_v45, %v3733_v44  ;;  %v3736_v36 = vpop.f32.mrb[158].mxu1  ;;  %v3063_v27 = vsel %vm2999_vm0, %v2959_v33, %v3031_v54 }
 0x3ea   :  { %v3737_v16 = vpop.f32.mrb[159].mxu1  ;;  %3161 = vadd.xlane.f32.xlu0 %v3101_v15  ;;  %v3102_v61 = vmul.f32 %v5354_v12, %v3063_v27 }
 0x3eb   :  { %v2964_v35 = vadd.f32 %v3735_v32, %v5347_v7  ;;  %v3738_v18 = vadd.f32 %v3737_v16, %v3736_v36 }
 0x3ec   :  { %3163 = vadd.xlane.f32.xlu1 %v3102_v61 }
 0x3ed   :  { %v2967_v56 = vadd.f32 %v3738_v18, %v5347_v7  ;;  %vm3000_vm1 = vcmp.gt.f32.partialorder %v2964_v35, 0.0  ;;  %v3032_v52 = vmul.f32 0.2, %v2964_v35 }
 0x3ef   :  { %v3064_v59 = vsel %vm3000_vm1, %v2964_v35, %v3032_v52  ;;  %vm3001_vm3 = vcmp.gt.f32.partialorder %v2967_v56, 0.0  ;;  %v3033_v19 = vmul.f32 0.2, %v2967_v56 }
 0x3f0   :  { %v3103_v22 = vmul.f32 %v5354_v12, %v3064_v59 }
 0x3f1   :  { %v3065_v24 = vsel %vm3001_vm3, %v2967_v56, %v3033_v19 }
 0x3f2   :  { %3165 = vadd.xlane.f32.xlu0 %v3103_v22  ;;  %v3104_v20 = vmul.f32 %v5354_v12, %v3065_v24 }
 0x3f4   :  { %3167 = vadd.xlane.f32.xlu1 %v3104_v20 }
 0x407   :  { %v3106_v46 = vpop.xlane.xlu0 %3105 }
 0x408   :  { %v3176_v42 = vadd.f32 %v5418_v26, %v3106_v46 }
 0x40a   :  { %v3595_v63 = vmul.f32 -1.442695, %v3176_v42 }
 0x40b   :  { %v3108_v47 = vpop.xlane.xlu0 %3107 }
 0x40c   :  { %4123 = vpow2.f32 %v3595_v63  ;;  %v3177_v7 = vadd.f32 %v5418_v26, %v3108_v47 }
 0x40e   :  { %v3596_v49 = vmul.f32 -1.442695, %v3177_v7 }
 0x40f   :  { %v3110_v28 = vpop.xlane.xlu1 %3109 }
 0x410   :  { %4125 = vpow2.f32 %v3596_v49  ;;  %v3178_v50 = vadd.f32 %v5418_v26, %v3110_v28 }
 0x412   :  { %v3597_v1 = vmul.f32 -1.442695, %v3178_v50 }
 0x413   :  { %v3112_v37 = vpop.xlane.xlu1 %3111 }
 0x414   :  { %4127 = vpow2.f32 %v3597_v1  ;;  %v3179_v12 = vadd.f32 %v5418_v26, %v3112_v37 }
 0x416   :  { %v4124_v29 = vpop.eup %4123  ;;  %v3598_v51 = vmul.f32 -1.442695, %v3179_v12 }
 0x417   :  { %v3304_v39 = vadd.f32 1.0, %v4124_v29  ;;  %v3114_v23 = vpop.xlane.xlu0 %3113 }
 0x418   :  { %4129 = vpow2.f32 %v3598_v51  ;;  %v3180_v5 = vadd.f32 %v5418_v26, %v3114_v23 }
 0x419   :  { %4131 = vrcp.f32 %v3304_v39  ;;  %v3116_v38 = vpop.xlane.xlu1 %3115 }
 0x41a   :  { %v4126_v25 = vpop.eup %4125  ;;  %v3599_v13 = vmul.f32 -1.442695, %v3180_v5  ;;  %v3181_v4 = vadd.f32 %v5418_v26, %v3116_v38 }
 0x41b   :  { %v3305_v21 = vadd.f32 1.0, %v4126_v25 }
 0x41c   :  { %4133 = vpow2.f32 %v3599_v13  ;;  %v3600_v40 = vmul.f32 -1.442695, %v3181_v4 }
 0x41d   :  { %4135 = vrcp.f32 %v3305_v21 }
 0x41e   :  { %v4128_v48 = vpop.eup %4127  ;;  %4137 = vpow2.f32 %v3600_v40 }
 0x41f   :  { %v3306_v31 = vadd.f32 1.0, %v4128_v48  ;;  %v3118_v2 = vpop.xlane.xlu0 %3117 }
 0x420   :  { %v3182_v57 = vadd.f32 %v5418_v26, %v3118_v2 }
 0x421   :  { %4139 = vrcp.f32 %v3306_v31  ;;  %v3120_v55 = vpop.xlane.xlu1 %3119 }
 0x422   :  { %v4130_v53 = vpop.eup %4129  ;;  %v3601_v3 = vmul.f32 -1.442695, %v3182_v57  ;;  %v3183_v6 = vadd.f32 %v5418_v26, %v3120_v55 }
 0x423   :  { %v4132_v0 = vpop.eup %4131  ;;  %v3307_v8 = vadd.f32 1.0, %v4130_v53 }
 0x424   :  { %3401 = vst.msk [vmem:[%s5591_s11] sm:$0xff] %vm3400_vm4, %v4132_v0  ;;  %4141 = vpow2.f32 %v3601_v3  ;;  %v3602_v10 = vmul.f32 -1.442695, %v3183_v6 }
 0x425   :  { %4143 = vrcp.f32 %v3307_v8 }
 0x426   :  { %v4134_v9 = vpop.eup %4133  ;;  %4145 = vpow2.f32 %v3602_v10 }
 0x427   :  { %v4136_v30 = vpop.eup %4135  ;;  %v3308_v60 = vadd.f32 1.0, %v4134_v9  ;;  %v3122_v41 = vpop.xlane.xlu0 %3121 }
 0x428   :  { %v4138_v11 = vpop.eup %4137  ;;  %3402 = vst.msk [vmem:[%s5591_s11 + $0x8] sm:$0xff] %vm3400_vm4, %v4136_v30  ;;  %v3184_v43 = vadd.f32 %v5418_v26, %v3122_v41 }
 0x429   :  { %4147 = vrcp.f32 %v3308_v60  ;;  %v3309_v17 = vadd.f32 1.0, %v4138_v11  ;;  %v3124_v62 = vpop.xlane.xlu1 %3123 }
 0x42a   :  { %v3603_v58 = vmul.f32 -1.442695, %v3184_v43  ;;  %v3185_v33 = vadd.f32 %v5418_v26, %v3124_v62 }
 0x42b   :  { %v4140_v14 = vpop.eup %4139  ;;  %4149 = vrcp.f32 %v3309_v17 }
 0x42c   :  { %3403 = vst.msk [vmem:[%s5591_s11 + $0x10] sm:$0xff] %vm3400_vm4, %v4140_v14  ;;  %4151 = vpow2.f32 %v3603_v58  ;;  %v3604_v44 = vmul.f32 -1.442695, %v3185_v33 }
 0x42e   :  { %v4142_v34 = vpop.eup %4141  ;;  %4153 = vpow2.f32 %v3604_v44 }
 0x42f   :  { %v4144_v54 = vpop.eup %4143  ;;  %v3310_v45 = vadd.f32 1.0, %v4142_v34  ;;  %v3126_v15 = vpop.xlane.xlu0 %3125 }
 0x430   :  { %v4146_v32 = vpop.eup %4145  ;;  %3404 = vst.msk [vmem:[%s5591_s11 + $0x18] sm:$0xff] %vm3400_vm4, %v4144_v54  ;;  %v3186_v36 = vadd.f32 %v5418_v26, %v3126_v15 }
 0x431   :  { %4155 = vrcp.f32 %v3310_v45  ;;  %v3311_v27 = vadd.f32 1.0, %v4146_v32  ;;  %v3128_v16 = vpop.xlane.xlu1 %3127 }
 0x432   :  { %v3605_v61 = vmul.f32 -1.442695, %v3186_v36  ;;  %v3187_v35 = vadd.f32 %v5418_v26, %v3128_v16 }
 0x433   :  { %v4148_v18 = vpop.eup %4147  ;;  %4157 = vrcp.f32 %v3311_v27 }
 0x434   :  { %3405 = vst.msk [vmem:[%s5591_s11 + $0x20] sm:$0xff] %vm3400_vm4, %v4148_v18  ;;  %4159 = vpow2.f32 %v3605_v61  ;;  %v3606_v56 = vmul.f32 -1.442695, %v3187_v35 }
 0x435   :  { %v4150_v52 = vpop.eup %4149 }
 0x436   :  { %v4152_v59 = vpop.eup %4151  ;;  %3406 = vst.msk [vmem:[%s5591_s11 + $0x28] sm:$0xff] %vm3400_vm4, %v4150_v52  ;;  %4161 = vpow2.f32 %v3606_v56 }
 0x437   :  { %v3312_v19 = vadd.f32 1.0, %v4152_v59  ;;  %v3130_v22 = vpop.xlane.xlu0 %3129 }
 0x438   :  { %v4154_v24 = vpop.eup %4153  ;;  %v3188_v20 = vadd.f32 %v5418_v26, %v3130_v22 }
 0x439   :  { %4163 = vrcp.f32 %v3312_v19  ;;  %v3313_v46 = vadd.f32 1.0, %v4154_v24  ;;  %v3132_v42 = vpop.xlane.xlu1 %3131 }
 0x43a   :  { %v3607_v63 = vmul.f32 -1.442695, %v3188_v20  ;;  %v3189_v47 = vadd.f32 %v5418_v26, %v3132_v42 }
 0x43b   :  { %v4156_v7 = vpop.eup %4155  ;;  %4165 = vrcp.f32 %v3313_v46 }
 0x43c   :  { %3407 = vst.msk [vmem:[%s5591_s11 + $0x30] sm:$0xff] %vm3400_vm4, %v4156_v7  ;;  %4167 = vpow2.f32 %v3607_v63  ;;  %v3608_v49 = vmul.f32 -1.442695, %v3189_v47 }
 0x43d   :  { %v4158_v28 = vpop.eup %4157 }
 0x43e   :  { %v4160_v50 = vpop.eup %4159  ;;  %3408 = vst.msk [vmem:[%s5591_s11 + $0x38] sm:$0xff] %vm3400_vm4, %v4158_v28  ;;  %4169 = vpow2.f32 %v3608_v49 }
 0x43f   :  { %v3314_v1 = vadd.f32 1.0, %v4160_v50  ;;  %v3134_v37 = vpop.xlane.xlu0 %3133 }
 0x440   :  { %v4162_v12 = vpop.eup %4161  ;;  %v3190_v29 = vadd.f32 %v5418_v26, %v3134_v37 }
 0x441   :  { %4171 = vrcp.f32 %v3314_v1  ;;  %v3315_v51 = vadd.f32 1.0, %v4162_v12  ;;  %v3136_v39 = vpop.xlane.xlu1 %3135 }
 0x442   :  { %v3609_v23 = vmul.f32 -1.442695, %v3190_v29  ;;  %v3191_v5 = vadd.f32 %v5418_v26, %v3136_v39 }
 0x443   :  { %v4164_v38 = vpop.eup %4163  ;;  %4173 = vrcp.f32 %v3315_v51 }
 0x444   :  { %3409 = vst.msk [vmem:[%s5591_s11 + $0x40] sm:$0xff] %vm3400_vm4, %v4164_v38  ;;  %4175 = vpow2.f32 %v3609_v23  ;;  %v3610_v25 = vmul.f32 -1.442695, %v3191_v5 }
 0x445   :  { %v4166_v13 = vpop.eup %4165 }
 0x446   :  { %v4168_v4 = vpop.eup %4167  ;;  %3410 = vst.msk [vmem:[%s5591_s11 + $0x48] sm:$0xff] %vm3400_vm4, %v4166_v13  ;;  %4177 = vpow2.f32 %v3610_v25 }
 0x447   :  { %v3316_v21 = vadd.f32 1.0, %v4168_v4  ;;  %v3138_v40 = vpop.xlane.xlu0 %3137 }
 0x448   :  { %v4170_v48 = vpop.eup %4169  ;;  %v3192_v31 = vadd.f32 %v5418_v26, %v3138_v40 }
 0x449   :  { %4179 = vrcp.f32 %v3316_v21  ;;  %v3317_v2 = vadd.f32 1.0, %v4170_v48  ;;  %v3140_v57 = vpop.xlane.xlu1 %3139 }
 0x44a   :  { %v3611_v55 = vmul.f32 -1.442695, %v3192_v31  ;;  %v3193_v53 = vadd.f32 %v5418_v26, %v3140_v57 }
 0x44b   :  { %v4172_v3 = vpop.eup %4171  ;;  %4181 = vrcp.f32 %v3317_v2 }
 0x44c   :  { %3411 = vst.msk [vmem:[%s5591_s11 + $0x50] sm:$0xff] %vm3400_vm4, %v4172_v3  ;;  %4183 = vpow2.f32 %v3611_v55  ;;  %v3612_v6 = vmul.f32 -1.442695, %v3193_v53 }
 0x44d   :  { %v4174_v0 = vpop.eup %4173 }
 0x44e   :  { %v4176_v8 = vpop.eup %4175  ;;  %3412 = vst.msk [vmem:[%s5591_s11 + $0x58] sm:$0xff] %vm3400_vm4, %v4174_v0  ;;  %4185 = vpow2.f32 %v3612_v6 }
 0x44f   :  { %v3318_v10 = vadd.f32 1.0, %v4176_v8  ;;  %v3142_v9 = vpop.xlane.xlu0 %3141 }
 0x450   :  { %v4178_v30 = vpop.eup %4177  ;;  %v3194_v60 = vadd.f32 %v5418_v26, %v3142_v9 }
 0x451   :  { %4187 = vrcp.f32 %v3318_v10  ;;  %v3319_v41 = vadd.f32 1.0, %v4178_v30  ;;  %v3144_v11 = vpop.xlane.xlu1 %3143 }
 0x452   :  { %v3613_v43 = vmul.f32 -1.442695, %v3194_v60  ;;  %v3195_v17 = vadd.f32 %v5418_v26, %v3144_v11 }
 0x453   :  { %v4180_v62 = vpop.eup %4179  ;;  %4189 = vrcp.f32 %v3319_v41 }
 0x454   :  { %3413 = vst.msk [vmem:[%s5591_s11 + $0x60] sm:$0xff] %vm3400_vm4, %v4180_v62  ;;  %4191 = vpow2.f32 %v3613_v43  ;;  %v3614_v58 = vmul.f32 -1.442695, %v3195_v17 }
 0x455   :  { %v4182_v33 = vpop.eup %4181 }
 0x456   :  { %v4184_v14 = vpop.eup %4183  ;;  %3414 = vst.msk [vmem:[%s5591_s11 + $0x68] sm:$0xff] %vm3400_vm4, %v4182_v33  ;;  %4193 = vpow2.f32 %v3614_v58 }
 0x457   :  { %v3320_v44 = vadd.f32 1.0, %v4184_v14  ;;  %v3146_v34 = vpop.xlane.xlu0 %3145 }
 0x458   :  { %v4186_v54 = vpop.eup %4185  ;;  %v3196_v45 = vadd.f32 %v5418_v26, %v3146_v34 }
 0x459   :  { %4195 = vrcp.f32 %v3320_v44  ;;  %v3321_v15 = vadd.f32 1.0, %v4186_v54  ;;  %v3148_v32 = vpop.xlane.xlu1 %3147 }
 0x45a   :  { %v3615_v36 = vmul.f32 -1.442695, %v3196_v45  ;;  %v3197_v27 = vadd.f32 %v5418_v26, %v3148_v32 }
 0x45b   :  { %v4188_v16 = vpop.eup %4187  ;;  %4197 = vrcp.f32 %v3321_v15 }
 0x45c   :  { %3415 = vst.msk [vmem:[%s5591_s11 + $0x70] sm:$0xff] %vm3400_vm4, %v4188_v16  ;;  %4199 = vpow2.f32 %v3615_v36  ;;  %v3616_v61 = vmul.f32 -1.442695, %v3197_v27 }
 0x45d   :  { %v4190_v35 = vpop.eup %4189 }
 0x45e   :  { %v4192_v18 = vpop.eup %4191  ;;  %3416 = vst.msk [vmem:[%s5591_s11 + $0x78] sm:$0xff] %vm3400_vm4, %v4190_v35  ;;  %4201 = vpow2.f32 %v3616_v61 }
 0x45f   :  { %v3322_v56 = vadd.f32 1.0, %v4192_v18  ;;  %v3150_v52 = vpop.xlane.xlu0 %3149 }
 0x460   :  { %v4194_v59 = vpop.eup %4193  ;;  %v3198_v19 = vadd.f32 %v5418_v26, %v3150_v52 }
 0x461   :  { %4203 = vrcp.f32 %v3322_v56  ;;  %v3323_v22 = vadd.f32 1.0, %v4194_v59  ;;  %v3152_v24 = vpop.xlane.xlu1 %3151 }
 0x462   :  { %v3617_v20 = vmul.f32 -1.442695, %v3198_v19  ;;  %v3199_v46 = vadd.f32 %v5418_v26, %v3152_v24 }
 0x463   :  { %v4196_v42 = vpop.eup %4195  ;;  %4205 = vrcp.f32 %v3323_v22 }
 0x464   :  { %3417 = vst.msk [vmem:[%s5591_s11 + $0x80] sm:$0xff] %vm3400_vm4, %v4196_v42  ;;  %4207 = vpow2.f32 %v3617_v20  ;;  %v3618_v63 = vmul.f32 -1.442695, %v3199_v46 }
 0x465   :  { %v4198_v47 = vpop.eup %4197 }
 0x466   :  { %v4200_v7 = vpop.eup %4199  ;;  %3418 = vst.msk [vmem:[%s5591_s11 + $0x88] sm:$0xff] %vm3400_vm4, %v4198_v47  ;;  %4209 = vpow2.f32 %v3618_v63 }
 0x467   :  { %v3324_v49 = vadd.f32 1.0, %v4200_v7  ;;  %v3154_v28 = vpop.xlane.xlu0 %3153 }
 0x468   :  { %v4202_v50 = vpop.eup %4201  ;;  %v3200_v1 = vadd.f32 %v5418_v26, %v3154_v28 }
 0x469   :  { %4211 = vrcp.f32 %v3324_v49  ;;  %v3325_v37 = vadd.f32 1.0, %v4202_v50  ;;  %v3156_v12 = vpop.xlane.xlu1 %3155 }
 0x46a   :  { %v3619_v29 = vmul.f32 -1.442695, %v3200_v1  ;;  %v3201_v51 = vadd.f32 %v5418_v26, %v3156_v12 }
 0x46b   :  { %v4204_v39 = vpop.eup %4203  ;;  %4213 = vrcp.f32 %v3325_v37 }
 0x46c   :  { %3419 = vst.msk [vmem:[%s5591_s11 + $0x90] sm:$0xff] %vm3400_vm4, %v4204_v39  ;;  %4215 = vpow2.f32 %v3619_v29  ;;  %v3620_v23 = vmul.f32 -1.442695, %v3201_v51 }
 0x46d   :  { %v4206_v5 = vpop.eup %4205 }
 0x46e   :  { %v4208_v38 = vpop.eup %4207  ;;  %3420 = vst.msk [vmem:[%s5591_s11 + $0x98] sm:$0xff] %vm3400_vm4, %v4206_v5  ;;  %4217 = vpow2.f32 %v3620_v23 }
 0x46f   :  { %v3326_v25 = vadd.f32 1.0, %v4208_v38  ;;  %v3158_v13 = vpop.xlane.xlu0 %3157 }
 0x470   :  { %v4210_v4 = vpop.eup %4209  ;;  %v3202_v21 = vadd.f32 %v5418_v26, %v3158_v13 }
 0x471   :  { %4219 = vrcp.f32 %v3326_v25  ;;  %v3327_v40 = vadd.f32 1.0, %v4210_v4  ;;  %v3160_v48 = vpop.xlane.xlu1 %3159 }
 0x472   :  { %v3621_v31 = vmul.f32 -1.442695, %v3202_v21  ;;  %v3203_v2 = vadd.f32 %v5418_v26, %v3160_v48 }
 0x473   :  { %v4212_v57 = vpop.eup %4211  ;;  %4221 = vrcp.f32 %v3327_v40 }
 0x474   :  { %3421 = vst.msk [vmem:[%s5591_s11 + $0xa0] sm:$0xff] %vm3400_vm4, %v4212_v57  ;;  %4223 = vpow2.f32 %v3621_v31  ;;  %v3622_v55 = vmul.f32 -1.442695, %v3203_v2 }
 0x475   :  { %v4214_v53 = vpop.eup %4213 }
 0x476   :  { %v4216_v3 = vpop.eup %4215  ;;  %3422 = vst.msk [vmem:[%s5591_s11 + $0xa8] sm:$0xff] %vm3400_vm4, %v4214_v53  ;;  %4225 = vpow2.f32 %v3622_v55 }
 0x477   :  { %v3328_v6 = vadd.f32 1.0, %v4216_v3  ;;  %v3162_v0 = vpop.xlane.xlu0 %3161 }
 0x478   :  { %v4218_v8 = vpop.eup %4217  ;;  %v3204_v10 = vadd.f32 %v5418_v26, %v3162_v0 }
 0x479   :  { %4227 = vrcp.f32 %v3328_v6  ;;  %v3329_v9 = vadd.f32 1.0, %v4218_v8  ;;  %v3164_v30 = vpop.xlane.xlu1 %3163 }
 0x47a   :  { %v3623_v60 = vmul.f32 -1.442695, %v3204_v10  ;;  %v3205_v41 = vadd.f32 %v5418_v26, %v3164_v30 }
 0x47b   :  { %v4220_v11 = vpop.eup %4219  ;;  %4229 = vrcp.f32 %v3329_v9 }
 0x47c   :  { %3423 = vst.msk [vmem:[%s5591_s11 + $0xb0] sm:$0xff] %vm3400_vm4, %v4220_v11  ;;  %4231 = vpow2.f32 %v3623_v60  ;;  %v3624_v43 = vmul.f32 -1.442695, %v3205_v41 }
 0x47d   :  { %v4222_v17 = vpop.eup %4221 }
 0x47e   :  { %v4224_v62 = vpop.eup %4223  ;;  %3424 = vst.msk [vmem:[%s5591_s11 + $0xb8] sm:$0xff] %vm3400_vm4, %v4222_v17  ;;  %4233 = vpow2.f32 %v3624_v43 }
 0x47f   :  { %v3330_v58 = vadd.f32 1.0, %v4224_v62  ;;  %v3166_v33 = vpop.xlane.xlu0 %3165 }
 0x480   :  { %v4226_v14 = vpop.eup %4225  ;;  %v3206_v44 = vadd.f32 %v5418_v26, %v3166_v33 }
 0x481   :  { %4235 = vrcp.f32 %v3330_v58  ;;  %v3331_v34 = vadd.f32 1.0, %v4226_v14  ;;  %v3168_v54 = vpop.xlane.xlu1 %3167 }
 0x482   :  { %v3625_v45 = vmul.f32 -1.442695, %v3206_v44  ;;  %v3207_v15 = vadd.f32 %v5418_v26, %v3168_v54 }
 0x483   :  { %v4228_v32 = vpop.eup %4227  ;;  %4237 = vrcp.f32 %v3331_v34 }
 0x484   :  { %3425 = vst.msk [vmem:[%s5591_s11 + $0xc0] sm:$0xff] %vm3400_vm4, %v4228_v32  ;;  %4239 = vpow2.f32 %v3625_v45  ;;  %v3626_v36 = vmul.f32 -1.442695, %v3207_v15 }
 0x485   :  { %v4230_v27 = vpop.eup %4229 }
 0x486   :  { %v4232_v16 = vpop.eup %4231  ;;  %3426 = vst.msk [vmem:[%s5591_s11 + $0xc8] sm:$0xff] %vm3400_vm4, %v4230_v27  ;;  %4241 = vpow2.f32 %v3626_v36 }
 0x487   :  { %v3332_v61 = vadd.f32 1.0, %v4232_v16 }
 0x488   :  { %v4234_v35 = vpop.eup %4233 }
 0x489   :  { %4243 = vrcp.f32 %v3332_v61  ;;  %v3333_v26 = vadd.f32 1.0, %v4234_v35 }
 0x48b   :  { %v4236_v18 = vpop.eup %4235  ;;  %4245 = vrcp.f32 %v3333_v26 }
 0x48c   :  { %3427 = vst.msk [vmem:[%s5591_s11 + $0xd0] sm:$0xff] %vm3400_vm4, %v4236_v18 }
 0x48d   :  { %v4238_v56 = vpop.eup %4237 }
 0x48e   :  { %v4240_v52 = vpop.eup %4239  ;;  %3428 = vst.msk [vmem:[%s5591_s11 + $0xd8] sm:$0xff] %vm3400_vm4, %v4238_v56 }
 0x48f   :  { %v3334_v59 = vadd.f32 1.0, %v4240_v52 }
 0x490   :  { %v4242_v19 = vpop.eup %4241 }
 0x491   :  { %4247 = vrcp.f32 %v3334_v59  ;;  %v3335_v22 = vadd.f32 1.0, %v4242_v19 }
 0x493   :  { %v4244_v24 = vpop.eup %4243  ;;  %4249 = vrcp.f32 %v3335_v22 }
 0x494   :  { %3429 = vst.msk [vmem:[%s5591_s11 + $0xe0] sm:$0xff] %vm3400_vm4, %v4244_v24 }
 0x495   :  { %v4246_v20 = vpop.eup %4245 }
 0x496   :  { %3430 = vst.msk [vmem:[%s5591_s11 + $0xe8] sm:$0xff] %vm3400_vm4, %v4246_v20 }
 0x49b   :  { %v4248_v46 = vpop.eup %4247 }
 0x49c   :  { %3431 = vst.msk [vmem:[%s5591_s11 + $0xf0] sm:$0xff] %vm3400_vm4, %v4248_v46 }
 0x49d   :  { %v4250_v42 = vpop.eup %4249 }
 0x49e   :  { %3432 = vst.msk [vmem:[%s5591_s11 + $0xf8] sm:$0xff] %vm3400_vm4, %v4250_v42 }
 0x49f   :  { %3437 = vsyncpa [#allocation4], 1 }

</bundles_post_ra>
